<compile_context>
chip_gen: v7x
topology: tpu7x:2x2x1
jax: 0.10.0
libtpu: 0.0.40
codegen_flags: <defaults>
</compile_context>

<pallas_src>
import functools

import jax
import jax.numpy as jnp
from jax.experimental import pallas as pl
from jax.experimental.pallas import tpu as pltpu


# ----------------------------------------------------------------------------
# In-kernel helpers
# ----------------------------------------------------------------------------
def _layer_norm(x, gamma, beta, eps=1e-5):
    mu = jnp.mean(x, axis=-1, keepdims=True)
    var = jnp.mean(jnp.square(x - mu), axis=-1, keepdims=True)
    return (x - mu) * jax.lax.rsqrt(var + eps) * gamma + beta


# ----------------------------------------------------------------------------
# Fused encoder-stack kernel: one grid step = (one batch tile, one layer).
# The activation lives in VMEM scratch across the layer axis.
# ----------------------------------------------------------------------------
def _encoder_layer_kernel(heads,
                          x_ref, bias_ref, wqkv_ref, wo_ref, w1_ref, b1_ref,
                          w2_ref, vec_ref, o_ref, act_ref):
    layer = pl.program_id(1)
    bt, seq, embed = x_ref.shape
    hd = embed // heads
    m_rows = bt * seq

    # Load the embedding output into the resident activation on the first layer.
    @pl.when(layer == 0)
    def _():
        act_ref[...] = x_ref[...].reshape(m_rows, embed)

    x2d = act_ref[...]                                  # (M, E) f32 layer input
    x_bf = x2d.astype(jnp.bfloat16)                     # bf16 MXU operands

    # --- head-major activation: one shuffle instead of three -----------------
    # (static lane slices + stack along a new major head axis; no 4-D transpose)
    x3 = x_bf.reshape(bt, seq, embed)
    xh = jnp.stack([x3[:, :, h * hd:(h + 1) * hd] for h in range(heads)],
                   axis=1)                              # (bt, H, seq, hd)
    xh2 = xh.reshape(bt * heads * seq, hd)

    # --- per-head shared Q/K/V projections ((hd,hd) weights, no bias) --------
    # 1/sqrt(embed_size) is already folded into the Q weight (wrapper glue).
    q = jnp.dot(xh2, wqkv_ref[0, 0], preferred_element_type=jnp.float32)
    k = jnp.dot(xh2, wqkv_ref[0, 1], preferred_element_type=jnp.float32)
    v = jnp.dot(xh2, wqkv_ref[0, 2], preferred_element_type=jnp.float32)
    q3 = q.astype(jnp.bfloat16).reshape(bt * heads, seq, hd)
    k3 = k.astype(jnp.bfloat16).reshape(bt * heads, seq, hd)
    v3 = v.astype(jnp.bfloat16).reshape(bt * heads, seq, hd)

    # --- per-head batched attention (contract over hd only) ------------------
    scores = jnp.einsum('bqd,bkd->bqk', q3, k3,
                        preferred_element_type=jnp.float32)     # (B*H, S, S) f32
    bias4 = bias_ref[...].reshape(bt, 1, 1, seq)                # 0 / -1e30 keys
    scores = scores.reshape(bt, heads, seq, seq) + bias4
    smax = jnp.max(scores, axis=-1, keepdims=True)              # stats stay f32
    p = jnp.exp(scores - smax)
    denom = jnp.sum(p, axis=-1, keepdims=True)
    attn = (p * pl.reciprocal(denom, approx=True)).astype(jnp.bfloat16)
    ctx = jnp.einsum('bqk,bkd->bqd', attn.reshape(bt * heads, seq, seq), v3,
                     preferred_element_type=jnp.float32)        # (B*H, S, hd)

    # Merge heads back onto the lane (embed) dim.
    ctx4 = ctx.reshape(bt, heads, seq, hd)
    concat = jnp.concatenate([ctx4[:, h] for h in range(heads)], axis=-1)
    concat = concat.reshape(m_rows, embed)

    # --- packed per-layer vectors ---------------------------------------------
    vec = vec_ref[0]                                    # (6, E) f32
    bo, g1, be1 = vec[0:1], vec[1:2], vec[2:3]
    b2, g2, be2 = vec[3:4], vec[4:5], vec[5:6]

    # --- fc_out, residual + LayerNorm 1 ---------------------------------------
    attn_out = jnp.dot(concat.astype(jnp.bfloat16), wo_ref[0],
                       preferred_element_type=jnp.float32) + bo
    h1 = _layer_norm(attn_out + x2d, g1, be1)

    # --- feed forward, residual + LayerNorm 2 ---------------------------------
    ff = jnp.dot(h1.astype(jnp.bfloat16), w1_ref[0],
                 preferred_element_type=jnp.float32) + b1_ref[0]
    ff = jnp.maximum(ff, 0.0)                           # ReLU in f32 (VPU)
    ff = jnp.dot(ff.astype(jnp.bfloat16), w2_ref[0],
                 preferred_element_type=jnp.float32) + b2
    out = _layer_norm(ff + h1, g2, be2)

    act_ref[...] = out                                  # resident for layer+1

    @pl.when(layer == pl.num_programs(1) - 1)
    def _():
        o_ref[...] = out.reshape(bt, seq, embed).astype(o_ref.dtype)


# ----------------------------------------------------------------------------
# Wrapper: weight packing + generation-aware tiling + single pallas_call.
# ----------------------------------------------------------------------------
def _tpu_vmem_and_split():
    """Return (per-core VMEM bytes, prefer >=2 batch tiles?)."""
    try:
        vmem = int(pltpu.get_tpu_info().vmem_capacity_bytes)
    except Exception:
        vmem = 64 * 1024 * 1024                         # conservative default
    # v7x: 64 MiB / core and 2 TensorCores -> keep a 2-way "parallel" split.
    # v5e / v6e: 128 MiB, 1 TC -> one biggest tile (extra tiles are a serial
    # loop that re-fetches the whole weight stack).
    prefer_two_tiles = vmem < 100 * 1024 * 1024
    return vmem, prefer_two_tiles


def _pick_batch_tile(n, seq, embed, ffn, heads, vmem_bytes, prefer_two_tiles):
    """Largest divisor of n whose working set fits the VMEM budget.  Never
    raises and always returns a divisor of n (bt=1 is always feasible)."""
    def tile_bytes(bt):
        m = bt * seq
        act = m * embed * 4                             # resident f32 scratch
        io = 2 * (2 * m * embed * 4)                    # double-buffered in/out
        attn = 2 * bt * heads * seq * seq * 4           # scores + exp(p) f32
        ffbuf = m * ffn * 4                             # f32 FFN intermediate
        return act + io + attn + ffbuf

    budget = int(vmem_bytes * 0.45)                     # leave room for weights
    divisors = [d for d in range(1, n + 1) if n % d == 0]
    feasible = [d for d in divisors if tile_bytes(d) <= budget]
    bt = max(feasible) if feasible else 1
    if prefer_two_tiles and bt >= n and n > 1:
        bt = max(d for d in divisors if d < n)          # >=2 tiles for 2 TCs
    return bt


def _prepare_encoder_weights(params, heads, embed):
    """Stack per-layer weights on a leading layer axis; ship raw (hd,hd) QKV
    weights (no block-diag redundancy); fold 1/sqrt(E) into Q; pack the small
    per-layer vectors into (L,6,E) + (L,1,ffn); bf16 matmul weights."""
    inv_scale = 1.0 / (float(embed) ** 0.5)
    wqkv, wo, w1, b1, w2, vecs = [], [], [], [], [], []
    for p in params["layers"]:
        wqkv.append(jnp.stack([p["wq"].T * inv_scale, p["wk"].T, p["wv"].T], 0))
        wo.append(p["wo"].T)
        w1.append(p["w1"].T)
        b1.append(p["b1"][None, :])
        w2.append(p["w2"].T)
        vecs.append(jnp.stack([p["bo"], p["g1"], p["beta1"],
                               p["b2"], p["g2"], p["beta2"]], 0))
    return dict(
        wqkv=jnp.stack(wqkv).astype(jnp.bfloat16),      # (L, 3, hd, hd)
        wo=jnp.stack(wo).astype(jnp.bfloat16),          # (L, E, E)
        w1=jnp.stack(w1).astype(jnp.bfloat16),          # (L, E, ffn)
        b1=jnp.stack(b1).astype(jnp.float32),           # (L, 1, ffn)
        w2=jnp.stack(w2).astype(jnp.bfloat16),          # (L, ffn, E)
        vec=jnp.stack(vecs).astype(jnp.float32),        # (L, 6, E)
    )


def _cost_estimate(n, seq, embed, ffn, heads, hd, num_layers):
    m = n * seq
    per_layer = m * (6 * embed * hd                     # QKV projections
                     + 4 * seq * embed                  # scores + context
                     + 2 * embed * embed                # fc_out
                     + 4 * embed * ffn)                 # FFN
    flops = num_layers * per_layer
    transcendentals = num_layers * n * heads * seq * seq
    weight_bytes = num_layers * (3 * hd * hd * 2 + embed * embed * 2
                                 + 2 * embed * ffn * 2 + 6 * embed * 4 + ffn * 4)
    act_bytes = 2 * m * embed * 4 + n * seq * 4
    return pl.CostEstimate(flops=flops, transcendentals=transcendentals,
                           bytes_accessed=weight_bytes + act_bytes)


def _encoder_stack(x, bias, w, heads, num_layers):
    n, seq, embed = x.shape
    ffn = w["w1"].shape[-1]
    hd = embed // heads

    vmem_bytes, prefer_two = _tpu_vmem_and_split()
    bt = _pick_batch_tile(n, seq, embed, ffn, heads, vmem_bytes, prefer_two)
    n_tiles = n // bt
    # 96 MiB scoped limit on 128-MiB chips, 48 MiB on v7x's 64 MiB per core.
    vmem_limit = min(96 * 1024 * 1024, int(vmem_bytes * 0.75))

    kernel = functools.partial(_encoder_layer_kernel, heads)
    wmap3 = lambda b, l: (l, 0, 0)
    wmap4 = lambda b, l: (l, 0, 0, 0)

    in_specs = [
        pl.BlockSpec((bt, seq, embed), lambda b, l: (b, 0, 0)),   # activations in
        pl.BlockSpec((bt, 1, seq), lambda b, l: (b, 0, 0)),       # additive key mask
        pl.BlockSpec((1, 3, hd, hd), wmap4),                      # Wq / Wk / Wv
        pl.BlockSpec((1, embed, embed), wmap3),                   # Wo
        pl.BlockSpec((1, embed, ffn), wmap3),                     # W1
        pl.BlockSpec((1, 1, ffn), wmap3),                         # b1
        pl.BlockSpec((1, ffn, embed), wmap3),                     # W2
        pl.BlockSpec((1, 6, embed), wmap3),                       # packed vectors
    ]

    return pl.pallas_call(
        kernel,
        out_shape=jax.ShapeDtypeStruct((n, seq, embed), x.dtype),
        grid=(n_tiles, num_layers),                     # layer axis last (arbitrary)
        in_specs=in_specs,
        out_specs=pl.BlockSpec((bt, seq, embed), lambda b, l: (b, 0, 0)),
        scratch_shapes=[pltpu.VMEM((bt * seq, embed), jnp.float32)],
        compiler_params=pltpu.CompilerParams(
            dimension_semantics=("parallel", "arbitrary"),
            vmem_limit_bytes=vmem_limit),
        cost_estimate=_cost_estimate(n, seq, embed, ffn, heads, hd, num_layers),
    )(x, bias, w["wqkv"], w["wo"], w["w1"], w["b1"], w["w2"], w["vec"])


def encoder_forward(params, heads, x_tokens, mask):
    n, seq = x_tokens.shape
    embed = params["word_emb"].shape[1]
    num_layers = len(params["layers"])

    # Glue: embedding lookups (gathers), equivalent to nn.Embedding.
    word = jnp.take(params["word_emb"], x_tokens, axis=0)               # (n,seq,E)
    pos = jnp.take(params["pos_emb"], jnp.arange(seq), axis=0)[None]    # (1,seq,E)
    acts = (word + pos).astype(jnp.float32)
    # TODO(synk): nn.Dropout is stochastic-at-train-time only; identity here (eval).

    # Pad seq to a multiple of 128 so scores/softmax and stores are lane-dense;
    # padded keys are killed by the additive mask, padded query rows sliced off.
    seq_pad = ((seq + 127) // 128) * 128
    if seq_pad != seq:
        acts = jnp.pad(acts, ((0, 0), (0, seq_pad - seq), (0, 0)))
        mask = jnp.pad(mask, ((0, 0), (0, seq_pad - seq)))
    bias = jnp.where(mask > 0, 0.0, -1e30).astype(jnp.float32).reshape(n, 1, seq_pad)

    w = _prepare_encoder_weights(params, heads, embed)
    out = _encoder_stack(acts, bias, w, heads, num_layers)
    return out[:, :seq, :]


# ----------------------------------------------------------------------------
# Deterministic parameter init (shapes follow the PyTorch module)
# ----------------------------------------------------------------------------
def init_params(key, vocab, embed, num_layers, heads, forward_expansion, max_len):
    hd = embed // heads
    ffn = forward_expansion * embed
    keys = jax.random.split(key, 2 + num_layers)
    params = {
        "word_emb": 0.02 * jax.random.normal(keys[0], (vocab, embed), jnp.float32),
        "pos_emb": 0.02 * jax.random.normal(keys[1], (max_len, embed), jnp.float32),
        "layers": [],
    }
    for i in range(num_layers):
        lk = jax.random.split(keys[2 + i], 6)
        layer = {
            # SelfAttention: shared-per-head (hd x hd) Linear, no bias (PyTorch (out,in))
            "wq": 0.1 * jax.random.normal(lk[0], (hd, hd), jnp.float32),
            "wk": 0.1 * jax.random.normal(lk[1], (hd, hd), jnp.float32),
            "wv": 0.1 * jax.random.normal(lk[2], (hd, hd), jnp.float32),
            "wo": 0.1 * jax.random.normal(lk[3], (embed, embed), jnp.float32),
            "bo": jnp.zeros((embed,), jnp.float32),
            # LayerNorms
            "g1": jnp.ones((embed,), jnp.float32),
            "beta1": jnp.zeros((embed,), jnp.float32),
            "g2": jnp.ones((embed,), jnp.float32),
            "beta2": jnp.zeros((embed,), jnp.float32),
            # Feed-forward
            "w1": 0.1 * jax.random.normal(lk[4], (ffn, embed), jnp.float32),
            "b1": jnp.zeros((ffn,), jnp.float32),
            "w2": 0.1 * jax.random.normal(lk[5], (embed, ffn), jnp.float32),
            "b2": jnp.zeros((embed,), jnp.float32),
        }
        params["layers"].append(layer)
    return params


if __name__ == "__main__":
    # Module hyper-params (small, consistent with the forward pass)
    src_vocab_size, embed_size, num_layers = 50, 32, 2
    heads, forward_expansion, dropout, max_len = 4, 4, 0.0, 16
    n, seq = 2, 8

    key = jax.random.PRNGKey(0)
    kp, kx = jax.random.split(key)
    params = init_params(kp, src_vocab_size, embed_size, num_layers,
                         heads, forward_expansion, max_len)

    x_tokens = jax.random.randint(kx, (n, seq), 1, src_vocab_size, dtype=jnp.int32)
    x_tokens = x_tokens.at[1, -2:].set(0)               # pad tail of 2nd sequence
    mask = (x_tokens != 0).astype(jnp.float32)          # (n, seq): 1 keep, 0 pad

    out = encoder_forward(params, heads, x_tokens, mask)
    out = jax.block_until_ready(out)
    assert out.shape == (n, seq, embed_size) and out.dtype == jnp.float32
    assert bool(jnp.all(jnp.isfinite(out)))
    print("KERNEL_OK")
</pallas_src>

<mosaic_0001>
module attributes {stable_mosaic.version = 11 : i64} {
  func.func @_encoder_layer_kernel(%arg0: i32, %arg1: i32, %arg2: memref<1x128x32xf32, #tpu.memory_space<vmem>>, %arg3: memref<1x1x128xf32, #tpu.memory_space<vmem>>, %arg4: memref<1x3x8x8xbf16, #tpu.memory_space<vmem>>, %arg5: memref<1x32x32xbf16, #tpu.memory_space<vmem>>, %arg6: memref<1x32x128xbf16, #tpu.memory_space<vmem>>, %arg7: memref<1x1x128xf32, #tpu.memory_space<vmem>>, %arg8: memref<1x128x32xbf16, #tpu.memory_space<vmem>>, %arg9: memref<1x6x32xf32, #tpu.memory_space<vmem>>, %arg10: memref<1x128x32xf32, #tpu.memory_space<vmem>>, %arg11: memref<128x32xf32, #tpu.memory_space<vmem>>) attributes {dimension_semantics = [#tpu.dimension_semantics<parallel>, #tpu.dimension_semantics<arbitrary>], iteration_bounds = array<i64: 2, 2>, scalar_prefetch = 0 : i64, scratch_operands = 1 : i64, tpu.core_type = #tpu.core_type<tc>, window_params = [{transform_indices = @transform_0, window_bounds = array<i64: 1, 128, 32>}, {transform_indices = @transform_1, window_bounds = array<i64: 1, 1, 128>}, {transform_indices = @transform_2, window_bounds = array<i64: 1, 3, 8, 8>}, {transform_indices = @transform_3, window_bounds = array<i64: 1, 32, 32>}, {transform_indices = @transform_4, window_bounds = array<i64: 1, 32, 128>}, {transform_indices = @transform_5, window_bounds = array<i64: 1, 1, 128>}, {transform_indices = @transform_6, window_bounds = array<i64: 1, 128, 32>}, {transform_indices = @transform_7, window_bounds = array<i64: 1, 6, 32>}, {transform_indices = @transform_8, window_bounds = array<i64: 1, 128, 32>}]} {
    %c0_i32 = arith.constant 0 : i32
    %0 = arith.cmpi eq, %arg1, %c0_i32 : i32
    %1 = arith.extui %0 : i1 to i32
    %c0_i32_0 = arith.constant 0 : i32
    %2 = arith.cmpi ne, %1, %c0_i32_0 : i32
    scf.if %2 {
      %c0_53 = arith.constant 0 : index
      %c0_54 = arith.constant 0 : index
      %c0_55 = arith.constant 0 : index
      %141 = vector.load %arg2[%c0_53, %c0_54, %c0_55] : memref<1x128x32xf32, #tpu.memory_space<vmem>>, vector<1x128x32xf32>
      %142 = vector.shape_cast %141 : vector<1x128x32xf32> to vector<128x32xf32>
      %c0_56 = arith.constant 0 : index
      %c0_57 = arith.constant 0 : index
      %143 = vector.load %arg11[%c0_56, %c0_57] : memref<128x32xf32, #tpu.memory_space<vmem>>, vector<128x32xf32>
      tpu.vector_store %arg11[%c0_56, %c0_57], %142 {strides = array<i32>} : memref<128x32xf32, #tpu.memory_space<vmem>>, vector<128x32xf32>,
    } else {
    }
    %c0 = arith.constant 0 : index
    %c0_1 = arith.constant 0 : index
    %3 = vector.load %arg11[%c0, %c0_1] : memref<128x32xf32, #tpu.memory_space<vmem>>, vector<128x32xf32>
    %4 = arith.truncf %3 : vector<128x32xf32> to vector<128x32xbf16>
    %5 = vector.shape_cast %4 : vector<128x32xbf16> to vector<1x128x32xbf16>
    %6 = vector.extract_strided_slice %5 {offsets = [0, 0, 0], sizes = [1, 128, 8], strides = [1, 1, 1]} : vector<1x128x32xbf16> to vector<1x128x8xbf16>
    %7 = vector.extract_strided_slice %5 {offsets = [0, 0, 8], sizes = [1, 128, 8], strides = [1, 1, 1]} : vector<1x128x32xbf16> to vector<1x128x8xbf16>
    %8 = vector.extract_strided_slice %5 {offsets = [0, 0, 16], sizes = [1, 128, 8], strides = [1, 1, 1]} : vector<1x128x32xbf16> to vector<1x128x8xbf16>
    %9 = vector.extract_strided_slice %5 {offsets = [0, 0, 24], sizes = [1, 128, 8], strides = [1, 1, 1]} : vector<1x128x32xbf16> to vector<1x128x8xbf16>
    %10 = vector.shape_cast %6 : vector<1x128x8xbf16> to vector<1x1x128x8xbf16>
    %11 = vector.shape_cast %7 : vector<1x128x8xbf16> to vector<1x1x128x8xbf16>
    %12 = vector.shape_cast %8 : vector<1x128x8xbf16> to vector<1x1x128x8xbf16>
    %13 = vector.shape_cast %9 : vector<1x128x8xbf16> to vector<1x1x128x8xbf16>
    %14 = tpu.concatenate %10, %11, %12, %13 in 1 : vector<1x1x128x8xbf16>, vector<1x1x128x8xbf16>, vector<1x1x128x8xbf16>, vector<1x1x128x8xbf16> -> vector<1x4x128x8xbf16>
    %15 = vector.shape_cast %14 : vector<1x4x128x8xbf16> to vector<512x8xbf16>
    %c0_2 = arith.constant 0 : index
    %c0_3 = arith.constant 0 : index
    %c0_4 = arith.constant 0 : index
    %c0_5 = arith.constant 0 : index
    %16 = vector.load %arg4[%c0_2, %c0_3, %c0_4, %c0_5] : memref<1x3x8x8xbf16, #tpu.memory_space<vmem>>, vector<1x1x8x8xbf16>
    %17 = vector.shape_cast %16 : vector<1x1x8x8xbf16> to vector<8x8xbf16>
    %cst = arith.constant dense<0.000000e+00> : vector<512x8xf32>
    %18 = tpu.matmul %15, %17, %cst {dimension_numbers = #tpu.dot_dimension_numbers<[1], [0], [0], [1], [0, 0, 1, 1], [], []>} : vector<512x8xbf16>, vector<8x8xbf16>, vector<512x8xf32> -> vector<512x8xf32>
    %c0_6 = arith.constant 0 : index
    %c1 = arith.constant 1 : index
    %c0_7 = arith.constant 0 : index
    %c0_8 = arith.constant 0 : index
    %19 = vector.load %arg4[%c0_6, %c1, %c0_7, %c0_8] : memref<1x3x8x8xbf16, #tpu.memory_space<vmem>>, vector<1x1x8x8xbf16>
    %20 = vector.shape_cast %19 : vector<1x1x8x8xbf16> to vector<8x8xbf16>
    %cst_9 = arith.constant dense<0.000000e+00> : vector<512x8xf32>
    %21 = tpu.matmul %15, %20, %cst_9 {dimension_numbers = #tpu.dot_dimension_numbers<[1], [0], [0], [1], [0, 0, 1, 1], [], []>} : vector<512x8xbf16>, vector<8x8xbf16>, vector<512x8xf32> -> vector<512x8xf32>
    %c0_10 = arith.constant 0 : index
    %c2 = arith.constant 2 : index
    %c0_11 = arith.constant 0 : index
    %c0_12 = arith.constant 0 : index
    %22 = vector.load %arg4[%c0_10, %c2, %c0_11, %c0_12] : memref<1x3x8x8xbf16, #tpu.memory_space<vmem>>, vector<1x1x8x8xbf16>
    %23 = vector.shape_cast %22 : vector<1x1x8x8xbf16> to vector<8x8xbf16>
    %cst_13 = arith.constant dense<0.000000e+00> : vector<512x8xf32>
    %24 = tpu.matmul %15, %23, %cst_13 {dimension_numbers = #tpu.dot_dimension_numbers<[1], [0], [0], [1], [0, 0, 1, 1], [], []>} : vector<512x8xbf16>, vector<8x8xbf16>, vector<512x8xf32> -> vector<512x8xf32>
    %25 = arith.truncf %18 : vector<512x8xf32> to vector<512x8xbf16>
    %26 = vector.shape_cast %25 : vector<512x8xbf16> to vector<4x128x8xbf16>
    %27 = arith.truncf %21 : vector<512x8xf32> to vector<512x8xbf16>
    %28 = vector.shape_cast %27 : vector<512x8xbf16> to vector<4x128x8xbf16>
    %29 = arith.truncf %24 : vector<512x8xf32> to vector<512x8xbf16>
    %30 = vector.shape_cast %29 : vector<512x8xbf16> to vector<4x128x8xbf16>
    "tpu.trace_start"() <{level = 10 : i32, message = "bqd,bkd->bqk"}> : () -> ()
    %cst_14 = arith.constant dense<0.000000e+00> : vector<4x128x128xf32>
    %31 = tpu.matmul %26, %28, %cst_14 {dimension_numbers = #tpu.dot_dimension_numbers<[2], [2], [1], [1], [0, 0, 0, 1, 1, 1], [0], [0]>} : vector<4x128x8xbf16>, vector<4x128x8xbf16>, vector<4x128x128xf32> -> vector<4x128x128xf32>
    "tpu.trace_stop"() : () -> ()
    %c0_15 = arith.constant 0 : index
    %c0_16 = arith.constant 0 : index
    %c0_17 = arith.constant 0 : index
    %32 = vector.load %arg3[%c0_15, %c0_16, %c0_17] : memref<1x1x128xf32, #tpu.memory_space<vmem>>, vector<1x1x128xf32>
    %33 = vector.shape_cast %32 : vector<1x1x128xf32> to vector<1x1x1x128xf32>
    %34 = vector.shape_cast %31 : vector<4x128x128xf32> to vector<1x4x128x128xf32>
    %35 = vector.broadcast %33 : vector<1x1x1x128xf32> to vector<1x4x128x128xf32>
    %36 = arith.addf %34, %35 : vector<1x4x128x128xf32>
    %cst_18 = arith.constant dense<0xFF800000> : vector<1x4x128xf32>
    %37 = vector.multi_reduction <maximumf>, %36, %cst_18 [3] : vector<1x4x128x128xf32> to vector<1x4x128xf32>
    %38 = vector.shape_cast %37 : vector<1x4x128xf32> to vector<1x4x128x1xf32>
    %39 = vector.broadcast %38 : vector<1x4x128x1xf32> to vector<1x4x128x128xf32>
    %40 = arith.subf %36, %39 : vector<1x4x128x128xf32>
    %41 = math.exp %40 : vector<1x4x128x128xf32>
    %cst_19 = arith.constant dense<0.000000e+00> : vector<1x4x128xf32>
    %42 = vector.multi_reduction <add>, %41, %cst_19 [3] : vector<1x4x128x128xf32> to vector<1x4x128xf32>
    %43 = vector.shape_cast %42 : vector<1x4x128xf32> to vector<1x4x128x1xf32>
    %44 = tpu.reciprocal %43 {approx = true} : vector<1x4x128x1xf32> -> vector<1x4x128x1xf32>
    %45 = vector.broadcast %44 : vector<1x4x128x1xf32> to vector<1x4x128x128xf32>
    %46 = arith.mulf %41, %45 : vector<1x4x128x128xf32>
    %47 = arith.truncf %46 : vector<1x4x128x128xf32> to vector<1x4x128x128xbf16>
    %48 = vector.shape_cast %47 : vector<1x4x128x128xbf16> to vector<4x128x128xbf16>
    "tpu.trace_start"() <{level = 10 : i32, message = "bqk,bkd->bqd"}> : () -> ()
    %cst_20 = arith.constant dense<0.000000e+00> : vector<4x128x8xf32>
    %49 = tpu.matmul %48, %30, %cst_20 {dimension_numbers = #tpu.dot_dimension_numbers<[2], [1], [1], [2], [0, 0, 0, 1, 1, 2], [0], [0]>} : vector<4x128x128xbf16>, vector<4x128x8xbf16>, vector<4x128x8xf32> -> vector<4x128x8xf32>
    "tpu.trace_stop"() : () -> ()
    %50 = vector.shape_cast %49 : vector<4x128x8xf32> to vector<1x4x128x8xf32>
    %51 = vector.extract_strided_slice %50 {offsets = [0, 0, 0, 0], sizes = [1, 1, 128, 8], strides = [1, 1, 1, 1]} : vector<1x4x128x8xf32> to vector<1x1x128x8xf32>
    %52 = vector.shape_cast %51 : vector<1x1x128x8xf32> to vector<1x128x8xf32>
    %53 = vector.extract_strided_slice %50 {offsets = [0, 1, 0, 0], sizes = [1, 1, 128, 8], strides = [1, 1, 1, 1]} : vector<1x4x128x8xf32> to vector<1x1x128x8xf32>
    %54 = vector.shape_cast %53 : vector<1x1x128x8xf32> to vector<1x128x8xf32>
    %55 = vector.extract_strided_slice %50 {offsets = [0, 2, 0, 0], sizes = [1, 1, 128, 8], strides = [1, 1, 1, 1]} : vector<1x4x128x8xf32> to vector<1x1x128x8xf32>
    %56 = vector.shape_cast %55 : vector<1x1x128x8xf32> to vector<1x128x8xf32>
    %57 = vector.extract_strided_slice %50 {offsets = [0, 3, 0, 0], sizes = [1, 1, 128, 8], strides = [1, 1, 1, 1]} : vector<1x4x128x8xf32> to vector<1x1x128x8xf32>
    %58 = vector.shape_cast %57 : vector<1x1x128x8xf32> to vector<1x128x8xf32>
    %59 = tpu.concatenate %52, %54, %56, %58 in 2 : vector<1x128x8xf32>, vector<1x128x8xf32>, vector<1x128x8xf32>, vector<1x128x8xf32> -> vector<1x128x32xf32>
    %60 = vector.shape_cast %59 : vector<1x128x32xf32> to vector<128x32xf32>
    %c0_21 = arith.constant 0 : index
    %c0_22 = arith.constant 0 : index
    %c0_23 = arith.constant 0 : index
    %61 = vector.load %arg9[%c0_21, %c0_22, %c0_23] : memref<1x6x32xf32, #tpu.memory_space<vmem>>, vector<1x6x32xf32>
    %62 = vector.shape_cast %61 : vector<1x6x32xf32> to vector<6x32xf32>
    %63 = vector.extract_strided_slice %62 {offsets = [0, 0], sizes = [1, 32], strides = [1, 1]} : vector<6x32xf32> to vector<1x32xf32>
    %64 = vector.extract_strided_slice %62 {offsets = [1, 0], sizes = [1, 32], strides = [1, 1]} : vector<6x32xf32> to vector<1x32xf32>
    %65 = vector.extract_strided_slice %62 {offsets = [2, 0], sizes = [1, 32], strides = [1, 1]} : vector<6x32xf32> to vector<1x32xf32>
    %66 = vector.extract_strided_slice %62 {offsets = [3, 0], sizes = [1, 32], strides = [1, 1]} : vector<6x32xf32> to vector<1x32xf32>
    %67 = vector.extract_strided_slice %62 {offsets = [4, 0], sizes = [1, 32], strides = [1, 1]} : vector<6x32xf32> to vector<1x32xf32>
    %68 = vector.extract_strided_slice %62 {offsets = [5, 0], sizes = [1, 32], strides = [1, 1]} : vector<6x32xf32> to vector<1x32xf32>
    %69 = arith.truncf %60 : vector<128x32xf32> to vector<128x32xbf16>
    %c0_24 = arith.constant 0 : index
    %c0_25 = arith.constant 0 : index
    %c0_26 = arith.constant 0 : index
    %70 = vector.load %arg5[%c0_24, %c0_25, %c0_26] : memref<1x32x32xbf16, #tpu.memory_space<vmem>>, vector<1x32x32xbf16>
    %71 = vector.shape_cast %70 : vector<1x32x32xbf16> to vector<32x32xbf16>
    %cst_27 = arith.constant dense<0.000000e+00> : vector<128x32xf32>
    %72 = tpu.matmul %69, %71, %cst_27 {dimension_numbers = #tpu.dot_dimension_numbers<[1], [0], [0], [1], [0, 0, 1, 1], [], []>} : vector<128x32xbf16>, vector<32x32xbf16>, vector<128x32xf32> -> vector<128x32xf32>
    %73 = vector.broadcast %63 : vector<1x32xf32> to vector<128x32xf32>
    %74 = arith.addf %72, %73 : vector<128x32xf32>
    %75 = arith.addf %74, %3 : vector<128x32xf32>
    %cst_28 = arith.constant dense<0.000000e+00> : vector<128xf32>
    %76 = vector.multi_reduction <add>, %75, %cst_28 [1] : vector<128x32xf32> to vector<128xf32>
    %77 = vector.shape_cast %76 : vector<128xf32> to vector<128x1xf32>
    %cst_29 = arith.constant 3.200000e+01 : f32
    %78 = vector.broadcast %cst_29 : f32 to vector<128x1xf32>
    %79 = arith.divf %77, %78 : vector<128x1xf32>
    %80 = vector.broadcast %79 : vector<128x1xf32> to vector<128x32xf32>
    %81 = arith.subf %75, %80 : vector<128x32xf32>
    %82 = arith.mulf %81, %81 : vector<128x32xf32>
    %cst_30 = arith.constant dense<0.000000e+00> : vector<128xf32>
    %83 = vector.multi_reduction <add>, %82, %cst_30 [1] : vector<128x32xf32> to vector<128xf32>
    %84 = vector.shape_cast %83 : vector<128xf32> to vector<128x1xf32>
    %cst_31 = arith.constant 3.200000e+01 : f32
    %85 = vector.broadcast %cst_31 : f32 to vector<128x1xf32>
    %86 = arith.divf %84, %85 : vector<128x1xf32>
    %87 = vector.broadcast %79 : vector<128x1xf32> to vector<128x32xf32>
    %88 = arith.subf %75, %87 : vector<128x32xf32>
    %cst_32 = arith.constant 9.99999974E-6 : f32
    %89 = vector.broadcast %cst_32 : f32 to vector<128x1xf32>
    %90 = arith.addf %86, %89 : vector<128x1xf32>
    %91 = math.rsqrt %90 : vector<128x1xf32>
    %92 = vector.broadcast %91 : vector<128x1xf32> to vector<128x32xf32>
    %93 = arith.mulf %88, %92 : vector<128x32xf32>
    %94 = vector.broadcast %64 : vector<1x32xf32> to vector<128x32xf32>
    %95 = arith.mulf %93, %94 : vector<128x32xf32>
    %96 = vector.broadcast %65 : vector<1x32xf32> to vector<128x32xf32>
    %97 = arith.addf %95, %96 : vector<128x32xf32>
    %98 = arith.truncf %97 : vector<128x32xf32> to vector<128x32xbf16>
    %c0_33 = arith.constant 0 : index
    %c0_34 = arith.constant 0 : index
    %c0_35 = arith.constant 0 : index
    %99 = vector.load %arg6[%c0_33, %c0_34, %c0_35] : memref<1x32x128xbf16, #tpu.memory_space<vmem>>, vector<1x32x128xbf16>
    %100 = vector.shape_cast %99 : vector<1x32x128xbf16> to vector<32x128xbf16>
    %cst_36 = arith.constant dense<0.000000e+00> : vector<128x128xf32>
    %101 = tpu.matmul %98, %100, %cst_36 {dimension_numbers = #tpu.dot_dimension_numbers<[1], [0], [0], [1], [0, 0, 1, 1], [], []>} : vector<128x32xbf16>, vector<32x128xbf16>, vector<128x128xf32> -> vector<128x128xf32>
    %c0_37 = arith.constant 0 : index
    %c0_38 = arith.constant 0 : index
    %c0_39 = arith.constant 0 : index
    %102 = vector.load %arg7[%c0_37, %c0_38, %c0_39] : memref<1x1x128xf32, #tpu.memory_space<vmem>>, vector<1x1x128xf32>
    %103 = vector.shape_cast %102 : vector<1x1x128xf32> to vector<1x128xf32>
    %104 = vector.broadcast %103 : vector<1x128xf32> to vector<128x128xf32>
    %105 = arith.addf %101, %104 : vector<128x128xf32>
    %cst_40 = arith.constant 0.000000e+00 : f32
    %106 = vector.broadcast %cst_40 : f32 to vector<128x128xf32>
    %107 = arith.maximumf %105, %106 : vector<128x128xf32>
    %108 = arith.truncf %107 : vector<128x128xf32> to vector<128x128xbf16>
    %c0_41 = arith.constant 0 : index
    %c0_42 = arith.constant 0 : index
    %c0_43 = arith.constant 0 : index
    %109 = vector.load %arg8[%c0_41, %c0_42, %c0_43] : memref<1x128x32xbf16, #tpu.memory_space<vmem>>, vector<1x128x32xbf16>
    %110 = vector.shape_cast %109 : vector<1x128x32xbf16> to vector<128x32xbf16>
    %cst_44 = arith.constant dense<0.000000e+00> : vector<128x32xf32>
    %111 = tpu.matmul %108, %110, %cst_44 {dimension_numbers = #tpu.dot_dimension_numbers<[1], [0], [0], [1], [0, 0, 1, 1], [], []>} : vector<128x128xbf16>, vector<128x32xbf16>, vector<128x32xf32> -> vector<128x32xf32>
    %112 = vector.broadcast %66 : vector<1x32xf32> to vector<128x32xf32>
    %113 = arith.addf %111, %112 : vector<128x32xf32>
    %114 = arith.addf %113, %97 : vector<128x32xf32>
    %cst_45 = arith.constant dense<0.000000e+00> : vector<128xf32>
    %115 = vector.multi_reduction <add>, %114, %cst_45 [1] : vector<128x32xf32> to vector<128xf32>
    %116 = vector.shape_cast %115 : vector<128xf32> to vector<128x1xf32>
    %cst_46 = arith.constant 3.200000e+01 : f32
    %117 = vector.broadcast %cst_46 : f32 to vector<128x1xf32>
    %118 = arith.divf %116, %117 : vector<128x1xf32>
    %119 = vector.broadcast %118 : vector<128x1xf32> to vector<128x32xf32>
    %120 = arith.subf %114, %119 : vector<128x32xf32>
    %121 = arith.mulf %120, %120 : vector<128x32xf32>
    %cst_47 = arith.constant dense<0.000000e+00> : vector<128xf32>
    %122 = vector.multi_reduction <add>, %121, %cst_47 [1] : vector<128x32xf32> to vector<128xf32>
    %123 = vector.shape_cast %122 : vector<128xf32> to vector<128x1xf32>
    %cst_48 = arith.constant 3.200000e+01 : f32
    %124 = vector.broadcast %cst_48 : f32 to vector<128x1xf32>
    %125 = arith.divf %123, %124 : vector<128x1xf32>
    %126 = vector.broadcast %118 : vector<128x1xf32> to vector<128x32xf32>
    %127 = arith.subf %114, %126 : vector<128x32xf32>
    %cst_49 = arith.constant 9.99999974E-6 : f32
    %128 = vector.broadcast %cst_49 : f32 to vector<128x1xf32>
    %129 = arith.addf %125, %128 : vector<128x1xf32>
    %130 = math.rsqrt %129 : vector<128x1xf32>
    %131 = vector.broadcast %130 : vector<128x1xf32> to vector<128x32xf32>
    %132 = arith.mulf %127, %131 : vector<128x32xf32>
    %133 = vector.broadcast %67 : vector<1x32xf32> to vector<128x32xf32>
    %134 = arith.mulf %132, %133 : vector<128x32xf32>
    %135 = vector.broadcast %68 : vector<1x32xf32> to vector<128x32xf32>
    %136 = arith.addf %134, %135 : vector<128x32xf32>
    %c0_50 = arith.constant 0 : index
    %c0_51 = arith.constant 0 : index
    %137 = vector.load %arg11[%c0_50, %c0_51] : memref<128x32xf32, #tpu.memory_space<vmem>>, vector<128x32xf32>
    tpu.vector_store %arg11[%c0_50, %c0_51], %136 {strides = array<i32>} : memref<128x32xf32, #tpu.memory_space<vmem>>, vector<128x32xf32>,
    %c1_i32 = arith.constant 1 : i32
    %138 = arith.cmpi eq, %arg1, %c1_i32 : i32
    %139 = arith.extui %138 : i1 to i32
    %c0_i32_52 = arith.constant 0 : i32
    %140 = arith.cmpi ne, %139, %c0_i32_52 : i32
    scf.if %140 {
      %141 = vector.shape_cast %136 : vector<128x32xf32> to vector<1x128x32xf32>
      %c0_53 = arith.constant 0 : index
      %c0_54 = arith.constant 0 : index
      %c0_55 = arith.constant 0 : index
      %142 = vector.load %arg10[%c0_53, %c0_54, %c0_55] : memref<1x128x32xf32, #tpu.memory_space<vmem>>, vector<1x128x32xf32>
      tpu.vector_store %arg10[%c0_53, %c0_54, %c0_55], %141 {strides = array<i32>} : memref<1x128x32xf32, #tpu.memory_space<vmem>>, vector<1x128x32xf32>,
    } else {
    }
    return
  }
  func.func @transform_0(%arg0: i32, %arg1: i32) -> (i32, i32, i32) {
    %c0_i32 = arith.constant 0 : i32
    %c0_i32_0 = arith.constant 0 : i32
    %c0_i32_1 = arith.constant 0 : i32
    return %arg0, %c0_i32, %c0_i32_0 : i32, i32, i32
  }
  func.func @transform_1(%arg0: i32, %arg1: i32) -> (i32, i32, i32) {
    %c0_i32 = arith.constant 0 : i32
    %c0_i32_0 = arith.constant 0 : i32
    %c0_i32_1 = arith.constant 0 : i32
    return %arg0, %c0_i32, %c0_i32_0 : i32, i32, i32
  }
  func.func @transform_2(%arg0: i32, %arg1: i32) -> (i32, i32, i32, i32) {
    %c0_i32 = arith.constant 0 : i32
    %c0_i32_0 = arith.constant 0 : i32
    %c0_i32_1 = arith.constant 0 : i32
    %c0_i32_2 = arith.constant 0 : i32
    return %arg1, %c0_i32, %c0_i32_0, %c0_i32_1 : i32, i32, i32, i32
  }
  func.func @transform_3(%arg0: i32, %arg1: i32) -> (i32, i32, i32) {
    %c0_i32 = arith.constant 0 : i32
    %c0_i32_0 = arith.constant 0 : i32
    %c0_i32_1 = arith.constant 0 : i32
    return %arg1, %c0_i32, %c0_i32_0 : i32, i32, i32
  }
  func.func @transform_4(%arg0: i32, %arg1: i32) -> (i32, i32, i32) {
    %c0_i32 = arith.constant 0 : i32
    %c0_i32_0 = arith.constant 0 : i32
    %c0_i32_1 = arith.constant 0 : i32
    return %arg1, %c0_i32, %c0_i32_0 : i32, i32, i32
  }
  func.func @transform_5(%arg0: i32, %arg1: i32) -> (i32, i32, i32) {
    %c0_i32 = arith.constant 0 : i32
    %c0_i32_0 = arith.constant 0 : i32
    %c0_i32_1 = arith.constant 0 : i32
    return %arg1, %c0_i32, %c0_i32_0 : i32, i32, i32
  }
  func.func @transform_6(%arg0: i32, %arg1: i32) -> (i32, i32, i32) {
    %c0_i32 = arith.constant 0 : i32
    %c0_i32_0 = arith.constant 0 : i32
    %c0_i32_1 = arith.constant 0 : i32
    return %arg1, %c0_i32, %c0_i32_0 : i32, i32, i32
  }
  func.func @transform_7(%arg0: i32, %arg1: i32) -> (i32, i32, i32) {
    %c0_i32 = arith.constant 0 : i32
    %c0_i32_0 = arith.constant 0 : i32
    %c0_i32_1 = arith.constant 0 : i32
    return %arg1, %c0_i32, %c0_i32_0 : i32, i32, i32
  }
  func.func @transform_8(%arg0: i32, %arg1: i32) -> (i32, i32, i32) {
    %c0_i32 = arith.constant 0 : i32
    %c0_i32_0 = arith.constant 0 : i32
    %c0_i32_1 = arith.constant 0 : i32
    return %arg0, %c0_i32, %c0_i32_0 : i32, i32, i32
  }
}

</mosaic_0001>

<bundles_post_ra>
// kernel: tpu_custom_call.1
= control target key start
LH: loop header
LB: loop body
LE: loop exit
PB: predicated region body
PF: predicated region fallthrough
CT: control target
= control target key end

     0   :  { %s6346_s27 = smov 0   ;;  %s6348_s28 = smov 0   ;;  %s8707_s0 = inlined_call_operand.vmem [shape: f32[2,128,32], index: 0, kind: input, shape index: {}]   ;;  %s8708_s1 = inlined_call_operand.vmem [shape: f32[2,1,128], index: 1, kind: input, shape index: {}]   ;;  %s8709_s2 = inlined_call_operand.vmem [shape: bf16[2,3,8,8], index: 2, kind: input, shape index: {}]   ;;  %s8710_s3 = inlined_call_operand.vmem [shape: bf16[2,32,32], index: 3, kind: input, shape index: {}]   ;;  %s8711_s4 = inlined_call_operand.vmem [shape: bf16[2,32,128], index: 4, kind: input, shape index: {}]   ;;  %s8712_s5 = inlined_call_operand.vmem [shape: f32[2,1,128], index: 5, kind: input, shape index: {}]   ;;  %s8713_s6 = inlined_call_operand.vmem [shape: bf16[2,128,32], index: 6, kind: input, shape index: {}]   ;;  %s8714_s7 = inlined_call_operand.vmem [shape: f32[2,6,32], index: 7, kind: input, shape index: {}]   ;;  %s8715_s8 = inlined_call_operand.vmem [shape: f32[2,128,32], index: 8, kind: output, shape index: {}]  }
   0x1   :  { %8777 = sst [smem:[#allocation40_spill]] %s8707_s0  ;;  %s6350_s29 = smov 0  }
   0x2   :  { %s6352_s30 = smov 0   ;;  %s6354_s9 = smov 0  }
   0x3 LB: > { %8778 = sst [smem:[#allocation3_spill]] %s6285_s29  ;;  %s27_s10 = sadd.s32 1, %s6285_s29  ;;  %s6293_s9 = sphi %s6354_s9, %s18_s9   ;;  %s6289_s30 = sphi %s6352_s30, %s8936_s30   ;;  %s6285_s29 = sphi %s6350_s29, %s8935_s29   ;;  %s6281_s28 = sphi %s6348_s28, %s8934_s28   ;;  %s6277_s27 = sphi %s6346_s27, %s8933_s27  }
   0x4   : > { %8779 = sst [smem:[#allocation4_spill]] %s6289_s30  ;;  %s30_s11 = sadd.s32 1, %s6289_s30 }
   0x5   : > { %p28_p0 = scmp.ge.s32.totalorder %s27_s10, 2  ;;  %p4730_p1 = scmp.ge.s32.totalorder %s6293_s9, 1 }
   0x6   : > { %p339_p2 = scmp.lt.s32.totalorder %s6293_s9, 5 }
   0x7   : > { %s8938_s10 = smov (%p28_p0, %s27_s10), 0  ;;  %s8940_s11 = smov (!%p28_p0, %s30_s11), %s6289_s30 }
   0x8   : > { %8780 = sst [smem:[#allocation5_spill]] %s8938_s10  ;;  %p340_p3 = pnand %p4730_p1, %p339_p2 }
   0x9   : > { %p32_p4 = scmp.ge.s32.totalorder %s8940_s11, 2 }
   0xa   : > { %343 = sbr.rel (%p340_p3) target bundleno = 2782 (0xade), region = 52 }
   0xb   : > { %s8942_s11 = smov (%p32_p4, %s8940_s11), 0 }
   0xc   : > { %8781 = sst [smem:[#allocation6_spill]] %s8942_s11 }
  0x11   : > { %p403_p5 = scmp.lt.s32.totalorder %s6281_s28, 1  ;;  %p411_p6 = scmp.lt.s32.totalorder %s6277_s27, 1 }
  0x12   : > { %s8782_s0 = sld [smem:[#allocation40_spill]]  ;;  %p4743_p7 = scmp.ne.s32.totalorder %s6277_s27, 0 }
  0x13   : > { %s8944_s28 = smov (!%p403_p5, %s6281_s28), 1  ;;  %vm464_vm0 = vcmask (!%p4743_p7), 261120  }
  0x14   : > { %s6382_s12 = scalar_select %p411_p6, %s6277_s27, 1 }
  0x15   : > { %s4907_s13 = sshll.u32 %s8944_s28, 7  ;;  %447 = sbr.rel (%p4743_p7) target bundleno = 34 (0x22), region = 56 }
  0x16   : > { %s5739_s20 = smul.u32 12, %s6382_s12  ;;  %s4908_s21 = sshll.u32 %s6382_s12, 4 }
  0x17   : > { %s6408_s14 = scalar_lea.vmem %s8710_s3, %s4908_s21  ;;  %s6413_s18 = scalar_lea.vmem %s8711_s4, %s4908_s21 }
  0x18   : > { %s6392_s19 = scalar_lea.vmem %s8782_s0, %s4907_s13  ;;  %s6403_s11 = scalar_lea.vmem %s8709_s2, %s5739_s20 }
  0x19   : > { %s4910_s16 = sshll.u32 %s6382_s12, 6  ;;  %s4740_s23 = sshll.u32 %s6382_s12, 3  ;;  %v448_v0 = vld [vmem:[%s6392_s19] sm:$0xff] (!%p4743_p7)  ;;  %v449_v1 = vld [vmem:[%s6392_s19 + $0x8] sm:$0xff] (!%p4743_p7)  ;;  %v450_v2 = vld [vmem:[%s6392_s19 + $0x10] sm:$0xff] (!%p4743_p7) }
  0x1a   : > { %s6419_s22 = scalar_lea.vmem %s8713_s6, %s4910_s16  ;;  %s6425_s26 = scalar_lea.vmem %s8714_s7, %s4740_s23  ;;  %465 = vst.msk [vmem:[#allocation2] sm:$0xff] (!%p4743_p7), %vm464_vm0, %v448_v0  ;;  %466 = vst.msk [vmem:[#allocation2 + $0x8] sm:$0xff] (!%p4743_p7), %vm464_vm0, %v449_v1  ;;  %v451_v3 = vld [vmem:[%s6392_s19 + $0x18] sm:$0xff] (!%p4743_p7)  ;;  %v452_v4 = vld [vmem:[%s6392_s19 + $0x20] sm:$0xff] (!%p4743_p7) }
  0x1b   : > { %s6430_s24 = scalar_lea.vmem %s8715_s8, %s4907_s13  ;;  %467 = vst.msk [vmem:[#allocation2 + $0x10] sm:$0xff] (!%p4743_p7), %vm464_vm0, %v450_v2  ;;  %v453_v5 = vld [vmem:[%s6392_s19 + $0x28] sm:$0xff] (!%p4743_p7)  ;;  %468 = vst.msk [vmem:[#allocation2 + $0x18] sm:$0xff] (!%p4743_p7), %vm464_vm0, %v451_v3  ;;  %v454_v6 = vld [vmem:[%s6392_s19 + $0x30] sm:$0xff] (!%p4743_p7) }
  0x1c   : > { %469 = vst.msk [vmem:[#allocation2 + $0x20] sm:$0xff] %vm464_vm0, %v452_v4  ;;  %470 = vst.msk [vmem:[#allocation2 + $0x28] sm:$0xff] %vm464_vm0, %v453_v5  ;;  %v455_v7 = vld [vmem:[%s6392_s19 + $0x38] sm:$0xff]  ;;  %v456_v8 = vld [vmem:[%s6392_s19 + $0x40] sm:$0xff] }
  0x1d   : > { %471 = vst.msk [vmem:[#allocation2 + $0x30] sm:$0xff] %vm464_vm0, %v454_v6  ;;  %472 = vst.msk [vmem:[#allocation2 + $0x38] sm:$0xff] %vm464_vm0, %v455_v7  ;;  %v457_v9 = vld [vmem:[%s6392_s19 + $0x48] sm:$0xff]  ;;  %v458_v10 = vld [vmem:[%s6392_s19 + $0x50] sm:$0xff] }
  0x1e   : > { %473 = vst.msk [vmem:[#allocation2 + $0x40] sm:$0xff] %vm464_vm0, %v456_v8  ;;  %v459_v11 = vld [vmem:[%s6392_s19 + $0x58] sm:$0xff]  ;;  %474 = vst.msk [vmem:[#allocation2 + $0x48] sm:$0xff] %vm464_vm0, %v457_v9  ;;  %v460_v12 = vld [vmem:[%s6392_s19 + $0x60] sm:$0xff] }
  0x1f   : > { %475 = vst.msk [vmem:[#allocation2 + $0x50] sm:$0xff] %vm464_vm0, %v458_v10  ;;  %476 = vst.msk [vmem:[#allocation2 + $0x58] sm:$0xff] %vm464_vm0, %v459_v11  ;;  %v461_v13 = vld [vmem:[%s6392_s19 + $0x68] sm:$0xff]  ;;  %v462_v14 = vld [vmem:[%s6392_s19 + $0x70] sm:$0xff] }
  0x20   : > { %477 = vst.msk [vmem:[#allocation2 + $0x60] sm:$0xff] %vm464_vm0, %v460_v12  ;;  %478 = vst.msk [vmem:[#allocation2 + $0x68] sm:$0xff] %vm464_vm0, %v461_v13  ;;  %v463_v15 = vld [vmem:[%s6392_s19 + $0x78] sm:$0xff] }
  0x21   : > { %479 = vst.msk [vmem:[#allocation2 + $0x70] sm:$0xff] %vm464_vm0, %v462_v14  ;;  %480 = vst.msk [vmem:[#allocation2 + $0x78] sm:$0xff] %vm464_vm0, %v463_v15 }
  0x22 PF: > { %s6295_s0 = smov 104   ;;  %vm659_vm1 = vcmask 1043456   ;;  %vm562_vm2 = vcmask 64512   ;;  %v561_v34 = vld [vmem:[%s6403_s11] sm:$0xf]  ;;  %s6296_s29 = smov 120  }
  0x23   : > { %v4776_v35 = vld [vmem:[%s6403_s11 + $0x4] sm:$0xf]  ;;  %5703 = vmatprep.subr.msk.bf16.mxu0 %vm659_vm1, %v561_v34  ;;  %v661_v37 = vsel %vm659_vm1, %v561_v34, 0  ;;  %5704 = vmatprep.subr.msk.bf16.mxu1 %vm659_vm1, %v561_v34  ;;  %s6297_s13 = smov 112   ;;  %v4809_v43 = vld [vmem:[%s6403_s11 + $0x8] sm:$0xf]  ;;  %s8863_s19 = scalar_lea.vmem %s8708_s1, %s8944_s28 }
  0x24   : > { %v487_v38 = vld [vmem:[#allocation2 + $0x30] sm:$0xff]  ;;  %v488_v39 = vld [vmem:[#allocation2 + $0x38] sm:$0xff]  ;;  %5176 = vmatpush3.bf16.msra.mxu0 %v661_v37  ;;  %5702 = vmatpush3.bf16.msra.mxu1 %v661_v37  ;;  %v1249_v44 = vsel %vm659_vm1, %v4809_v43, 0  ;;  %v955_v47 = vsel %vm659_vm1, %v4776_v35, 0  ;;  %s6298_s28 = smov 8   ;;  %s6299_s21 = smov 16  }
  0x25   : > { %v489_v16 = vld [vmem:[#allocation2 + $0x40] sm:$0xff]  ;;  %v490_v17 = vld [vmem:[#allocation2 + $0x48] sm:$0xff]  ;;  %5705 = vmatprep.subr.msk.bf16.mxu1 %vm659_vm1, %v4776_v35  ;;  %v6501_v42 = vpack.c.bf16 %v488_v39, %v487_v38  ;;  %5706 = vmatprep.subr.msk.bf16.mxu0 %vm659_vm1, %v4809_v43  ;;  %s6300_s15 = smov 24   ;;  %vm3491_vm3 = vcmask 130048   ;;  %vm3508_vm4 = vcmask 195584   ;;  %vm3554_vm5 = vcmask 261120  }
  0x26   : > { %v6465_v19 = vpack.c.bf16 %v490_v17, %v489_v16  ;;  %v491_v21 = vld [vmem:[#allocation2 + $0x50] sm:$0xff]  ;;  %v492_v22 = vld [vmem:[#allocation2 + $0x58] sm:$0xff]  ;;  %p4904_p8 = scmp.ne.s32.totalorder %s6277_s27, 1 }
  0x27   : > { %v493_v18 = vld [vmem:[#allocation2 + $0x60] sm:$0xff]  ;;  %v494_v20 = vld [vmem:[#allocation2 + $0x68] sm:$0xff]  ;;  %v6471_v27 = vpack.c.bf16 %v492_v22, %v491_v21 }
  0x28   : > { %v6467_v23 = vpack.c.bf16 %v494_v20, %v493_v18  ;;  %v495_v24 = vld [vmem:[#allocation2 + $0x70] sm:$0xff]  ;;  %v496_v25 = vld [vmem:[#allocation2 + $0x78] sm:$0xff]  ;;  %v481_v26 = vld [vmem:[#allocation2] sm:$0xff]  ;;  %553 = vrot.lane.b32.xlu0 %v6465_v19, %s6295_s0 }
  0x29   : > { %v482_v28 = vld [vmem:[#allocation2 + $0x8] sm:$0xff]  ;;  %v6475_v29 = vpack.c.bf16 %v496_v25, %v495_v24  ;;  %v483_v31 = vld [vmem:[#allocation2 + $0x10] sm:$0xff]  ;;  %v484_v32 = vld [vmem:[#allocation2 + $0x18] sm:$0xff] }
  0x2a   : > { %557 = vrot.lane.b32.xlu1 %v6467_v23, %s6295_s0  ;;  %v6477_v30 = vpack.c.bf16 %v482_v28, %v481_v26  ;;  %v485_v33 = vld [vmem:[#allocation2 + $0x20] sm:$0xff]  ;;  %v486_v36 = vld [vmem:[#allocation2 + $0x28] sm:$0xff]  ;;  %v6489_v40 = vpack.c.bf16 %v484_v32, %v483_v31 }
  0x2b   : > { %v6492_v41 = vpack.c.bf16 %v486_v36, %v485_v33 }
  0x2c   : > { %5177 = vmatprep.mubr.msk.bf16.mxu0 %vm562_vm2, %v6477_v30  ;;  %555 = vrot.lane.b32.xlu0 %v6471_v27, %s6295_s0 }
  0x2d   : > { %5178 = vmatmul.mubr.msk.bf16.vlgmr.msra.gmra.mrb[0].mxu0 %vm562_vm2, %v6489_v40 }
  0x2e   : > { %559 = vrot.lane.b32.xlu1 %v6475_v29, %s6295_s0  ;;  %5181 = vmatprep.mubr.msk.bf16.mxu0 %vm562_vm2, %v6492_v41 }
  0x2f   : > { %5308 = vmatpush3.bf16.msra.mxu0 %v1249_v44 }
  0x30   : > { %513 = vrot.lane.b32.xlu0 %v6477_v30, %s6296_s29 }
  0x32   : > { %515 = vrot.lane.b32.xlu1 %v6489_v40, %s6296_s29 }
  0x34   : > { %517 = vrot.lane.b32.xlu0 %v6492_v41, %s6296_s29 }
  0x35   : > { %5182 = vmatmul.mubr.msk.bf16.gmra.mrb[4].mxu0 %vm562_vm2, %v6501_v42 }
  0x36   : > { %519 = vrot.lane.b32.xlu1 %v6501_v42, %s6296_s29  ;;  %5185 = vmatprep.mubr.msk.bf16.mxu0 %vm562_vm2, %v6465_v19 }
  0x38   : > { %521 = vrot.lane.b32.xlu0 %v6465_v19, %s6296_s29 }
  0x3a   : > { %523 = vrot.lane.b32.xlu1 %v6471_v27, %s6296_s29 }
  0x3c   : > { %525 = vrot.lane.b32.xlu0 %v6467_v23, %s6296_s29 }
  0x3d   : > { %5186 = vmatmul.mubr.msk.bf16.gmra.mrb[8].mxu0 %vm562_vm2, %v6471_v27 }
  0x3e   : > { %527 = vrot.lane.b32.xlu1 %v6475_v29, %s6296_s29  ;;  %5189 = vmatprep.mubr.msk.bf16.mxu0 %vm562_vm2, %v6467_v23 }
  0x40   : > { %529 = vrot.lane.b32.xlu0 %v6477_v30, %s6297_s13 }
  0x42   : > { %531 = vrot.lane.b32.xlu1 %v6489_v40, %s6297_s13 }
  0x44   : > { %533 = vrot.lane.b32.xlu0 %v6492_v41, %s6297_s13 }
  0x45   : > { %5190 = vmatmul.mubr.msk.bf16.gmra.mrb[12].mxu0 %vm562_vm2, %v6475_v29 }
  0x46   : > { %535 = vrot.lane.b32.xlu1 %v6501_v42, %s6297_s13 }
  0x48   : > { %537 = vrot.lane.b32.xlu0 %v6465_v19, %s6297_s13 }
  0x4a   : > { %539 = vrot.lane.b32.xlu1 %v6471_v27, %s6297_s13 }
  0x4c   : > { %541 = vrot.lane.b32.xlu0 %v6467_v23, %s6297_s13 }
  0x4e   : > { %543 = vrot.lane.b32.xlu1 %v6475_v29, %s6297_s13 }
  0x50   : > { %545 = vrot.lane.b32.xlu0 %v6477_v30, %s6295_s0 }
  0x52   : > { %547 = vrot.lane.b32.xlu1 %v6489_v40, %s6295_s0 }
  0x54   : > { %549 = vrot.lane.b32.xlu0 %v6492_v41, %s6295_s0 }
  0x56   : > { %551 = vrot.lane.b32.xlu1 %v6501_v42, %s6295_s0 }
  0x9a   : > { %v6538_v45 = vpop.permute.xlu0 %553 }
  0x9b   : > { %5233 = vmatprep.mubr.msk.bf16.mxu1 %vm562_vm2, %v6538_v45 }
  0x9c   : > { %v6540_v46 = vpop.permute.xlu1 %557 }
  0x9e   : > { %v6545_v48 = vpop.permute.xlu0 %555 }
  0x9f   : > { %5234 = vmatmul.mubr.msk.bf16.vlgmr.msra.gmra.mrb[0].mxu1 %vm562_vm2, %v6545_v48 }
  0xa0   : > { %v6547_v49 = vpop.permute.xlu1 %559  ;;  %5237 = vmatprep.mubr.msk.bf16.mxu1 %vm562_vm2, %v6540_v46  ;;  %5242 = vmatpush3.bf16.msra.mxu1 %v955_v47 }
  0xa2   : > { %v6553_v50 = vpop.permute.xlu0 %513 }
  0xa3   : > { %5193 = vmatprep.mubr.msk.bf16.mxu0 %vm562_vm2, %v6553_v50 }
  0xa4   : > { %v6555_v51 = vpop.permute.xlu1 %515 }
  0xa5   : > { %5194 = vmatmul.mubr.msk.bf16.gmra.mrb[16].mxu0 %vm562_vm2, %v6555_v51 }
  0xa6   : > { %v6561_v52 = vpop.permute.xlu0 %517 }
  0xa7   : > { %5238 = vmatmul.mubr.msk.bf16.gmra.mrb[4].mxu1 %vm562_vm2, %v6547_v49  ;;  %5197 = vmatprep.mubr.msk.bf16.mxu0 %vm562_vm2, %v6561_v52 }
  0xa8   : > { %5243 = vmatprep.mubr.msk.bf16.mxu1 %vm562_vm2, %v6477_v30  ;;  %v6569_v53 = vpop.permute.xlu1 %519 }
  0xaa   : > { %v6571_v54 = vpop.permute.xlu0 %521 }
  0xac   : > { %v6581_v55 = vpop.permute.xlu1 %523 }
  0xad   : > { %5198 = vmatmul.mubr.msk.bf16.gmra.mrb[20].mxu0 %vm562_vm2, %v6569_v53 }
  0xae   : > { %5201 = vmatprep.mubr.msk.bf16.mxu0 %vm562_vm2, %v6571_v54  ;;  %v6583_v56 = vpop.permute.xlu0 %525 }
  0xaf   : > { %5244 = vmatmul.mubr.msk.bf16.vlgmr.msra.gmra.mrb[8].mxu1 %vm562_vm2, %v6489_v40 }
  0xb0   : > { %5247 = vmatprep.mubr.msk.bf16.mxu1 %vm562_vm2, %v6492_v41  ;;  %v6593_v57 = vpop.permute.xlu1 %527 }
  0xb2   : > { %v6595_v58 = vpop.permute.xlu0 %529 }
  0xb4   : > { %v6605_v59 = vpop.permute.xlu1 %531 }
  0xb5   : > { %5202 = vmatmul.mubr.msk.bf16.gmra.mrb[24].mxu0 %vm562_vm2, %v6581_v55 }
  0xb6   : > { %5205 = vmatprep.mubr.msk.bf16.mxu0 %vm562_vm2, %v6583_v56  ;;  %v6607_v60 = vpop.permute.xlu0 %533 }
  0xb7   : > { %5248 = vmatmul.mubr.msk.bf16.gmra.mrb[12].mxu1 %vm562_vm2, %v6501_v42 }
  0xb8   : > { %5251 = vmatprep.mubr.msk.bf16.mxu1 %vm562_vm2, %v6465_v19  ;;  %v6617_v61 = vpop.permute.xlu1 %535 }
  0xba   : > { %v6619_v62 = vpop.permute.xlu0 %537 }
  0xbc   : > { %v6629_v63 = vpop.permute.xlu1 %539 }
  0xbd   : > { %5206 = vmatmul.mubr.msk.bf16.gmra.mrb[28].mxu0 %vm562_vm2, %v6593_v57 }
  0xbe   : > { %5209 = vmatprep.mubr.msk.bf16.mxu0 %vm562_vm2, %v6595_v58  ;;  %v6631_v0 = vpop.permute.xlu0 %541 }
  0xbf   : > { %5252 = vmatmul.mubr.msk.bf16.gmra.mrb[16].mxu1 %vm562_vm2, %v6471_v27 }
  0xc0   : > { %5255 = vmatprep.mubr.msk.bf16.mxu1 %vm562_vm2, %v6467_v23  ;;  %v6641_v1 = vpop.permute.xlu1 %543 }
  0xc2   : > { %v6643_v2 = vpop.permute.xlu0 %545 }
  0xc4   : > { %v6653_v3 = vpop.permute.xlu1 %547 }
  0xc5   : > { %5210 = vmatmul.mubr.msk.bf16.gmra.mrb[32].mxu0 %vm562_vm2, %v6605_v59 }
  0xc6   : > { %5213 = vmatprep.mubr.msk.bf16.mxu0 %vm562_vm2, %v6607_v60  ;;  %v6655_v4 = vpop.permute.xlu0 %549 }
  0xc7   : > { %5256 = vmatmul.mubr.msk.bf16.gmra.mrb[20].mxu1 %vm562_vm2, %v6475_v29 }
  0xc8   : > { %5259 = vmatprep.mubr.msk.bf16.mxu1 %vm562_vm2, %v6553_v50  ;;  %v6665_v5 = vpop.permute.xlu1 %551 }
  0xcd   : > { %5214 = vmatmul.mubr.msk.bf16.gmra.mrb[36].mxu0 %vm562_vm2, %v6617_v61 }
  0xce   : > { %5217 = vmatprep.mubr.msk.bf16.mxu0 %vm562_vm2, %v6619_v62 }
  0xcf   : > { %5260 = vmatmul.mubr.msk.bf16.gmra.mrb[24].mxu1 %vm562_vm2, %v6555_v51 }
  0xd0   : > { %5263 = vmatprep.mubr.msk.bf16.mxu1 %vm562_vm2, %v6561_v52 }
  0xd5   : > { %5218 = vmatmul.mubr.msk.bf16.gmra.mrb[40].mxu0 %vm562_vm2, %v6629_v63 }
  0xd6   : > { %5221 = vmatprep.mubr.msk.bf16.mxu0 %vm562_vm2, %v6631_v0 }
  0xd7   : > { %5264 = vmatmul.mubr.msk.bf16.gmra.mrb[28].mxu1 %vm562_vm2, %v6569_v53 }
  0xd8   : > { %5267 = vmatprep.mubr.msk.bf16.mxu1 %vm562_vm2, %v6571_v54 }
  0xdd   : > { %5222 = vmatmul.mubr.msk.bf16.gmra.mrb[44].mxu0 %vm562_vm2, %v6641_v1 }
  0xde   : > { %5225 = vmatprep.mubr.msk.bf16.mxu0 %vm562_vm2, %v6643_v2 }
  0xdf   : > { %5268 = vmatmul.mubr.msk.bf16.gmra.mrb[32].mxu1 %vm562_vm2, %v6581_v55 }
  0xe0   : > { %5271 = vmatprep.mubr.msk.bf16.mxu1 %vm562_vm2, %v6583_v56 }
  0xe5   : > { %5226 = vmatmul.mubr.msk.bf16.gmra.mrb[48].mxu0 %vm562_vm2, %v6653_v3 }
  0xe6   : > { %5229 = vmatprep.mubr.msk.bf16.mxu0 %vm562_vm2, %v6655_v4 }
  0xe7   : > { %5272 = vmatmul.mubr.msk.bf16.gmra.mrb[36].mxu1 %vm562_vm2, %v6593_v57 }
  0xe8   : > { %5275 = vmatprep.mubr.msk.bf16.mxu1 %vm562_vm2, %v6595_v58 }
  0xed   : > { %5230 = vmatmul.mubr.msk.bf16.gmra.mrb[52].mxu0 %vm562_vm2, %v6665_v5 }
  0xee   : > { %5309 = vmatprep.mubr.msk.bf16.mxu0 %vm562_vm2, %v6477_v30 }
  0xef   : > { %5276 = vmatmul.mubr.msk.bf16.gmra.mrb[40].mxu1 %vm562_vm2, %v6605_v59 }
  0xf0   : > { %5279 = vmatprep.mubr.msk.bf16.mxu1 %vm562_vm2, %v6607_v60 }
  0xf5   : > { %5310 = vmatmul.mubr.msk.bf16.vlgmr.msra.gmra.mrb[56].mxu0 %vm562_vm2, %v6489_v40 }
  0xf6   : > { %5313 = vmatprep.mubr.msk.bf16.mxu0 %vm562_vm2, %v6492_v41 }
  0xf7   : > { %5280 = vmatmul.mubr.msk.bf16.gmra.mrb[44].mxu1 %vm562_vm2, %v6617_v61 }
  0xf8   : > { %5283 = vmatprep.mubr.msk.bf16.mxu1 %vm562_vm2, %v6619_v62 }
  0xfd   : > { %5314 = vmatmul.mubr.msk.bf16.gmra.mrb[60].mxu0 %vm562_vm2, %v6501_v42 }
  0xfe   : > { %5317 = vmatprep.mubr.msk.bf16.mxu0 %vm562_vm2, %v6465_v19 }
  0xff   : > { %5284 = vmatmul.mubr.msk.bf16.gmra.mrb[48].mxu1 %vm562_vm2, %v6629_v63 }
 0x100   : > { %5287 = vmatprep.mubr.msk.bf16.mxu1 %vm562_vm2, %v6631_v0  ;;  %v6707_v6 = vpop.f32.mrb[0].mxu0 }
 0x101   : > { %v697_v7 = vpop.f32.mrb[1].mxu0 }
 0x102   : > { %v6709_v8 = vpop.f32.mrb[2].mxu0 }
 0x103   : > { %v700_v10 = vpop.f32.mrb[3].mxu0 }
 0x104   : > { %v1540_v11 = vpack.c.bf16 %v700_v10, %v697_v7 }
 0x105   : > { %5318 = vmatmul.mubr.msk.bf16.gmra.mrb[64].mxu0 %vm562_vm2, %v6471_v27 }
 0x106   : > { %5321 = vmatprep.mubr.msk.bf16.mxu0 %vm562_vm2, %v6467_v23 }
 0x107   : > { %5288 = vmatmul.mubr.msk.bf16.gmra.mrb[52].mxu1 %vm562_vm2, %v6641_v1 }
 0x108   : > { %5291 = vmatprep.mubr.msk.bf16.mxu1 %vm562_vm2, %v6643_v2  ;;  %v6719_v12 = vpop.f32.mrb[4].mxu0 }
 0x109   : > { %v6723_v13 = vpop.f32.mrb[5].mxu0 }
 0x10a   : > { %v6725_v14 = vpop.f32.mrb[6].mxu0 }
 0x10b   : > { %v6729_v16 = vpop.f32.mrb[7].mxu0 }
 0x10d   : > { %5322 = vmatmul.mubr.msk.bf16.gmra.mrb[68].mxu0 %vm562_vm2, %v6475_v29 }
 0x10e   : > { %5325 = vmatprep.mubr.msk.bf16.mxu0 %vm562_vm2, %v6553_v50 }
 0x10f   : > { %5292 = vmatmul.mubr.msk.bf16.gmra.mrb[56].mxu1 %vm562_vm2, %v6653_v3 }
 0x110   : > { %5295 = vmatprep.mubr.msk.bf16.mxu1 %vm562_vm2, %v6655_v4  ;;  %v6733_v18 = vpop.f32.mrb[8].mxu0 }
 0x111   : > { %v6737_v19 = vpop.f32.mrb[9].mxu0 }
 0x112   : > { %v6741_v20 = vpop.f32.mrb[10].mxu0 }
 0x113   : > { %v6745_v22 = vpop.f32.mrb[11].mxu0 }
 0x115   : > { %5326 = vmatmul.mubr.msk.bf16.gmra.mrb[72].mxu0 %vm562_vm2, %v6555_v51 }
 0x116   : > { %5329 = vmatprep.mubr.msk.bf16.mxu0 %vm562_vm2, %v6561_v52 }
 0x117   : > { %5296 = vmatmul.mubr.msk.bf16.gmra.mrb[60].mxu1 %vm562_vm2, %v6665_v5 }
 0x118   : > { %5299 = vmatprep.mubr.msk.bf16.mxu1 %vm562_vm2, %v6538_v45  ;;  %v6751_v24 = vpop.f32.mrb[12].mxu0 }
 0x119   : > { %v6755_v25 = vpop.f32.mrb[13].mxu0 }
 0x11a   : > { %v6757_v26 = vpop.f32.mrb[14].mxu0 }
 0x11b   : > { %v6761_v28 = vpop.f32.mrb[15].mxu0 }
 0x11d   : > { %5330 = vmatmul.mubr.msk.bf16.gmra.mrb[76].mxu0 %vm562_vm2, %v6569_v53 }
 0x11e   : > { %5333 = vmatprep.mubr.msk.bf16.mxu0 %vm562_vm2, %v6571_v54 }
 0x11f   : > { %5300 = vmatmul.mubr.msk.bf16.gmra.mrb[64].mxu1 %vm562_vm2, %v6545_v48 }
 0x120   : > { %5303 = vmatprep.mubr.msk.bf16.mxu1 %vm562_vm2, %v6540_v46 }
 0x125   : > { %5334 = vmatmul.mubr.msk.bf16.gmra.mrb[80].mxu0 %vm562_vm2, %v6581_v55 }
 0x126   : > { %5337 = vmatprep.mubr.msk.bf16.mxu0 %vm562_vm2, %v6583_v56 }
 0x127   : > { %5304 = vmatmul.mubr.msk.bf16.gmra.mrb[68].mxu1 %vm562_vm2, %v6547_v49 }
 0x128   : > { %5389 = vmatprep.mubr.msk.bf16.mxu1 %vm562_vm2, %v1540_v11 }
 0x12d   : > { %5338 = vmatmul.mubr.msk.bf16.gmra.mrb[84].mxu0 %vm562_vm2, %v6593_v57 }
 0x12e   : > { %5341 = vmatprep.mubr.msk.bf16.mxu0 %vm562_vm2, %v6595_v58 }
 0x135   : > { %5342 = vmatmul.mubr.msk.bf16.gmra.mrb[88].mxu0 %vm562_vm2, %v6605_v59 }
 0x136   : > { %5345 = vmatprep.mubr.msk.bf16.mxu0 %vm562_vm2, %v6607_v60 }
 0x13d   : > { %5346 = vmatmul.mubr.msk.bf16.gmra.mrb[92].mxu0 %vm562_vm2, %v6617_v61 }
 0x13e   : > { %5349 = vmatprep.mubr.msk.bf16.mxu0 %vm562_vm2, %v6619_v62 }
 0x145   : > { %5350 = vmatmul.mubr.msk.bf16.gmra.mrb[96].mxu0 %vm562_vm2, %v6629_v63 }
 0x146   : > { %5353 = vmatprep.mubr.msk.bf16.mxu0 %vm562_vm2, %v6631_v0 }
 0x14d   : > { %5354 = vmatmul.mubr.msk.bf16.gmra.mrb[100].mxu0 %vm562_vm2, %v6641_v1 }
 0x14e   : > { %5357 = vmatprep.mubr.msk.bf16.mxu0 %vm562_vm2, %v6643_v2 }
 0x155   : > { %5358 = vmatmul.mubr.msk.bf16.gmra.mrb[104].mxu0 %vm562_vm2, %v6653_v3 }
 0x156   : > { %5361 = vmatprep.mubr.msk.bf16.mxu0 %vm562_vm2, %v6655_v4 }
 0x15d   : > { %5362 = vmatmul.mubr.msk.bf16.gmra.mrb[108].mxu0 %vm562_vm2, %v6665_v5 }
 0x15e   : > { %5365 = vmatprep.mubr.msk.bf16.mxu0 %vm562_vm2, %v6538_v45 }
 0x165   : > { %5366 = vmatmul.mubr.msk.bf16.gmra.mrb[112].mxu0 %vm562_vm2, %v6545_v48 }
 0x166   : > { %5369 = vmatprep.mubr.msk.bf16.mxu0 %vm562_vm2, %v6540_v46 }
 0x16d   : > { %5370 = vmatmul.mubr.msk.bf16.gmra.mrb[116].mxu0 %vm562_vm2, %v6547_v49 }
 0x172   : > { %v6806_v30 = vpop.f32.mrb[0].mxu1 }
 0x173   : > { %8783 = vst [vmem:[#allocation7_spill] sm:$0xff] %v6806_v30  ;;  %v6808_v31 = vpop.f32.mrb[1].mxu1 }
 0x174   : > { %8784 = vst [vmem:[#allocation8_spill] sm:$0xff] %v6808_v31  ;;  %v6810_v32 = vpop.f32.mrb[2].mxu1 }
 0x175   : > { %8785 = vst [vmem:[#allocation9_spill] sm:$0xff] %v6810_v32  ;;  %v6814_v34 = vpop.f32.mrb[3].mxu1 }
 0x176   : > { %8786 = vst [vmem:[#allocation10_spill] sm:$0xff] %v6814_v34 }
 0x178   : > { %v6818_v36 = vpop.f32.mrb[16].mxu0 }
 0x179   : > { %v6820_v37 = vpop.f32.mrb[17].mxu0 }
 0x17a   : > { %v6822_v38 = vpop.f32.mrb[18].mxu0  ;;  %v6824_v39 = vpop.f32.mrb[4].mxu1 }
 0x17b   : > { %8787 = vst [vmem:[#allocation11_spill] sm:$0xff] %v6824_v39  ;;  %v6828_v41 = vpop.f32.mrb[19].mxu0  ;;  %v6830_v42 = vpop.f32.mrb[5].mxu1 }
 0x17c   : > { %8788 = vst [vmem:[#allocation12_spill] sm:$0xff] %v6830_v42  ;;  %v6834_v44 = vpop.f32.mrb[6].mxu1 }
 0x17d   : > { %8789 = vst [vmem:[#allocation13_spill] sm:$0xff] %v6834_v44  ;;  %v6838_v46 = vpop.f32.mrb[7].mxu1 }
 0x17e   : > { %8790 = vst [vmem:[#allocation14_spill] sm:$0xff] %v6838_v46 }
 0x180   : > { %v6842_v48 = vpop.f32.mrb[20].mxu0 }
 0x181   : > { %v6844_v49 = vpop.f32.mrb[21].mxu0 }
 0x182   : > { %v6846_v50 = vpop.f32.mrb[22].mxu0  ;;  %v5245_v51 = vpop.f32.mrb[8].mxu1 }
 0x183   : > { %v6850_v53 = vpop.f32.mrb[23].mxu0  ;;  %v991_v54 = vpop.f32.mrb[9].mxu1 }
 0x184   : > { %v5246_v56 = vpop.f32.mrb[10].mxu1 }
 0x185   : > { %v1573_v57 = vpack.c.bf16 %v5246_v56, %v5245_v51  ;;  %v994_v58 = vpop.f32.mrb[11].mxu1 }
 0x186   : > { %v1572_v59 = vpack.c.bf16 %v994_v58, %v991_v54 }
 0x187   : > { %v1664_v54 = vsel %vm562_vm2, %v1573_v57, 0 }
 0x188   : > { %v6854_v60 = vpop.f32.mrb[24].mxu0  ;;  %v1661_v61 = vsel %vm562_vm2, %v1572_v59, 0  ;;  %5707 = vmatprep.subr.msk.bf16.mxu1 %vm562_vm2, %v1572_v59 }
 0x189   : > { %v6858_v62 = vpop.f32.mrb[25].mxu0  ;;  %5374 = vmatpush3.bf16.xpose.msra.mxu1 %v1661_v61 }
 0x18a   : > { %v6860_v63 = vpop.f32.mrb[26].mxu0  ;;  %v5249_v0 = vpop.f32.mrb[12].mxu1  ;;  %5708 = vmatprep.subr.msk.bf16.mxu1 %vm562_vm2, %v1573_v57 }
 0x18b   : > { %v6865_v2 = vpop.f32.mrb[27].mxu0  ;;  %v1007_v3 = vpop.f32.mrb[13].mxu1 }
 0x18c   : > { %v5250_v5 = vpop.f32.mrb[14].mxu1 }
 0x18d   : > { %v1575_v7 = vpack.c.bf16 %v5250_v5, %v5249_v0  ;;  %v1010_v10 = vpop.f32.mrb[15].mxu1 }
 0x18e   : > { %v1574_v11 = vpack.c.bf16 %v1010_v10, %v1007_v3 }
 0x190   : > { %v6869_v51 = vpop.f32.mrb[28].mxu0 }
 0x191   : > { %8791 = vst [vmem:[#allocation15_spill] sm:$0xff] %v6869_v51  ;;  %v6872_v56 = vpop.f32.mrb[29].mxu0  ;;  %5376 = vmatpush3.bf16.xpose.msra.mxu1 %v1664_v54  ;;  %v1667_v54 = vsel %vm562_vm2, %v1574_v11, 0 }
 0x192   : > { %v6874_v58 = vpop.f32.mrb[30].mxu0  ;;  %v5253_v59 = vpop.f32.mrb[16].mxu1  ;;  %5709 = vmatprep.subr.msk.bf16.mxu1 %vm562_vm2, %v1574_v11 }
 0x193   : > { %8792 = vst [vmem:[#allocation16_spill] sm:$0xff] %v6874_v58  ;;  %v6879_v45 = vpop.f32.mrb[31].mxu0  ;;  %v1023_v0 = vpop.f32.mrb[17].mxu1  ;;  %v8800_v58 = vpack.c.bf16 %v6709_v8, %v6707_v6  ;;  %v8801_v6 = vpack.c.bf16 %v6729_v16, %v6723_v13 }
 0x194   : > { %v5254_v5 = vpop.f32.mrb[18].mxu1 }
 0x195   : > { %v1577_v10 = vpack.c.bf16 %v5254_v5, %v5253_v59  ;;  %v1026_v57 = vpop.f32.mrb[19].mxu1 }
 0x196   : > { %v1576_v47 = vpack.c.bf16 %v1026_v57, %v1023_v0 }
 0x197   : > { %v1676_v17 = vsel %vm562_vm2, %v1577_v10, 0 }
 0x198   : > { %v6883_v33 = vpop.f32.mrb[32].mxu0  ;;  %v1673_v27 = vsel %vm562_vm2, %v1576_v47, 0 }
 0x199   : > { %v825_v35 = vpop.f32.mrb[33].mxu0  ;;  %5378 = vmatpush3.bf16.xpose.msra.mxu1 %v1667_v54  ;;  %v1670_v54 = vsel %vm562_vm2, %v1575_v7, 0 }
 0x19a   : > { %v6886_v1 = vpop.f32.mrb[34].mxu0  ;;  %v5257_v4 = vpop.f32.mrb[20].mxu1  ;;  %5710 = vmatprep.subr.msk.bf16.mxu1 %vm562_vm2, %v1575_v7 }
 0x19b   : > { %v828_v52 = vpop.f32.mrb[35].mxu0  ;;  %v1039_v3 = vpop.f32.mrb[21].mxu1 }
 0x19c   : > { %v1556_v55 = vpack.c.bf16 %v828_v52, %v825_v35  ;;  %v5258_v59 = vpop.f32.mrb[22].mxu1 }
 0x19d   : > { %v6891_v5 = vpack.c.bf16 %v5258_v59, %v5257_v4  ;;  %v1042_v0 = vpop.f32.mrb[23].mxu1 }
 0x19e   : > { %5453 = vmatprep.mubr.msk.bf16.mxu0 %vm562_vm2, %v1556_v55  ;;  %v1578_v11 = vpack.c.bf16 %v1042_v0, %v1039_v3 }
 0x1a0   : > { %v6894_v57 = vpop.f32.mrb[36].mxu0  ;;  %v1679_v46 = vsel %vm562_vm2, %v1578_v11, 0 }
 0x1a1   : > { %v6897_v40 = vpop.f32.mrb[37].mxu0  ;;  %5380 = vmatpush3.bf16.xpose.msra.mxu1 %v1670_v54 }
 0x1a2   : > { %v6899_v43 = vpop.f32.mrb[38].mxu0  ;;  %v5261_v61 = vpop.f32.mrb[24].mxu1  ;;  %5711 = vmatprep.subr.msk.bf16.mxu1 %vm562_vm2, %v1576_v47 }
 0x1a3   : > { %v6904_v52 = vpop.f32.mrb[39].mxu0  ;;  %v1055_v4 = vpop.f32.mrb[25].mxu1 }
 0x1a4   : > { %v5262_v3 = vpop.f32.mrb[26].mxu1 }
 0x1a5   : > { %v6908_v59 = vpack.c.bf16 %v5262_v3, %v5261_v61  ;;  %v1058_v7 = vpop.f32.mrb[27].mxu1 }
 0x1a6   : > { %v1580_v0 = vpack.c.bf16 %v1058_v7, %v1055_v4 }
 0x1a8   : > { %v6910_v54 = vpop.f32.mrb[40].mxu0 }
 0x1a9   : > { %v6913_v29 = vpop.f32.mrb[41].mxu0  ;;  %5382 = vmatpush3.bf16.xpose.msra.mxu1 %v1673_v27 }
 0x1aa   : > { %v6915_v21 = vpop.f32.mrb[42].mxu0  ;;  %v5265_v35 = vpop.f32.mrb[28].mxu1  ;;  %5712 = vmatprep.subr.msk.bf16.mxu1 %vm562_vm2, %v1577_v10 }
 0x1ab   : > { %v6920_v23 = vpop.f32.mrb[43].mxu0  ;;  %v1071_v61 = vpop.f32.mrb[29].mxu1 }
 0x1ac   : > { %v5266_v3 = vpop.f32.mrb[30].mxu1 }
 0x1ad   : > { %v6924_v7 = vpack.c.bf16 %v5266_v3, %v5265_v35  ;;  %v1074_v47 = vpop.f32.mrb[31].mxu1 }
 0x1ae   : > { %v6926_v15 = vpack.c.bf16 %v1074_v47, %v1071_v61 }
 0x1b0   : > { %v6928_v27 = vpop.f32.mrb[44].mxu0 }
 0x1b1   : > { %8793 = vst [vmem:[#allocation17_spill] sm:$0xff] %v6928_v27  ;;  %v6931_v9 = vpop.f32.mrb[45].mxu0  ;;  %5384 = vmatpush3.bf16.xpose.msra.mxu1 %v1676_v17  ;;  %v1682_v27 = vsel %vm562_vm2, %v6891_v5, 0 }
 0x1b2   : > { %v6933_v55 = vpop.f32.mrb[46].mxu0  ;;  %v5269_v39 = vpop.f32.mrb[32].mxu1  ;;  %5713 = vmatprep.subr.msk.bf16.mxu1 %vm562_vm2, %v1578_v11 }
 0x1b3   : > { %8794 = vst [vmem:[#allocation18_spill] sm:$0xff] %v6933_v55  ;;  %v6938_v35 = vpop.f32.mrb[47].mxu0  ;;  %v1087_v3 = vpop.f32.mrb[33].mxu1 }
 0x1b4   : > { %v5270_v47 = vpop.f32.mrb[34].mxu1 }
 0x1b5   : > { %v6942_v44 = vpack.c.bf16 %v5270_v47, %v5269_v39  ;;  %v1090_v10 = vpop.f32.mrb[35].mxu1 }
 0x1b6   : > { %v6944_v42 = vpack.c.bf16 %v1090_v10, %v1087_v3 }
 0x1b8   : > { %v6946_v17 = vpop.f32.mrb[48].mxu0 }
 0x1b9   : > { %8795 = vst [vmem:[#allocation19_spill] sm:$0xff] %v6946_v17  ;;  %v6949_v30 = vpop.f32.mrb[49].mxu0  ;;  %5386 = vmatpush3.bf16.xpose.msra.mxu1 %v1679_v46 }
 0x1ba   : > { %8796 = vst [vmem:[#allocation20_spill] sm:$0xff] %v6949_v30  ;;  %v6951_v4 = vpop.f32.mrb[50].mxu0  ;;  %v5273_v32 = vpop.f32.mrb[36].mxu1  ;;  %5714 = vmatprep.subr.msk.bf16.mxu1 %vm562_vm2, %v6891_v5 }
 0x1bb   : > { %8797 = vst [vmem:[#allocation21_spill] sm:$0xff] %v6951_v4  ;;  %v6957_v47 = vpop.f32.mrb[51].mxu0  ;;  %v1103_v3 = vpop.f32.mrb[37].mxu1 }
 0x1bc   : > { %8798 = vst [vmem:[#allocation22_spill] sm:$0xff] %v6957_v47  ;;  %v5274_v61 = vpop.f32.mrb[38].mxu1 }
 0x1bd   : > { %v6961_v11 = vpack.c.bf16 %v5274_v61, %v5273_v32  ;;  %v1106_v31 = vpop.f32.mrb[39].mxu1 }
 0x1be   : > { %v6963_v46 = vpack.c.bf16 %v1106_v31, %v1103_v3 }
 0x1c0   : > { %v6965_v34 = vpop.f32.mrb[52].mxu0 }
 0x1c1   : > { %8799 = vst [vmem:[#allocation23_spill] sm:$0xff] %v6965_v34  ;;  %v6969_v55 = vpop.f32.mrb[53].mxu0  ;;  %5388 = vmatpush3.bf16.xpose.msra.mxu1 %v1682_v27  ;;  %v1806_v27 = vsel %vm562_vm2, %v1580_v0, 0  ;;  %v1809_v34 = vsel %vm562_vm2, %v6908_v59, 0 }
 0x1c2   : > { %v6971_v39 = vpop.f32.mrb[54].mxu0  ;;  %v5277_v17 = vpop.f32.mrb[40].mxu1  ;;  %5715 = vmatprep.subr.msk.bf16.mxu1 %vm562_vm2, %v1580_v0 }
 0x1c3   : > { %v6976_v61 = vpop.f32.mrb[55].mxu0  ;;  %v1119_v31 = vpop.f32.mrb[41].mxu1 }
 0x1c4   : > { %v5278_v10 = vpop.f32.mrb[42].mxu1 }
 0x1c5   : > { %v1589_v4 = vpack.c.bf16 %v5278_v10, %v5277_v17  ;;  %v1122_v5 = vpop.f32.mrb[43].mxu1 }
 0x1c6   : > { %v1588_v30 = vpack.c.bf16 %v1122_v5, %v1119_v31 }
 0x1c8   : > { %v5311_v47 = vpop.f32.mrb[56].mxu0  ;;  %v1951_v51 = vsel %vm562_vm2, %v1588_v30, 0  ;;  %5390 = vmatmul.mubr.msk.bf16.vlgmr.msra.gmra.mrb[72].mxu1 %vm562_vm2, %v8800_v58  ;;  %5723 = vmatprep.subr.msk.bf16.mxu0 %vm562_vm2, %v1588_v30 }
 0x1c9   : > { %v1285_v32 = vpop.f32.mrb[57].mxu0  ;;  %5406 = vmatpush3.bf16.xpose.msra.mxu1 %v1806_v27  ;;  %5438 = vmatpush3.bf16.xpose.msra.mxu0 %v1951_v51 }
 0x1ca   : > { %v5312_v3 = vpop.f32.mrb[58].mxu0  ;;  %5716 = vmatprep.subr.msk.bf16.mxu1 %vm562_vm2, %v6908_v59  ;;  %5724 = vmatprep.subr.msk.bf16.mxu0 %vm562_vm2, %v1589_v4  ;;  %v5281_v17 = vpop.f32.mrb[44].mxu1 }
 0x1cb   : > { %v6990_v0 = vpack.c.bf16 %v5312_v3, %v5311_v47  ;;  %v1288_v10 = vpop.f32.mrb[59].mxu0  ;;  %5393 = vmatprep.mubr.msk.bf16.mxu1 %vm562_vm2, %v8801_v6  ;;  %v1135_v8 = vpop.f32.mrb[45].mxu1  ;;  %v1954_v47 = vsel %vm562_vm2, %v1589_v4, 0  ;;  %v8802_v3 = vpack.c.bf16 %v6725_v14, %v6719_v12 }
 0x1cc   : > { %v6996_v30 = vpack.c.bf16 %v1288_v10, %v1285_v32  ;;  %v5282_v58 = vpop.f32.mrb[46].mxu1  ;;  %v8803_v32 = vpack.c.bf16 %v6745_v22, %v6737_v19  ;;  %v1812_v19 = vsel %vm562_vm2, %v6926_v15, 0  ;;  %v8804_v22 = vpack.c.bf16 %v6741_v20, %v6733_v18 }
 0x1cd   : > { %v1591_v51 = vpack.c.bf16 %v5282_v58, %v5281_v17  ;;  %v1138_v31 = vpop.f32.mrb[47].mxu1 }
 0x1ce   : > { %v1590_v5 = vpack.c.bf16 %v1138_v31, %v1135_v8 }
 0x1d0   : > { %v5315_v27 = vpop.f32.mrb[60].mxu0  ;;  %5394 = vmatmul.mubr.msk.bf16.gmra.mrb[76].mxu1 %vm562_vm2, %v8802_v3  ;;  %v1957_v8 = vsel %vm562_vm2, %v1590_v5, 0 }
 0x1d1   : > { %v1301_v13 = vpop.f32.mrb[61].mxu0  ;;  %5408 = vmatpush3.bf16.xpose.msra.mxu1 %v1809_v34  ;;  %5440 = vmatpush3.bf16.xpose.msra.mxu0 %v1954_v47 }
 0x1d2   : > { %v5316_v16 = vpop.f32.mrb[62].mxu0  ;;  %5717 = vmatprep.subr.msk.bf16.mxu1 %vm562_vm2, %v6926_v15  ;;  %5397 = vmatprep.mubr.msk.bf16.mxu1 %vm562_vm2, %v8803_v32  ;;  %v5285_v17 = vpop.f32.mrb[48].mxu1 }
 0x1d3   : > { %v7011_v59 = vpack.c.bf16 %v5316_v16, %v5315_v27  ;;  %v1304_v4 = vpop.f32.mrb[63].mxu0  ;;  %5725 = vmatprep.subr.msk.bf16.mxu0 %vm562_vm2, %v1590_v5  ;;  %v1151_v14 = vpop.f32.mrb[49].mxu1  ;;  %v8805_v5 = vpack.c.bf16 %v6761_v28, %v6755_v25  ;;  %v1815_v25 = vsel %vm562_vm2, %v6924_v7, 0  ;;  %v8806_v28 = vpack.c.bf16 %v6757_v26, %v6751_v24 }
 0x1d4   : > { %v7014_v12 = vpack.c.bf16 %v1304_v4, %v1301_v13  ;;  %v5286_v34 = vpop.f32.mrb[50].mxu1 }
 0x1d5   : > { %v7016_v10 = vpack.c.bf16 %v5286_v34, %v5285_v17  ;;  %v1154_v6 = vpop.f32.mrb[51].mxu1 }
 0x1d6   : > { %v1592_v58 = vpack.c.bf16 %v1154_v6, %v1151_v14  ;;  %v1960_v6 = vsel %vm562_vm2, %v1591_v51, 0 }
 0x1d8   : > { %v5319_v31 = vpop.f32.mrb[64].mxu0  ;;  %5398 = vmatmul.mubr.msk.bf16.gmra.mrb[80].mxu1 %vm562_vm2, %v8804_v22 }
 0x1d9   : > { %v1317_v27 = vpop.f32.mrb[65].mxu0  ;;  %5410 = vmatpush3.bf16.xpose.msra.mxu1 %v1812_v19  ;;  %5442 = vmatpush3.bf16.xpose.msra.mxu0 %v1957_v8  ;;  %v8807_v8 = vpack.c.bf16 %v6828_v41, %v6820_v37 }
 0x1da   : > { %v5320_v47 = vpop.f32.mrb[66].mxu0  ;;  %5718 = vmatprep.subr.msk.bf16.mxu1 %vm562_vm2, %v6924_v7  ;;  %5401 = vmatprep.mubr.msk.bf16.mxu1 %vm562_vm2, %v8805_v5  ;;  %v5289_v13 = vpop.f32.mrb[52].mxu1 }
 0x1db   : > { %v7031_v3 = vpack.c.bf16 %v5320_v47, %v5319_v31  ;;  %v1320_v15 = vpop.f32.mrb[67].mxu0  ;;  %5726 = vmatprep.subr.msk.bf16.mxu0 %vm562_vm2, %v1591_v51  ;;  %v1167_v20 = vpop.f32.mrb[53].mxu1  ;;  %v1963_v47 = vsel %vm562_vm2, %v1592_v58, 0 }
 0x1dc   : > { %v7034_v18 = vpack.c.bf16 %v1320_v15, %v1317_v27  ;;  %v5290_v16 = vpop.f32.mrb[54].mxu1  ;;  %v1818_v15 = vsel %vm562_vm2, %v6944_v42, 0 }
 0x1dd   : > { %v7036_v32 = vpack.c.bf16 %v5290_v16, %v5289_v13  ;;  %v1170_v4 = vpop.f32.mrb[55].mxu1 }
 0x1de   : > { %v1594_v17 = vpack.c.bf16 %v1170_v4, %v1167_v20 }
 0x1e0   : > { %v5323_v14 = vpop.f32.mrb[68].mxu0  ;;  %5402 = vmatmul.mubr.msk.bf16.gmra.mrb[84].mxu1 %vm562_vm2, %v8806_v28 }
 0x1e1   : > { %v1333_v34 = vpop.f32.mrb[69].mxu0  ;;  %5412 = vmatpush3.bf16.xpose.msra.mxu1 %v1815_v25  ;;  %5421 = vmatprep.mubr.msk.bf16.mxu1 %vm562_vm2, %v8807_v8 }
 0x1e2   : > { %v5324_v31 = vpop.f32.mrb[70].mxu0  ;;  %5444 = vmatpush3.bf16.xpose.msra.mxu0 %v1960_v6  ;;  %5719 = vmatprep.subr.msk.bf16.mxu1 %vm562_vm2, %v6944_v42  ;;  %v5293_v24 = vpop.f32.mrb[56].mxu1 }
 0x1e3   : > { %v7051_v7 = vpack.c.bf16 %v5324_v31, %v5323_v14  ;;  %v1336_v19 = vpop.f32.mrb[71].mxu0  ;;  %5727 = vmatprep.subr.msk.bf16.mxu0 %vm562_vm2, %v1592_v58  ;;  %v1183_v51 = vpop.f32.mrb[57].mxu1  ;;  %v1821_v31 = vsel %vm562_vm2, %v6942_v44, 0 }
 0x1e4   : > { %v7053_v26 = vpack.c.bf16 %v1336_v19, %v1333_v34  ;;  %v5294_v22 = vpop.f32.mrb[58].mxu1 }
 0x1e5   : > { %v7056_v27 = vpack.c.bf16 %v5294_v22, %v5293_v24  ;;  %v1186_v37 = vpop.f32.mrb[59].mxu1  ;;  %v1966_v24 = vsel %vm562_vm2, %v7016_v10, 0 }
 0x1e6   : > { %v7058_v41 = vpack.c.bf16 %v1186_v37, %v1183_v51 }
 0x1e8   : > { %v5327_v5 = vpop.f32.mrb[72].mxu0 }
 0x1e9   : > { %v1349_v13 = vpop.f32.mrb[73].mxu0  ;;  %5414 = vmatpush3.bf16.xpose.msra.mxu1 %v1818_v15 }
 0x1ea   : > { %v5328_v20 = vpop.f32.mrb[74].mxu0  ;;  %5446 = vmatpush3.bf16.xpose.msra.mxu0 %v1963_v47  ;;  %5720 = vmatprep.subr.msk.bf16.mxu1 %vm562_vm2, %v6942_v44  ;;  %v5297_v14 = vpop.f32.mrb[60].mxu1 }
 0x1eb   : > { %v7063_v16 = vpack.c.bf16 %v5328_v20, %v5327_v5  ;;  %v1352_v4 = vpop.f32.mrb[75].mxu0  ;;  %v1199_v28 = vpop.f32.mrb[61].mxu1  ;;  %5728 = vmatprep.subr.msk.bf16.mxu0 %vm562_vm2, %v7016_v10 }
 0x1ec   : > { %v7067_v25 = vpack.c.bf16 %v1352_v4, %v1349_v13  ;;  %v5298_v58 = vpop.f32.mrb[62].mxu1  ;;  %v1969_v4 = vsel %vm562_vm2, %v1594_v17, 0 }
 0x1ed   : > { %v7071_v34 = vpack.c.bf16 %v5298_v58, %v5297_v14  ;;  %v1202_v42 = vpop.f32.mrb[63].mxu1 }
 0x1ee   : > { %v7073_v6 = vpack.c.bf16 %v1202_v42, %v1199_v28  ;;  %v1824_v28 = vsel %vm562_vm2, %v6963_v46, 0 }
 0x1f0   : > { %v5331_v8 = vpop.f32.mrb[76].mxu0 }
 0x1f1   : > { %v1365_v19 = vpop.f32.mrb[77].mxu0  ;;  %5416 = vmatpush3.bf16.xpose.msra.mxu1 %v1821_v31 }
 0x1f2   : > { %v5332_v51 = vpop.f32.mrb[78].mxu0  ;;  %5448 = vmatpush3.bf16.xpose.msra.mxu0 %v1966_v24  ;;  %v5301_v37 = vpop.f32.mrb[64].mxu1  ;;  %5721 = vmatprep.subr.msk.bf16.mxu1 %vm562_vm2, %v6963_v46 }
 0x1f3   : > { %v7079_v22 = vpack.c.bf16 %v5332_v51, %v5331_v8  ;;  %v1368_v47 = vpop.f32.mrb[79].mxu0  ;;  %v1215_v15 = vpop.f32.mrb[65].mxu1  ;;  %5729 = vmatprep.subr.msk.bf16.mxu0 %vm562_vm2, %v1594_v17 }
 0x1f4   : > { %v7083_v5 = vpack.c.bf16 %v1368_v47, %v1365_v19  ;;  %v5302_v44 = vpop.f32.mrb[66].mxu1 }
 0x1f5   : > { %v7086_v13 = vpack.c.bf16 %v5302_v44, %v5301_v37  ;;  %v1218_v20 = vpop.f32.mrb[67].mxu1  ;;  %v1827_v44 = vsel %vm562_vm2, %v6961_v11, 0 }
 0x1f6   : > { %v7088_v10 = vpack.c.bf16 %v1218_v20, %v1215_v15 }
 0x1f8   : > { %v5335_v14 = vpop.f32.mrb[80].mxu0 }
 0x1f9   : > { %v1381_v58 = vpop.f32.mrb[81].mxu0  ;;  %5418 = vmatpush3.bf16.xpose.msra.mxu1 %v1824_v28 }
 0x1fa   : > { %v5336_v42 = vpop.f32.mrb[82].mxu0  ;;  %5450 = vmatpush3.bf16.xpose.msra.mxu0 %v1969_v4  ;;  %v5305_v31 = vpop.f32.mrb[68].mxu1  ;;  %5722 = vmatprep.subr.msk.bf16.mxu1 %vm562_vm2, %v6961_v11  ;;  %v1972_v4 = vsel %vm562_vm2, %v7036_v32, 0  ;;  %v8808_v11 = vpack.c.bf16 %v6822_v38, %v6818_v36  ;;  %v8812_v36 = vpack.c.bf16 %v6904_v52, %v6897_v40  ;;  %v8814_v40 = vpack.c.bf16 %v6846_v50, %v6842_v48 }
 0x1fb   : > { %v7093_v8 = vpack.c.bf16 %v5336_v42, %v5335_v14  ;;  %v1384_v19 = vpop.f32.mrb[83].mxu0  ;;  %v1231_v51 = vpop.f32.mrb[69].mxu1  ;;  %5730 = vmatprep.subr.msk.bf16.mxu0 %vm562_vm2, %v7036_v32  ;;  %v2096_v32 = vsel %vm562_vm2, %v7058_v41, 0  ;;  %v8815_v52 = vpack.c.bf16 %v6899_v43, %v6894_v57  ;;  %v8818_v48 = vpack.c.bf16 %v6920_v23, %v6913_v29 }
 0x1fc   : > { %v7097_v24 = vpack.c.bf16 %v1384_v19, %v1381_v58  ;;  %v5306_v17 = vpop.f32.mrb[70].mxu1  ;;  %v8820_v23 = vpack.c.bf16 %v6860_v63, %v6854_v60  ;;  %v2102_v29 = vsel %vm562_vm2, %v7073_v6, 0  ;;  %v8821_v57 = vpack.c.bf16 %v6915_v21, %v6910_v54  ;;  %v8827_v54 = vld [vmem:[#allocation15_spill] sm:$0xff] }
 0x1fd   : > { %v7101_v37 = vpack.c.bf16 %v5306_v17, %v5305_v31  ;;  %v1234_v46 = vpop.f32.mrb[71].mxu1  ;;  %v8824_v63 = vpack.c.bf16 %v6938_v35, %v6931_v9  ;;  %v2105_v35 = vsel %vm562_vm2, %v7071_v34, 0 }
 0x1fe   : > { %v7103_v47 = vpack.c.bf16 %v1234_v46, %v1231_v51  ;;  %v8809_v51 = vpack.c.bf16 %v6886_v1, %v6883_v33  ;;  %v8810_v46 = vpack.c.bf16 %v6850_v53, %v6844_v49  ;;  %v2099_v1 = vsel %vm562_vm2, %v7056_v27, 0 }
 0x200   : > { %v5339_v15 = vpop.f32.mrb[84].mxu0 }
 0x201   : > { %v1397_v20 = vpop.f32.mrb[85].mxu0  ;;  %5420 = vmatpush3.bf16.xpose.msra.mxu1 %v1827_v44  ;;  %v8829_v44 = vld [vmem:[#allocation18_spill] sm:$0xff] }
 0x202   : > { %v5340_v14 = vpop.f32.mrb[86].mxu0  ;;  %5452 = vmatpush3.bf16.xpose.msra.mxu0 %v1972_v4  ;;  %5731 = vmatprep.subr.msk.bf16.mxu1 %vm562_vm2, %v7058_v41 }
 0x203   : > { %v7109_v28 = vpack.c.bf16 %v5340_v14, %v5339_v15  ;;  %v1400_v58 = vpop.f32.mrb[87].mxu0  ;;  %5501 = vmatprep.subr.bf16.mxu0 %v6996_v30  ;;  %v8832_v14 = vld [vmem:[#allocation22_spill] sm:$0xff] }
 0x204   : > { %v7113_v42 = vpack.c.bf16 %v1400_v58, %v1397_v20  ;;  %v8830_v20 = vld [vmem:[#allocation17_spill] sm:$0xff] }
 0x205   : > { %v8831_v4 = vpack.c.bf16 %v8829_v44, %v8830_v20 }
 0x208   : > { %v5343_v31 = vpop.f32.mrb[88].mxu0  ;;  %5422 = vmatmul.mubr.msk.bf16.vlgmr.msra.gmra.mrb[88].mxu1 %vm562_vm2, %v8808_v11 }
 0x209   : > { %v1413_v19 = vpop.f32.mrb[89].mxu0  ;;  %5454 = vmatmul.mubr.msk.bf16.vlgmr.msra.gmra.mrb[120].mxu0 %vm562_vm2, %v8809_v51  ;;  %5425 = vmatprep.mubr.msk.bf16.mxu1 %vm562_vm2, %v8810_v46  ;;  %v2108_v51 = vsel %vm562_vm2, %v7088_v10, 0 }
 0x20a   : > { %v5344_v17 = vpop.f32.mrb[90].mxu0  ;;  %5457 = vmatprep.mubr.msk.bf16.mxu0 %vm562_vm2, %v8812_v36  ;;  %5470 = vmatpush3.bf16.xpose.msra.mxu1 %v2096_v32 }
 0x20b   : > { %v7130_v15 = vpack.c.bf16 %v5344_v17, %v5343_v31  ;;  %v1416_v38 = vpop.f32.mrb[91].mxu0  ;;  %5502 = vmatpush3.bf16.msra.mxu0 %v6996_v30  ;;  %5732 = vmatprep.subr.msk.bf16.mxu1 %vm562_vm2, %v7056_v27 }
 0x20c   : > { %v7137_v33 = vpack.c.bf16 %v1416_v38, %v1413_v19  ;;  %5503 = vmatprep.subr.bf16.mxu0 %v6990_v0 }
 0x20d   : > { %8811 = vst [vmem:[#allocation24_spill] sm:$0xff] %v7130_v15 }
 0x20e   : > { %8813 = vst [vmem:[#allocation25_spill] sm:$0xff] %v7137_v33 }
 0x20f   : > { %5504 = vmatpush3.bf16.msra.mxu0 %v6990_v0  ;;  %v8816_v0 = vpack.c.bf16 %v6865_v2, %v6858_v62 }
 0x210   : > { %v5347_v49 = vpop.f32.mrb[92].mxu0  ;;  %5426 = vmatmul.mubr.msk.bf16.gmra.mrb[92].mxu1 %vm562_vm2, %v8814_v40  ;;  %5505 = vmatprep.subr.bf16.mxu0 %v7014_v12 }
 0x211   : > { %v1429_v53 = vpop.f32.mrb[93].mxu0  ;;  %5458 = vmatmul.mubr.msk.bf16.gmra.mrb[124].mxu0 %vm562_vm2, %v8815_v52  ;;  %5429 = vmatprep.mubr.msk.bf16.mxu1 %vm562_vm2, %v8816_v0  ;;  %v2114_v0 = vsel %vm562_vm2, %v7103_v47, 0 }
 0x212   : > { %v5348_v30 = vpop.f32.mrb[94].mxu0  ;;  %5461 = vmatprep.mubr.msk.bf16.mxu0 %vm562_vm2, %v8818_v48  ;;  %5472 = vmatpush3.bf16.xpose.msra.mxu1 %v2099_v1 }
 0x213   : > { %v7158_v41 = vpack.c.bf16 %v5348_v30, %v5347_v49  ;;  %v1432_v50 = vpop.f32.mrb[95].mxu0  ;;  %5506 = vmatpush3.bf16.msra.mxu0 %v7014_v12  ;;  %5733 = vmatprep.subr.msk.bf16.mxu1 %vm562_vm2, %v7073_v6 }
 0x214   : > { %v7165_v43 = vpack.c.bf16 %v1432_v50, %v1429_v53  ;;  %5507 = vmatprep.subr.bf16.mxu0 %v7011_v59 }
 0x215   : > { %8817 = vst [vmem:[#allocation26_spill] sm:$0xff] %v7158_v41 }
 0x216   : > { %8819 = vst [vmem:[#allocation27_spill] sm:$0xff] %v7165_v43 }
 0x217   : > { %5508 = vmatpush3.bf16.msra.mxu0 %v7011_v59  ;;  %v8822_v59 = vpack.c.bf16 %v6879_v45, %v6872_v56  ;;  %v8826_v56 = vld [vmem:[#allocation16_spill] sm:$0xff] }
 0x218   : > { %v5351_v62 = vpop.f32.mrb[96].mxu0  ;;  %5430 = vmatmul.mubr.msk.bf16.gmra.mrb[96].mxu1 %vm562_vm2, %v8820_v23  ;;  %5509 = vmatprep.subr.bf16.mxu0 %v7034_v18  ;;  %v8828_v6 = vpack.c.bf16 %v8826_v56, %v8827_v54  ;;  %v8848_v56 = vpack.c.bf16 %v6976_v61, %v6969_v55  ;;  %v8854_v55 = vld [vmem:[#allocation9_spill] sm:$0xff]  ;;  %v8855_v61 = vld [vmem:[#allocation7_spill] sm:$0xff] }
 0x219   : > { %v1445_v2 = vpop.f32.mrb[97].mxu0  ;;  %5462 = vmatmul.mubr.msk.bf16.gmra.mrb[128].mxu0 %vm562_vm2, %v8821_v57  ;;  %5433 = vmatprep.mubr.msk.bf16.mxu1 %vm562_vm2, %v8822_v59 }
 0x21a   : > { %v5352_v12 = vpop.f32.mrb[98].mxu0  ;;  %5474 = vmatpush3.bf16.xpose.msra.mxu1 %v2102_v29  ;;  %5465 = vmatprep.mubr.msk.bf16.mxu0 %vm562_vm2, %v8824_v63  ;;  %v2117_v29 = vsel %vm562_vm2, %v7101_v37, 0  ;;  %v8846_v63 = vld [vmem:[#allocation19_spill] sm:$0xff] }
 0x21b   : > { %v7186_v27 = vpack.c.bf16 %v5352_v12, %v5351_v62  ;;  %v1448_v60 = vpop.f32.mrb[99].mxu0  ;;  %5510 = vmatpush3.bf16.msra.mxu0 %v7034_v18  ;;  %5734 = vmatprep.subr.msk.bf16.mxu1 %vm562_vm2, %v7071_v34 }
 0x21c   : > { %v7193_v21 = vpack.c.bf16 %v1448_v60, %v1445_v2  ;;  %5511 = vmatprep.subr.bf16.mxu0 %v7031_v3  ;;  %v8845_v60 = vld [vmem:[#allocation21_spill] sm:$0xff] }
 0x21d   : > { %8823 = vst [vmem:[#allocation28_spill] sm:$0xff] %v7186_v27 }
 0x21e   : > { %8825 = vst [vmem:[#allocation29_spill] sm:$0xff] %v7193_v21 }
 0x21f   : > { %5512 = vmatpush3.bf16.msra.mxu0 %v7031_v3  ;;  %v8833_v3 = vld [vmem:[#allocation20_spill] sm:$0xff] }
 0x220   : > { %v5355_v45 = vpop.f32.mrb[100].mxu0  ;;  %5434 = vmatmul.mubr.msk.bf16.gmra.mrb[100].mxu1 %vm562_vm2, %v8828_v6  ;;  %5513 = vmatprep.subr.bf16.mxu0 %v7053_v26  ;;  %v8834_v58 = vpack.c.bf16 %v8832_v14, %v8833_v3  ;;  %v8851_v6 = vld [vmem:[#allocation10_spill] sm:$0xff] }
 0x221   : > { %v1461_v9 = vpop.f32.mrb[101].mxu0  ;;  %5466 = vmatmul.mubr.msk.bf16.gmra.mrb[132].mxu0 %vm562_vm2, %v8831_v4 }
 0x222   : > { %v5356_v18 = vpop.f32.mrb[102].mxu0  ;;  %5485 = vmatprep.mubr.msk.bf16.mxu1 %vm562_vm2, %v8834_v58  ;;  %5476 = vmatpush3.bf16.xpose.msra.mxu1 %v2105_v35 }
 0x223   : > { %v7214_v31 = vpack.c.bf16 %v5356_v18, %v5355_v45  ;;  %v1464_v19 = vpop.f32.mrb[103].mxu0  ;;  %5514 = vmatpush3.bf16.msra.mxu0 %v7053_v26  ;;  %5735 = vmatprep.subr.msk.bf16.mxu1 %vm562_vm2, %v7088_v10  ;;  %v8847_v45 = vpack.c.bf16 %v8845_v60, %v8846_v63 }
 0x224   : > { %v7219_v34 = vpack.c.bf16 %v1464_v19, %v1461_v9  ;;  %5515 = vmatprep.subr.bf16.mxu0 %v7051_v7  ;;  %v8852_v9 = vld [vmem:[#allocation8_spill] sm:$0xff] }
 0x225   : > { %8835 = vst [vmem:[#allocation16_spill] sm:$0xff] %v7214_v31  ;;  %v8853_v35 = vpack.c.bf16 %v8851_v6, %v8852_v9 }
 0x226   : > { %8836 = vst [vmem:[#allocation15_spill] sm:$0xff] %v7219_v34 }
 0x227   : > { %5516 = vmatpush3.bf16.msra.mxu0 %v7051_v7  ;;  %v2111_v7 = vsel %vm562_vm2, %v7086_v13, 0 }
 0x228   : > { %v5359_v11 = vpop.f32.mrb[104].mxu0  ;;  %5565 = vmatprep.subr.bf16.mxu0 %v7137_v33 }
 0x229   : > { %v1477_v32 = vpop.f32.mrb[105].mxu0 }
 0x22a   : > { %v5360_v17 = vpop.f32.mrb[106].mxu0  ;;  %5478 = vmatpush3.bf16.xpose.msra.mxu1 %v2108_v51 }
 0x22b   : > { %v7226_v46 = vpack.c.bf16 %v5360_v17, %v5359_v11  ;;  %v1480_v26 = vpop.f32.mrb[107].mxu0  ;;  %5736 = vmatprep.subr.msk.bf16.mxu1 %vm562_vm2, %v7086_v13 }
 0x22c   : > { %v7230_v36 = vpack.c.bf16 %v1480_v26, %v1477_v32 }
 0x22d   : > { %8837 = vst [vmem:[#allocation18_spill] sm:$0xff] %v7226_v46 }
 0x22e   : > { %8838 = vst [vmem:[#allocation17_spill] sm:$0xff] %v7230_v36 }
 0x230   : > { %v5363_v38 = vpop.f32.mrb[108].mxu0 }
 0x231   : > { %v1493_v49 = vpop.f32.mrb[109].mxu0 }
 0x232   : > { %v5364_v53 = vpop.f32.mrb[110].mxu0  ;;  %5480 = vmatpush3.bf16.xpose.msra.mxu1 %v2111_v7 }
 0x233   : > { %v7234_v40 = vpack.c.bf16 %v5364_v53, %v5363_v38  ;;  %v1496_v10 = vpop.f32.mrb[111].mxu0  ;;  %5737 = vmatprep.subr.msk.bf16.mxu1 %vm562_vm2, %v7103_v47 }
 0x234   : > { %v7238_v1 = vpack.c.bf16 %v1496_v10, %v1493_v49 }
 0x235   : > { %8839 = vst [vmem:[#allocation22_spill] sm:$0xff] %v7234_v40 }
 0x236   : > { %8840 = vst [vmem:[#allocation20_spill] sm:$0xff] %v7238_v1 }
 0x238   : > { %v5367_v52 = vpop.f32.mrb[112].mxu0 }
 0x239   : > { %v1509_v30 = vpop.f32.mrb[113].mxu0 }
 0x23a   : > { %v5368_v48 = vpop.f32.mrb[114].mxu0  ;;  %5482 = vmatpush3.bf16.xpose.msra.mxu1 %v2114_v0 }
 0x23b   : > { %v7242_v50 = vpack.c.bf16 %v5368_v48, %v5367_v52  ;;  %v1512_v13 = vpop.f32.mrb[115].mxu0  ;;  %5738 = vmatprep.subr.msk.bf16.mxu1 %vm562_vm2, %v7101_v37  ;;  %v8849_v37 = vld [vmem:[#allocation23_spill] sm:$0xff] }
 0x23c   : > { %v7244_v62 = vpack.c.bf16 %v1512_v13, %v1509_v30  ;;  %v8850_v54 = vpack.c.bf16 %v6971_v39, %v8849_v37  ;;  %v8857_v39 = vld [vmem:[#allocation14_spill] sm:$0xff] }
 0x23d   : > { %8841 = vst [vmem:[#allocation30_spill] sm:$0xff] %v7242_v50 }
 0x23e   : > { %8842 = vst [vmem:[#allocation31_spill] sm:$0xff] %v7244_v62 }
 0x240   : > { %v5371_v2 = vpop.f32.mrb[116].mxu0 }
 0x241   : > { %v1525_v23 = vpop.f32.mrb[117].mxu0 }
 0x242   : > { %v5372_v57 = vpop.f32.mrb[118].mxu0  ;;  %5484 = vmatpush3.bf16.xpose.msra.mxu1 %v2117_v29 }
 0x243   : > { %v7250_v12 = vpack.c.bf16 %v5372_v57, %v5371_v2  ;;  %v1528_v47 = vpop.f32.mrb[119].mxu0  ;;  %5533 = vmatprep.subr.bf16.mxu1 %v7067_v25 }
 0x244   : > { %v7252_v59 = vpack.c.bf16 %v1528_v47, %v1525_v23 }
 0x245   : > { %8843 = vst [vmem:[#allocation32_spill] sm:$0xff] %v7250_v12 }
 0x246   : > { %8844 = vst [vmem:[#allocation33_spill] sm:$0xff] %v7252_v59 }
 0x249   : > { %5486 = vmatmul.mubr.msk.bf16.vlgmr.msra.gmra.mrb[104].mxu1 %vm562_vm2, %v8847_v45 }
 0x24a   : > { %5534 = vmatpush3.bf16.msra.mxu1 %v7067_v25  ;;  %5489 = vmatprep.mubr.msk.bf16.mxu1 %vm562_vm2, %v8848_v56  ;;  %v8858_v25 = vld [vmem:[#allocation12_spill] sm:$0xff] }
 0x24b   : > { %5535 = vmatprep.subr.bf16.mxu1 %v7063_v16  ;;  %v8859_v18 = vpack.c.bf16 %v8857_v39, %v8858_v25 }
 0x24e   : > { %5536 = vmatpush3.bf16.msra.mxu1 %v7063_v16  ;;  %v8856_v16 = vpack.c.bf16 %v8854_v55, %v8855_v61 }
 0x24f   : > { %5537 = vmatprep.subr.bf16.mxu1 %v7083_v5 }
 0x251   : > { %5490 = vmatmul.mubr.msk.bf16.gmra.mrb[108].mxu1 %vm562_vm2, %v8850_v54 }
 0x252   : > { %5493 = vmatprep.mubr.msk.bf16.mxu1 %vm562_vm2, %v8853_v35  ;;  %5538 = vmatpush3.bf16.msra.mxu1 %v7083_v5  ;;  %v8861_v5 = vld [vmem:[#allocation11_spill] sm:$0xff] }
 0x253   : > { %5539 = vmatprep.subr.bf16.mxu1 %v7079_v22 }
 0x256   : > { %5540 = vmatpush3.bf16.msra.mxu1 %v7079_v22  ;;  %v8860_v22 = vld [vmem:[#allocation13_spill] sm:$0xff] }
 0x257   : > { %5541 = vmatprep.subr.bf16.mxu1 %v7097_v24  ;;  %v8862_v44 = vpack.c.bf16 %v8860_v22, %v8861_v5 }
 0x259   : > { %5494 = vmatmul.mubr.msk.bf16.gmra.mrb[112].mxu1 %vm562_vm2, %v8856_v16 }
 0x25a   : > { %5497 = vmatprep.mubr.msk.bf16.mxu1 %vm562_vm2, %v8859_v18  ;;  %5542 = vmatpush3.bf16.msra.mxu1 %v7097_v24 }
 0x25b   : > { %5543 = vmatprep.subr.bf16.mxu1 %v7093_v8 }
 0x25e   : > { %5544 = vmatpush3.bf16.msra.mxu1 %v7093_v8  ;;  %v7304_v8 = vld [vmem:[%s8863_s19] ss:$0 sm:$0xff] }
 0x25f   : > { %5545 = vmatprep.subr.bf16.mxu1 %v7113_v42 }
 0x261   : > { %5498 = vmatmul.mubr.msk.bf16.gmra.mrb[116].mxu1 %vm562_vm2, %v8862_v44 }
 0x262   : > { %5546 = vmatpush3.bf16.msra.mxu1 %v7113_v42 }
 0x263   : > { %5547 = vmatprep.subr.bf16.mxu1 %v7109_v28 }
 0x266   : > { %5548 = vmatpush3.bf16.msra.mxu1 %v7109_v28 }
 0x267   : > { %5597 = vmatprep.subr.bf16.mxu1 %v7230_v36 }
 0x29b   : > { %v5391_v24 = vpop.f32.mrb[72].mxu1 }
 0x29c   : > { %v7307_v20 = vadd.f32 %v5391_v24, %v7304_v8  ;;  %v1718_v4 = vpop.f32.mrb[73].mxu1 }
 0x29d   : > { %v5392_v14 = vpop.f32.mrb[74].mxu1  ;;  %v7314_v28 = vadd.f32 %v7304_v8, %v1718_v4 }
 0x29e   : > { %2291 = vmax.xlane.f32.xlu0 %v7307_v20  ;;  %v1721_v42 = vpop.f32.mrb[75].mxu1  ;;  %v7319_v19 = vadd.f32 %v5392_v14, %v7304_v8 }
 0x29f   : > { %v7311_v3 = vadd.f32 %v7304_v8, %v1721_v42 }
 0x2a1   : > { %2289 = vmax.xlane.f32.xlu1 %v7311_v3 }
 0x2a2   : > { %2287 = vmax.xlane.f32.xlu0 %v7314_v28 }
 0x2a3   : > { %v5395_v58 = vpop.f32.mrb[76].mxu1 }
 0x2a4   : > { %v7322_v11 = vadd.f32 %v5395_v58, %v7304_v8  ;;  %v1734_v32 = vpop.f32.mrb[77].mxu1 }
 0x2a5   : > { %v5396_v51 = vpop.f32.mrb[78].mxu1  ;;  %v7327_v26 = vadd.f32 %v7304_v8, %v1734_v32 }
 0x2a6   : > { %2293 = vmax.xlane.f32.xlu0 %v7319_v19  ;;  %2299 = vmax.xlane.f32.xlu1 %v7322_v11  ;;  %v1737_v17 = vpop.f32.mrb[79].mxu1  ;;  %v7330_v38 = vadd.f32 %v5396_v51, %v7304_v8 }
 0x2a7   : > { %v7335_v7 = vadd.f32 %v7304_v8, %v1737_v17 }
 0x2aa   : > { %2295 = vmax.xlane.f32.xlu1 %v7327_v26  ;;  %2301 = vmax.xlane.f32.xlu0 %v7330_v38 }
 0x2ab   : > { %v5399_v49 = vpop.f32.mrb[80].mxu1 }
 0x2ac   : > { %v7338_v53 = vadd.f32 %v5399_v49, %v7304_v8  ;;  %v1750_v10 = vpop.f32.mrb[81].mxu1 }
 0x2ad   : > { %v5400_v52 = vpop.f32.mrb[82].mxu1  ;;  %v7343_v0 = vadd.f32 %v7304_v8, %v1750_v10 }
 0x2ae   : > { %2297 = vmax.xlane.f32.xlu0 %v7335_v7  ;;  %2307 = vmax.xlane.f32.xlu1 %v7338_v53  ;;  %v1753_v30 = vpop.f32.mrb[83].mxu1  ;;  %v7346_v48 = vadd.f32 %v5400_v52, %v7304_v8 }
 0x2af   : > { %v7351_v2 = vadd.f32 %v7304_v8, %v1753_v30 }
 0x2b2   : > { %2303 = vmax.xlane.f32.xlu1 %v7343_v0  ;;  %2309 = vmax.xlane.f32.xlu0 %v7346_v48 }
 0x2b3   : > { %v5403_v13 = vpop.f32.mrb[84].mxu1 }
 0x2b4   : > { %v7354_v23 = vadd.f32 %v5403_v13, %v7304_v8  ;;  %v1766_v29 = vpop.f32.mrb[85].mxu1 }
 0x2b5   : > { %v5404_v57 = vpop.f32.mrb[86].mxu1  ;;  %v7359_v60 = vadd.f32 %v7304_v8, %v1766_v29 }
 0x2b6   : > { %2305 = vmax.xlane.f32.xlu0 %v7351_v2  ;;  %2315 = vmax.xlane.f32.xlu1 %v7354_v23  ;;  %v1769_v47 = vpop.f32.mrb[87].mxu1  ;;  %v7362_v63 = vadd.f32 %v5404_v57, %v7304_v8 }
 0x2b7   : > { %v7367_v45 = vadd.f32 %v7304_v8, %v1769_v47 }
 0x2ba   : > { %2311 = vmax.xlane.f32.xlu1 %v7359_v60  ;;  %2317 = vmax.xlane.f32.xlu0 %v7362_v63 }
 0x2be   : > { %2313 = vmax.xlane.f32.xlu0 %v7367_v45 }
 0x2db   : > { %v5423_v56 = vpop.f32.mrb[88].mxu1 }
 0x2dc   : > { %v7371_v37 = vadd.f32 %v5423_v56, %v7304_v8  ;;  %v5455_v54 = vpop.f32.mrb[120].mxu0  ;;  %v1863_v6 = vpop.f32.mrb[89].mxu1 }
 0x2dd   : > { %v2008_v9 = vpop.f32.mrb[121].mxu0  ;;  %v5424_v35 = vpop.f32.mrb[90].mxu1  ;;  %v7378_v25 = vadd.f32 %v5455_v54, %v7304_v8  ;;  %v7386_v5 = vadd.f32 %v7304_v8, %v1863_v6 }
 0x2de   : > { %v7374_v55 = vadd.f32 %v5424_v35, %v7304_v8  ;;  %v5456_v61 = vpop.f32.mrb[122].mxu0  ;;  %2323 = vmax.xlane.f32.xlu1 %v7371_v37  ;;  %v1866_v16 = vpop.f32.mrb[91].mxu1  ;;  %v7394_v17 = vadd.f32 %v7304_v8, %v2008_v9 }
 0x2df   : > { %v2011_v39 = vpop.f32.mrb[123].mxu0  ;;  %v7382_v18 = vadd.f32 %v5456_v61, %v7304_v8  ;;  %v7390_v42 = vadd.f32 %v7304_v8, %v1866_v16 }
 0x2e0   : > { %2325 = vmax.xlane.f32.xlu0 %v7374_v55  ;;  %v7398_v49 = vadd.f32 %v7304_v8, %v2011_v39 }
 0x2e2   : > { %2355 = vmax.xlane.f32.xlu1 %v7378_v25 }
 0x2e3   : > { %v5427_v22 = vpop.f32.mrb[92].mxu1 }
 0x2e4   : > { %v5459_v44 = vpop.f32.mrb[124].mxu0  ;;  %v1879_v24 = vpop.f32.mrb[93].mxu1  ;;  %2357 = vmax.xlane.f32.xlu0 %v7382_v18  ;;  %v7402_v52 = vadd.f32 %v5427_v22, %v7304_v8 }
 0x2e5   : > { %v2024_v4 = vpop.f32.mrb[125].mxu0  ;;  %v5428_v14 = vpop.f32.mrb[94].mxu1  ;;  %v7410_v9 = vadd.f32 %v5459_v44, %v7304_v8  ;;  %v7418_v16 = vadd.f32 %v7304_v8, %v1879_v24 }
 0x2e6   : > { %v5460_v58 = vpop.f32.mrb[126].mxu0  ;;  %v1882_v32 = vpop.f32.mrb[95].mxu1  ;;  %2319 = vmax.xlane.f32.xlu1 %v7386_v5  ;;  %v7406_v47 = vadd.f32 %v5428_v14, %v7304_v8  ;;  %v7426_v62 = vadd.f32 %v7304_v8, %v2024_v4 }
 0x2e7   : > { %v2027_v51 = vpop.f32.mrb[127].mxu0  ;;  %v7414_v35 = vadd.f32 %v5460_v58, %v7304_v8  ;;  %v7422_v44 = vadd.f32 %v7304_v8, %v1882_v32 }
 0x2e8   : > { %2321 = vmax.xlane.f32.xlu0 %v7390_v42  ;;  %v7430_v24 = vadd.f32 %v7304_v8, %v2027_v51 }
 0x2ea   : > { %2351 = vmax.xlane.f32.xlu1 %v7394_v17 }
 0x2eb   : > { %v5431_v10 = vpop.f32.mrb[96].mxu1 }
 0x2ec   : > { %v5463_v30 = vpop.f32.mrb[128].mxu0  ;;  %v1895_v13 = vpop.f32.mrb[97].mxu1  ;;  %2353 = vmax.xlane.f32.xlu0 %v7398_v49  ;;  %v7434_v40 = vadd.f32 %v5431_v10, %v7304_v8 }
 0x2ed   : > { %v2040_v29 = vpop.f32.mrb[129].mxu0  ;;  %v5432_v57 = vpop.f32.mrb[98].mxu1  ;;  %v7442_v4 = vadd.f32 %v5463_v30, %v7304_v8  ;;  %v7450_v10 = vadd.f32 %v7304_v8, %v1895_v13 }
 0x2ee   : > { %v5464_v56 = vpop.f32.mrb[130].mxu0  ;;  %v1898_v54 = vpop.f32.mrb[99].mxu1  ;;  %2331 = vmax.xlane.f32.xlu1 %v7402_v52  ;;  %v7438_v32 = vadd.f32 %v5432_v57, %v7304_v8  ;;  %v7458_v30 = vadd.f32 %v7304_v8, %v2040_v29 }
 0x2ef   : > { %v2043_v6 = vpop.f32.mrb[131].mxu0  ;;  %v7446_v51 = vadd.f32 %v5464_v56, %v7304_v8  ;;  %v7454_v57 = vadd.f32 %v7304_v8, %v1898_v54 }
 0x2f0   : > { %2333 = vmax.xlane.f32.xlu0 %v7406_v47  ;;  %v7462_v56 = vadd.f32 %v7304_v8, %v2043_v6 }
 0x2f2   : > { %2363 = vmax.xlane.f32.xlu1 %v7410_v9 }
 0x2f3   : > { %v5435_v61 = vpop.f32.mrb[100].mxu1 }
 0x2f4   : > { %v1911_v39 = vpop.f32.mrb[101].mxu1  ;;  %2365 = vmax.xlane.f32.xlu0 %v7414_v35  ;;  %v5467_v22 = vpop.f32.mrb[132].mxu0  ;;  %v7466_v13 = vadd.f32 %v5435_v61, %v7304_v8 }
 0x2f5   : > { %v5436_v14 = vpop.f32.mrb[102].mxu1  ;;  %v2056_v12 = vpop.f32.mrb[133].mxu0  ;;  %v7474_v29 = vadd.f32 %v5467_v22, %v7304_v8  ;;  %v7482_v61 = vadd.f32 %v7304_v8, %v1911_v39 }
 0x2f6   : > { %v1914_v59 = vpop.f32.mrb[103].mxu1  ;;  %2327 = vmax.xlane.f32.xlu1 %v7418_v16  ;;  %v5468_v58 = vpop.f32.mrb[134].mxu0  ;;  %v7470_v54 = vadd.f32 %v5436_v14, %v7304_v8  ;;  %v7490_v22 = vadd.f32 %v7304_v8, %v2056_v12 }
 0x2f7   : > { %v2059_v50 = vpop.f32.mrb[135].mxu0  ;;  %8864 = vst [vmem:[#allocation21_spill] sm:$0xff] %v7474_v29  ;;  %v7478_v6 = vadd.f32 %v5468_v58, %v7304_v8  ;;  %v7486_v14 = vadd.f32 %v7304_v8, %v1914_v59 }
 0x2f8   : > { %2329 = vmax.xlane.f32.xlu0 %v7422_v44  ;;  %v7494_v58 = vadd.f32 %v7304_v8, %v2059_v50 }
 0x2f9   : > { %8865 = vst [vmem:[#allocation19_spill] sm:$0xff] %v7478_v6 }
 0x2fa   : > { %2359 = vmax.xlane.f32.xlu1 %v7426_v62 }
 0x2fc   : > { %2361 = vmax.xlane.f32.xlu0 %v7430_v24 }
 0x2fe   : > { %2339 = vmax.xlane.f32.xlu1 %v7434_v40 }
 0x300   : > { %2341 = vmax.xlane.f32.xlu0 %v7438_v32 }
 0x302   : > { %2371 = vmax.xlane.f32.xlu1 %v7442_v4 }
 0x304   : > { %2373 = vmax.xlane.f32.xlu0 %v7446_v51 }
 0x306   : > { %2335 = vmax.xlane.f32.xlu1 %v7450_v10 }
 0x308   : > { %2337 = vmax.xlane.f32.xlu0 %v7454_v57 }
 0x30a   : > { %2367 = vmax.xlane.f32.xlu1 %v7458_v30 }
 0x30c   : > { %2369 = vmax.xlane.f32.xlu0 %v7462_v56 }
 0x30e   : > { %2347 = vmax.xlane.f32.xlu1 %v7466_v13 }
 0x310   : > { %2349 = vmax.xlane.f32.xlu0 %v7470_v54 }
 0x312   : > { %2379 = vmax.xlane.f32.xlu1 %v7474_v29 }
 0x314   : > { %2381 = vmax.xlane.f32.xlu0 %v7478_v6 }
 0x316   : > { %2343 = vmax.xlane.f32.xlu1 %v7482_v61 }
 0x318   : > { %2345 = vmax.xlane.f32.xlu0 %v7486_v14 }
 0x31a   : > { %2375 = vmax.xlane.f32.xlu1 %v7490_v22 }
 0x31c   : > { %v5487_v1 = vpop.f32.mrb[104].mxu1  ;;  %2377 = vmax.xlane.f32.xlu0 %v7494_v58 }
 0x31d   : > { %v7499_v39 = vadd.f32 %v5487_v1, %v7304_v8  ;;  %v2153_v59 = vpop.f32.mrb[105].mxu1 }
 0x31e   : > { %v5488_v46 = vpop.f32.mrb[106].mxu1  ;;  %v7506_v31 = vadd.f32 %v7304_v8, %v2153_v59 }
 0x31f   : > { %v7502_v36 = vadd.f32 %v5488_v46, %v7304_v8  ;;  %v2156_v12 = vpop.f32.mrb[107].mxu1  ;;  %2387 = vmax.xlane.f32.xlu1 %v7499_v39 }
 0x320   : > { %v7510_v50 = vadd.f32 %v7304_v8, %v2156_v12 }
 0x321   : > { %2389 = vmax.xlane.f32.xlu0 %v7502_v36 }
 0x322   : > { %8866 = vst [vmem:[#allocation23_spill] sm:$0xff] %v7510_v50 }
 0x323   : > { %2383 = vmax.xlane.f32.xlu1 %v7506_v31 }
 0x324   : > { %v5491_v1 = vpop.f32.mrb[108].mxu1 }
 0x325   : > { %v7514_v34 = vadd.f32 %v5491_v1, %v7304_v8  ;;  %v2169_v27 = vpop.f32.mrb[109].mxu1  ;;  %2385 = vmax.xlane.f32.xlu0 %v7510_v50 }
 0x326   : > { %v5492_v46 = vpop.f32.mrb[110].mxu1  ;;  %v7522_v41 = vadd.f32 %v7304_v8, %v2169_v27 }
 0x327   : > { %8867 = vst [vmem:[#allocation10_spill] sm:$0xff] %v7514_v34  ;;  %v7518_v21 = vadd.f32 %v5492_v46, %v7304_v8  ;;  %2395 = vmax.xlane.f32.xlu1 %v7514_v34  ;;  %v2172_v59 = vpop.f32.mrb[111].mxu1 }
 0x328   : > { %8869 = vst [vmem:[#allocation9_spill] sm:$0xff] %v7522_v41  ;;  %v7526_v12 = vadd.f32 %v7304_v8, %v2172_v59 }
 0x329   : > { %8868 = vst [vmem:[#allocation8_spill] sm:$0xff] %v7518_v21  ;;  %2397 = vmax.xlane.f32.xlu0 %v7518_v21 }
 0x32a   : > { %8870 = vst [vmem:[#allocation7_spill] sm:$0xff] %v7526_v12 }
 0x32b   : > { %2391 = vmax.xlane.f32.xlu1 %v7522_v41  ;;  %v2292_v1 = vpop.xlane.xlu0 %2291 }
 0x32c   : > { %v2417_v43 = vsub.f32 %v7307_v20, %v2292_v1  ;;  %v5495_v15 = vpop.f32.mrb[112].mxu1 }
 0x32d   : > { %v7531_v46 = vadd.f32 %v5495_v15, %v7304_v8  ;;  %v2185_v33 = vpop.f32.mrb[113].mxu1  ;;  %2393 = vmax.xlane.f32.xlu0 %v7526_v12 }
 0x32e   : > { %v5496_v6 = vpop.f32.mrb[114].mxu1  ;;  %v2290_v27 = vpop.xlane.xlu1 %2289  ;;  %v2483_v41 = vmul.f32 1.442695, %v2417_v43  ;;  %v7540_v20 = vadd.f32 %v7304_v8, %v2185_v33 }
 0x32f   : > { %v7535_v29 = vadd.f32 %v5496_v6, %v7304_v8  ;;  %v2188_v21 = vpop.f32.mrb[115].mxu1  ;;  %2403 = vmax.xlane.f32.xlu1 %v7531_v46  ;;  %v2288_v59 = vpop.xlane.xlu0 %2287  ;;  %v2416_v15 = vsub.f32 %v7311_v3, %v2290_v27 }
 0x330   : > { %v2415_v34 = vsub.f32 %v7314_v28, %v2288_v59  ;;  %8872 = vst [vmem:[#allocation12_spill] sm:$0xff] %v7540_v20  ;;  %v7545_v1 = vadd.f32 %v7304_v8, %v2188_v21  ;;  %5918 = vpow2.f32 %v2483_v41 }
 0x331   : > { %8871 = vst [vmem:[#allocation14_spill] sm:$0xff] %v7535_v29  ;;  %2405 = vmax.xlane.f32.xlu0 %v7535_v29  ;;  %v2481_v27 = vmul.f32 1.442695, %v2416_v15 }
 0x332   : > { %v2479_v12 = vmul.f32 1.442695, %v2415_v34 }
 0x333   : > { %2399 = vmax.xlane.f32.xlu1 %v7540_v20  ;;  %v2294_v6 = vpop.xlane.xlu0 %2293  ;;  %v2300_v50 = vpop.xlane.xlu1 %2299 }
 0x334   : > { %v2418_v43 = vsub.f32 %v7319_v19, %v2294_v6  ;;  %v2421_v28 = vsub.f32 %v7322_v11, %v2300_v50  ;;  %v5499_v59 = vpop.f32.mrb[116].mxu1  ;;  %5920 = vpow2.f32 %v2479_v12 }
 0x335   : > { %v7551_v33 = vadd.f32 %v5499_v59, %v7304_v8  ;;  %v2201_v29 = vpop.f32.mrb[117].mxu1  ;;  %2401 = vmax.xlane.f32.xlu0 %v7545_v1 }
 0x336   : > { %v2485_v3 = vmul.f32 1.442695, %v2418_v43  ;;  %v5500_v21 = vpop.f32.mrb[118].mxu1  ;;  %v2491_v19 = vmul.f32 1.442695, %v2421_v28  ;;  %v7560_v6 = vadd.f32 %v7304_v8, %v2201_v29 }
 0x337   : > { %v7555_v34 = vadd.f32 %v5500_v21, %v7304_v8  ;;  %v2204_v20 = vpop.f32.mrb[119].mxu1  ;;  %2411 = vmax.xlane.f32.xlu1 %v7551_v33  ;;  %v2296_v41 = vpop.xlane.xlu1 %2295 }
 0x338   : > { %5922 = vpow2.f32 %v2485_v3  ;;  %v2419_v11 = vsub.f32 %v7327_v26, %v2296_v41  ;;  %v2302_v50 = vpop.xlane.xlu0 %2301  ;;  %v7565_v12 = vadd.f32 %v7304_v8, %v2204_v20 }
 0x339   : > { %v2422_v43 = vsub.f32 %v7330_v38, %v2302_v50  ;;  %2413 = vmax.xlane.f32.xlu0 %v7555_v34  ;;  %5924 = vpow2.f32 %v2481_v27 }
 0x33a   : > { %v2487_v15 = vmul.f32 1.442695, %v2419_v11  ;;  %5926 = vpow2.f32 %v2491_v19  ;;  %v7571_v38 = vpop.eup %5918 }
 0x33b   : > { %2407 = vmax.xlane.f32.xlu1 %v7560_v6  ;;  %v2308_v59 = vpop.xlane.xlu1 %2307  ;;  %v2493_v28 = vmul.f32 1.442695, %v2422_v43 }
 0x33c   : > { %v2298_v3 = vpop.xlane.xlu0 %2297  ;;  %v2425_v26 = vsub.f32 %v7338_v53, %v2308_v59  ;;  %5928 = vpow2.f32 %v2487_v15 }
 0x33d   : > { %v2420_v29 = vsub.f32 %v7335_v7, %v2298_v3  ;;  %2409 = vmax.xlane.f32.xlu0 %v7565_v12  ;;  %5930 = vpow2.f32 %v2493_v28 }
 0x33e   : > { %v2499_v21 = vmul.f32 1.442695, %v2425_v26  ;;  %v7575_v19 = vpop.eup %5920 }
 0x33f   : > { %2611 = vadd.xlane.f32.xlu1 %v7571_v38  ;;  %v2304_v8 = vpop.xlane.xlu1 %2303  ;;  %v2489_v20 = vmul.f32 1.442695, %v2420_v29 }
 0x340   : > { %v2423_v27 = vsub.f32 %v7343_v0, %v2304_v8  ;;  %v2310_v41 = vpop.xlane.xlu0 %2309  ;;  %5932 = vpow2.f32 %v2499_v21 }
 0x341   : > { %v2426_v53 = vsub.f32 %v7346_v48, %v2310_v41  ;;  %5934 = vpow2.f32 %v2489_v20 }
 0x342   : > { %v7578_v11 = vpop.eup %5922  ;;  %v2495_v7 = vmul.f32 1.442695, %v2423_v27 }
 0x343   : > { %2607 = vadd.xlane.f32.xlu1 %v7575_v19  ;;  %v2316_v50 = vpop.xlane.xlu1 %2315  ;;  %2613 = vadd.xlane.f32.xlu0 %v7578_v11  ;;  %v2501_v43 = vmul.f32 1.442695, %v2426_v53  ;;  %v7583_v0 = vpop.eup %5924 }
 0x344   : > { %v2306_v15 = vpop.xlane.xlu0 %2305  ;;  %v2429_v59 = vsub.f32 %v7354_v23, %v2316_v50  ;;  %v7586_v3 = vpop.eup %5926  ;;  %5936 = vpow2.f32 %v2495_v7 }
 0x345   : > { %v2424_v28 = vsub.f32 %v7351_v2, %v2306_v15  ;;  %5938 = vpow2.f32 %v2501_v43 }
 0x346   : > { %v2507_v48 = vmul.f32 1.442695, %v2429_v59  ;;  %v7591_v20 = vpop.eup %5928 }
 0x347   : > { %2619 = vadd.xlane.f32.xlu1 %v7586_v3  ;;  %v2312_v26 = vpop.xlane.xlu1 %2311  ;;  %2609 = vadd.xlane.f32.xlu0 %v7583_v0  ;;  %v2497_v29 = vmul.f32 1.442695, %v2424_v28  ;;  %v7594_v27 = vpop.eup %5930 }
 0x348   : > { %v2427_v21 = vsub.f32 %v7359_v60, %v2312_v26  ;;  %v2318_v8 = vpop.xlane.xlu0 %2317  ;;  %5940 = vpow2.f32 %v2507_v48 }
 0x349   : > { %v2430_v23 = vsub.f32 %v7362_v63, %v2318_v8  ;;  %5942 = vpow2.f32 %v2497_v29 }
 0x34a   : > { %v2503_v2 = vmul.f32 1.442695, %v2427_v21  ;;  %v7598_v7 = vpop.eup %5932 }
 0x34b   : > { %2615 = vadd.xlane.f32.xlu1 %v7591_v20  ;;  %2621 = vadd.xlane.f32.xlu0 %v7594_v27  ;;  %v2509_v41 = vmul.f32 1.442695, %v2430_v23  ;;  %8873 = vst [vmem:[#allocation13_spill] sm:$0xff] %v7598_v7  ;;  %v7601_v50 = vpop.eup %5934 }
 0x34c   : > { %v2314_v53 = vpop.xlane.xlu0 %2313  ;;  %5944 = vpow2.f32 %v2503_v2 }
 0x34d   : > { %v2428_v60 = vsub.f32 %v7367_v45, %v2314_v53  ;;  %5946 = vpow2.f32 %v2509_v41 }
 0x34e   : > { %v7605_v43 = vpop.eup %5936 }
 0x34f   : > { %2627 = vadd.xlane.f32.xlu1 %v7598_v7  ;;  %2617 = vadd.xlane.f32.xlu0 %v7601_v50  ;;  %v2505_v63 = vmul.f32 1.442695, %v2428_v60  ;;  %v7607_v15 = vpop.eup %5938 }
 0x351   : > { %5948 = vpow2.f32 %v2505_v63 }
 0x352   : > { %v7611_v59 = vpop.eup %5940 }
 0x353   : > { %2623 = vadd.xlane.f32.xlu1 %v7605_v43  ;;  %2629 = vadd.xlane.f32.xlu0 %v7607_v15  ;;  %8874 = vst [vmem:[#allocation11_spill] sm:$0xff] %v7611_v59  ;;  %v7613_v45 = vpop.eup %5942 }
 0x356   : > { %v7617_v28 = vpop.eup %5944 }
 0x357   : > { %2635 = vadd.xlane.f32.xlu1 %v7611_v59  ;;  %2625 = vadd.xlane.f32.xlu0 %v7613_v45  ;;  %8875 = vst [vmem:[#allocation34_spill] sm:$0xff] %v7617_v28  ;;  %v7619_v48 = vpop.eup %5946 }
 0x358   : > { %8876 = vst [vmem:[#allocation35_spill] sm:$0xff] %v7619_v48 }
 0x35b   : > { %2631 = vadd.xlane.f32.xlu1 %v7617_v28  ;;  %2637 = vadd.xlane.f32.xlu0 %v7619_v48  ;;  %v7623_v26 = vpop.eup %5948 }
 0x35c   : > { %8877 = vst [vmem:[#allocation36_spill] sm:$0xff] %v7623_v26 }
 0x35f   : > { %2633 = vadd.xlane.f32.xlu0 %v7623_v26 }
 0x36b   : > { %v2324_v29 = vpop.xlane.xlu1 %2323 }
 0x36c   : > { %v2433_v21 = vsub.f32 %v7371_v37, %v2324_v29 }
 0x36d   : > { %v2326_v8 = vpop.xlane.xlu0 %2325 }
 0x36e   : > { %v2515_v23 = vmul.f32 1.442695, %v2433_v21  ;;  %v2434_v2 = vsub.f32 %v7374_v55, %v2326_v8 }
 0x36f   : > { %v2356_v41 = vpop.xlane.xlu1 %2355 }
 0x370   : > { %5950 = vpow2.f32 %v2515_v23  ;;  %v2517_v53 = vmul.f32 1.442695, %v2434_v2  ;;  %v2449_v60 = vsub.f32 %v7378_v25, %v2356_v41 }
 0x371   : > { %v2358_v63 = vpop.xlane.xlu0 %2357 }
 0x372   : > { %5952 = vpow2.f32 %v2517_v53  ;;  %v2547_v59 = vmul.f32 1.442695, %v2449_v60  ;;  %v2450_v48 = vsub.f32 %v7382_v18, %v2358_v63 }
 0x373   : > { %v2320_v28 = vpop.xlane.xlu1 %2319 }
 0x374   : > { %5954 = vpow2.f32 %v2547_v59  ;;  %v2549_v26 = vmul.f32 1.442695, %v2450_v48  ;;  %v2431_v7 = vsub.f32 %v7386_v5, %v2320_v28 }
 0x375   : > { %v2322_v37 = vpop.xlane.xlu0 %2321 }
 0x376   : > { %5956 = vpow2.f32 %v2549_v26  ;;  %v2511_v29 = vmul.f32 1.442695, %v2431_v7  ;;  %v2432_v55 = vsub.f32 %v7390_v42, %v2322_v37 }
 0x377   : > { %v2352_v21 = vpop.xlane.xlu1 %2351 }
 0x378   : > { %5958 = vpow2.f32 %v2511_v29  ;;  %v2513_v8 = vmul.f32 1.442695, %v2432_v55  ;;  %v2447_v25 = vsub.f32 %v7394_v17, %v2352_v21 }
 0x379   : > { %v2354_v23 = vpop.xlane.xlu0 %2353 }
 0x37a   : > { %v7633_v2 = vpop.eup %5950  ;;  %5960 = vpow2.f32 %v2513_v8  ;;  %v2543_v18 = vmul.f32 1.442695, %v2447_v25  ;;  %v2448_v59 = vsub.f32 %v7398_v49, %v2354_v23 }
 0x37b   : > { %v2332_v48 = vpop.xlane.xlu1 %2331  ;;  %2643 = vadd.xlane.f32.xlu1 %v7633_v2 }
 0x37c   : > { %v7637_v5 = vpop.eup %5952  ;;  %5962 = vpow2.f32 %v2543_v18  ;;  %v2545_v7 = vmul.f32 1.442695, %v2448_v59  ;;  %v2437_v42 = vsub.f32 %v7402_v52, %v2332_v48 }
 0x37d   : > { %v2334_v28 = vpop.xlane.xlu0 %2333  ;;  %2645 = vadd.xlane.f32.xlu0 %v7637_v5 }
 0x37e   : > { %v7641_v17 = vpop.eup %5954  ;;  %5964 = vpow2.f32 %v2545_v7  ;;  %v2523_v26 = vmul.f32 1.442695, %v2437_v42  ;;  %v2438_v41 = vsub.f32 %v7406_v47, %v2334_v28 }
 0x37f   : > { %v2364_v53 = vpop.xlane.xlu1 %2363  ;;  %2675 = vadd.xlane.f32.xlu1 %v7641_v17 }
 0x380   : > { %v7645_v49 = vpop.eup %5956  ;;  %5966 = vpow2.f32 %v2523_v26  ;;  %v2525_v60 = vmul.f32 1.442695, %v2438_v41  ;;  %v2453_v63 = vsub.f32 %v7410_v9, %v2364_v53 }
 0x381   : > { %v2366_v37 = vpop.xlane.xlu0 %2365  ;;  %2677 = vadd.xlane.f32.xlu0 %v7645_v49 }
 0x382   : > { %v7649_v52 = vpop.eup %5958  ;;  %5968 = vpow2.f32 %v2525_v60  ;;  %v2555_v29 = vmul.f32 1.442695, %v2453_v63  ;;  %v2454_v55 = vsub.f32 %v7414_v35, %v2366_v37 }
 0x383   : > { %v2328_v21 = vpop.xlane.xlu1 %2327  ;;  %2639 = vadd.xlane.f32.xlu1 %v7649_v52 }
 0x384   : > { %v7653_v47 = vpop.eup %5960  ;;  %5970 = vpow2.f32 %v2555_v29  ;;  %v2557_v8 = vmul.f32 1.442695, %v2454_v55  ;;  %v2435_v25 = vsub.f32 %v7418_v16, %v2328_v21 }
 0x385   : > { %v2330_v23 = vpop.xlane.xlu0 %2329  ;;  %2641 = vadd.xlane.f32.xlu0 %v7653_v47 }
 0x386   : > { %v7657_v9 = vpop.eup %5962  ;;  %5972 = vpow2.f32 %v2557_v8  ;;  %v2519_v18 = vmul.f32 1.442695, %v2435_v25  ;;  %v2436_v59 = vsub.f32 %v7422_v44, %v2330_v23 }
 0x387   : > { %v2360_v48 = vpop.xlane.xlu1 %2359  ;;  %2671 = vadd.xlane.f32.xlu1 %v7657_v9 }
 0x388   : > { %v7661_v35 = vpop.eup %5964  ;;  %5974 = vpow2.f32 %v2519_v18  ;;  %v2521_v7 = vmul.f32 1.442695, %v2436_v59  ;;  %v2451_v42 = vsub.f32 %v7426_v62, %v2360_v48 }
 0x389   : > { %v2362_v28 = vpop.xlane.xlu0 %2361  ;;  %2673 = vadd.xlane.f32.xlu0 %v7661_v35 }
 0x38a   : > { %v7665_v16 = vpop.eup %5966  ;;  %5976 = vpow2.f32 %v2521_v7  ;;  %v2551_v26 = vmul.f32 1.442695, %v2451_v42  ;;  %v2452_v41 = vsub.f32 %v7430_v24, %v2362_v28 }
 0x38b   : > { %v2340_v53 = vpop.xlane.xlu1 %2339  ;;  %2651 = vadd.xlane.f32.xlu1 %v7665_v16 }
 0x38c   : > { %v7669_v44 = vpop.eup %5968  ;;  %5978 = vpow2.f32 %v2551_v26  ;;  %v2553_v60 = vmul.f32 1.442695, %v2452_v41  ;;  %v2441_v63 = vsub.f32 %v7434_v40, %v2340_v53 }
 0x38d   : > { %v2342_v37 = vpop.xlane.xlu0 %2341  ;;  %2653 = vadd.xlane.f32.xlu0 %v7669_v44 }
 0x38e   : > { %v7673_v62 = vpop.eup %5970  ;;  %5980 = vpow2.f32 %v2553_v60  ;;  %v2531_v29 = vmul.f32 1.442695, %v2441_v63  ;;  %v2442_v55 = vsub.f32 %v7438_v32, %v2342_v37 }
 0x38f   : > { %v2372_v21 = vpop.xlane.xlu1 %2371  ;;  %2683 = vadd.xlane.f32.xlu1 %v7673_v62 }
 0x390   : > { %v7677_v24 = vpop.eup %5972  ;;  %5982 = vpow2.f32 %v2531_v29  ;;  %v2533_v8 = vmul.f32 1.442695, %v2442_v55  ;;  %v2457_v25 = vsub.f32 %v7442_v4, %v2372_v21 }
 0x391   : > { %v2374_v23 = vpop.xlane.xlu0 %2373  ;;  %2685 = vadd.xlane.f32.xlu0 %v7677_v24 }
 0x392   : > { %v7681_v40 = vpop.eup %5974  ;;  %5984 = vpow2.f32 %v2533_v8  ;;  %v2563_v18 = vmul.f32 1.442695, %v2457_v25  ;;  %v2458_v59 = vsub.f32 %v7446_v51, %v2374_v23 }
 0x393   : > { %v2336_v48 = vpop.xlane.xlu1 %2335  ;;  %2647 = vadd.xlane.f32.xlu1 %v7681_v40 }
 0x394   : > { %v7685_v32 = vpop.eup %5976  ;;  %5986 = vpow2.f32 %v2563_v18  ;;  %v2565_v7 = vmul.f32 1.442695, %v2458_v59  ;;  %v2439_v42 = vsub.f32 %v7450_v10, %v2336_v48 }
 0x395   : > { %v2338_v28 = vpop.xlane.xlu0 %2337  ;;  %2649 = vadd.xlane.f32.xlu0 %v7685_v32 }
 0x396   : > { %v7689_v4 = vpop.eup %5978  ;;  %5988 = vpow2.f32 %v2565_v7  ;;  %v2527_v26 = vmul.f32 1.442695, %v2439_v42  ;;  %v2440_v41 = vsub.f32 %v7454_v57, %v2338_v28 }
 0x397   : > { %v2368_v53 = vpop.xlane.xlu1 %2367  ;;  %2679 = vadd.xlane.f32.xlu1 %v7689_v4 }
 0x398   : > { %v7693_v51 = vpop.eup %5980  ;;  %5990 = vpow2.f32 %v2527_v26  ;;  %v2529_v60 = vmul.f32 1.442695, %v2440_v41  ;;  %v2455_v63 = vsub.f32 %v7458_v30, %v2368_v53 }
 0x399   : > { %v2370_v37 = vpop.xlane.xlu0 %2369  ;;  %2681 = vadd.xlane.f32.xlu0 %v7693_v51 }
 0x39a   : > { %v7697_v10 = vpop.eup %5982  ;;  %5992 = vpow2.f32 %v2529_v60  ;;  %v2559_v29 = vmul.f32 1.442695, %v2455_v63  ;;  %v2456_v55 = vsub.f32 %v7462_v56, %v2370_v37 }
 0x39b   : > { %v2348_v21 = vpop.xlane.xlu1 %2347  ;;  %2659 = vadd.xlane.f32.xlu1 %v7697_v10 }
 0x39c   : > { %v7701_v57 = vpop.eup %5984  ;;  %5994 = vpow2.f32 %v2559_v29  ;;  %v2561_v8 = vmul.f32 1.442695, %v2456_v55  ;;  %v2445_v25 = vsub.f32 %v7466_v13, %v2348_v21 }
 0x39d   : > { %v2350_v23 = vpop.xlane.xlu0 %2349  ;;  %2661 = vadd.xlane.f32.xlu0 %v7701_v57 }
 0x39e   : > { %v7705_v30 = vpop.eup %5986  ;;  %5996 = vpow2.f32 %v2561_v8  ;;  %v2539_v18 = vmul.f32 1.442695, %v2445_v25  ;;  %v2446_v59 = vsub.f32 %v7470_v54, %v2350_v23 }
 0x39f   : > { %v7708_v48 = vpop.xlane.xlu1 %2379  ;;  %2691 = vadd.xlane.f32.xlu1 %v7705_v30 }
 0x3a0   : > { %v7711_v56 = vpop.eup %5988  ;;  %5998 = vpow2.f32 %v2539_v18  ;;  %v2541_v7 = vmul.f32 1.442695, %v2446_v59 }
 0x3a1   : > { %v7713_v42 = vpop.xlane.xlu0 %2381  ;;  %2693 = vadd.xlane.f32.xlu0 %v7711_v56 }
 0x3a2   : > { %v7716_v13 = vpop.eup %5990  ;;  %6000 = vpow2.f32 %v2541_v7 }
 0x3a3   : > { %v2344_v28 = vpop.xlane.xlu1 %2343  ;;  %2655 = vadd.xlane.f32.xlu1 %v7716_v13 }
 0x3a4   : > { %v7719_v26 = vpop.eup %5992  ;;  %v2443_v54 = vsub.f32 %v7482_v61, %v2344_v28 }
 0x3a5   : > { %v2346_v41 = vpop.xlane.xlu0 %2345  ;;  %2657 = vadd.xlane.f32.xlu0 %v7719_v26 }
 0x3a6   : > { %v7723_v53 = vpop.eup %5994  ;;  %v2535_v60 = vmul.f32 1.442695, %v2443_v54  ;;  %v2444_v63 = vsub.f32 %v7486_v14, %v2346_v41 }
 0x3a7   : > { %2687 = vadd.xlane.f32.xlu1 %v7723_v53  ;;  %v2376_v37 = vpop.xlane.xlu1 %2375 }
 0x3a8   : > { %v7727_v29 = vpop.eup %5996  ;;  %6002 = vpow2.f32 %v2535_v60  ;;  %v2537_v55 = vmul.f32 1.442695, %v2444_v63  ;;  %v2459_v21 = vsub.f32 %v7490_v22, %v2376_v37 }
 0x3a9   : > { %2689 = vadd.xlane.f32.xlu0 %v7727_v29  ;;  %v2378_v61 = vpop.xlane.xlu0 %2377 }
 0x3aa   : > { %v7731_v8 = vpop.eup %5998  ;;  %6004 = vpow2.f32 %v2537_v55  ;;  %v2567_v25 = vmul.f32 1.442695, %v2459_v21  ;;  %v2460_v23 = vsub.f32 %v7494_v58, %v2378_v61  ;;  %v8878_v21 = vld [vmem:[#allocation23_spill] sm:$0xff] }
 0x3ab   : > { %2667 = vadd.xlane.f32.xlu1 %v7731_v8 }
 0x3ac   : > { %v7735_v14 = vpop.eup %6000  ;;  %6006 = vpow2.f32 %v2567_v25  ;;  %v2569_v18 = vmul.f32 1.442695, %v2460_v23  ;;  %v2388_v59 = vpop.xlane.xlu1 %2387 }
 0x3ad   : > { %v2465_v7 = vsub.f32 %v7499_v39, %v2388_v59  ;;  %2669 = vadd.xlane.f32.xlu0 %v7735_v14 }
 0x3ae   : > { %6008 = vpow2.f32 %v2569_v18  ;;  %v2390_v22 = vpop.xlane.xlu0 %2389 }
 0x3af   : > { %v2579_v28 = vmul.f32 1.442695, %v2465_v7  ;;  %v2466_v54 = vsub.f32 %v7502_v36, %v2390_v22  ;;  %v8879_v36 = vld [vmem:[#allocation10_spill] sm:$0xff]  ;;  %v8880_v22 = vld [vmem:[#allocation8_spill] sm:$0xff] }
 0x3b0   : > { %v2384_v41 = vpop.xlane.xlu1 %2383 }
 0x3b1   : > { %6010 = vpow2.f32 %v2579_v28  ;;  %v2581_v60 = vmul.f32 1.442695, %v2466_v54  ;;  %v2463_v58 = vsub.f32 %v7506_v31, %v2384_v41 }
 0x3b2   : > { %v7741_v63 = vpop.eup %6002  ;;  %v2386_v37 = vpop.xlane.xlu0 %2385 }
 0x3b3   : > { %6012 = vpow2.f32 %v2581_v60  ;;  %v2575_v55 = vmul.f32 1.442695, %v2463_v58  ;;  %v2464_v61 = vsub.f32 %v8878_v21, %v2386_v37  ;;  %2663 = vadd.xlane.f32.xlu1 %v7741_v63  ;;  %v8881_v58 = vld [vmem:[#allocation9_spill] sm:$0xff] }
 0x3b4   : > { %v7745_v39 = vpop.eup %6004  ;;  %v2396_v25 = vpop.xlane.xlu1 %2395 }
 0x3b5   : > { %6014 = vpow2.f32 %v2575_v55  ;;  %v2577_v23 = vmul.f32 1.442695, %v2464_v61  ;;  %v2469_v18 = vsub.f32 %v8879_v36, %v2396_v25  ;;  %2665 = vadd.xlane.f32.xlu0 %v7745_v39  ;;  %v8883_v25 = vld [vmem:[#allocation7_spill] sm:$0xff] }
 0x3b6   : > { %v7749_v59 = vpop.eup %6006  ;;  %v2398_v31 = vpop.xlane.xlu0 %2397 }
 0x3b7   : > { %6016 = vpow2.f32 %v2577_v23  ;;  %v2587_v7 = vmul.f32 1.442695, %v2469_v18  ;;  %v2470_v28 = vsub.f32 %v8880_v22, %v2398_v31  ;;  %2695 = vadd.xlane.f32.xlu1 %v7749_v59 }
 0x3b8   : > { %v7753_v54 = vpop.eup %6008  ;;  %v2392_v41 = vpop.xlane.xlu1 %2391 }
 0x3b9   : > { %6018 = vpow2.f32 %v2587_v7  ;;  %v2589_v60 = vmul.f32 1.442695, %v2470_v28  ;;  %v2467_v37 = vsub.f32 %v8881_v58, %v2392_v41  ;;  %2697 = vadd.xlane.f32.xlu0 %v7753_v54 }
 0x3ba   : > { %v2394_v55 = vpop.xlane.xlu0 %2393 }
 0x3bb   : > { %v7757_v21 = vpop.eup %6010  ;;  %6020 = vpow2.f32 %v2589_v60  ;;  %v2583_v61 = vmul.f32 1.442695, %v2467_v37  ;;  %v2468_v23 = vsub.f32 %v8883_v25, %v2394_v55  ;;  %v8886_v60 = vld [vmem:[#allocation14_spill] sm:$0xff]  ;;  %v8887_v25 = vld [vmem:[#allocation21_spill] sm:$0xff] }
 0x3bc   : > { %8882 = vst [vmem:[#allocation23_spill] sm:$0xff] %v7757_v21  ;;  %2707 = vadd.xlane.f32.xlu1 %v7757_v21  ;;  %v2404_v36 = vpop.xlane.xlu1 %2403 }
 0x3bd   : > { %v7761_v18 = vpop.eup %6012  ;;  %6022 = vpow2.f32 %v2583_v61  ;;  %v2585_v31 = vmul.f32 1.442695, %v2468_v23  ;;  %v2473_v7 = vsub.f32 %v7531_v46, %v2404_v36  ;;  %v2461_v61 = vsub.f32 %v8887_v25, %v7708_v48  ;;  %v8888_v46 = vld [vmem:[#allocation12_spill] sm:$0xff] }
 0x3be   : > { %8884 = vst [vmem:[#allocation10_spill] sm:$0xff] %v7761_v18  ;;  %2709 = vadd.xlane.f32.xlu0 %v7761_v18  ;;  %v2406_v22 = vpop.xlane.xlu0 %2405 }
 0x3bf   : > { %v7765_v28 = vpop.eup %6014  ;;  %6024 = vpow2.f32 %v2585_v31  ;;  %v2595_v41 = vmul.f32 1.442695, %v2473_v7  ;;  %v2474_v58 = vsub.f32 %v8886_v60, %v2406_v22  ;;  %v8889_v31 = vld [vmem:[#allocation19_spill] sm:$0xff] }
 0x3c0   : > { %8885 = vst [vmem:[#allocation8_spill] sm:$0xff] %v7765_v28  ;;  %2703 = vadd.xlane.f32.xlu1 %v7765_v28  ;;  %v2400_v37 = vpop.xlane.xlu1 %2399  ;;  %v2462_v7 = vsub.f32 %v8889_v31, %v7713_v42 }
 0x3c1   : > { %v7769_v55 = vpop.eup %6016  ;;  %6026 = vpow2.f32 %v2595_v41  ;;  %v2597_v23 = vmul.f32 1.442695, %v2474_v58  ;;  %v2471_v36 = vsub.f32 %v8888_v46, %v2400_v37  ;;  %v2571_v41 = vmul.f32 1.442695, %v2461_v61 }
 0x3c2   : > { %2705 = vadd.xlane.f32.xlu0 %v7769_v55  ;;  %v2402_v21 = vpop.xlane.xlu0 %2401  ;;  %v2573_v46 = vmul.f32 1.442695, %v2462_v7 }
 0x3c3   : > { %v7775_v18 = vpop.eup %6018  ;;  %6028 = vpow2.f32 %v2597_v23  ;;  %v2591_v22 = vmul.f32 1.442695, %v2471_v36  ;;  %v2472_v60 = vsub.f32 %v7545_v1, %v2402_v21 }
 0x3c4   : > { %2715 = vadd.xlane.f32.xlu1 %v7775_v18  ;;  %v2412_v28 = vpop.xlane.xlu1 %2411 }
 0x3c5   : > { %v7781_v48 = vpop.eup %6020  ;;  %6030 = vpow2.f32 %v2591_v22  ;;  %v2593_v58 = vmul.f32 1.442695, %v2472_v60  ;;  %v2477_v1 = vsub.f32 %v7551_v33, %v2412_v28 }
 0x3c6   : > { %2717 = vadd.xlane.f32.xlu0 %v7781_v48  ;;  %v2414_v37 = vpop.xlane.xlu0 %2413 }
 0x3c7   : > { %v7784_v25 = vpop.eup %6022  ;;  %6032 = vpow2.f32 %v2593_v58  ;;  %v2478_v61 = vsub.f32 %v7555_v34, %v2414_v37 }
 0x3c8   : > { %2711 = vadd.xlane.f32.xlu1 %v7784_v25  ;;  %v2408_v42 = vpop.xlane.xlu1 %2407  ;;  %6034 = vpow2.f32 %v2571_v41  ;;  %v2603_v41 = vmul.f32 1.442695, %v2477_v1 }
 0x3c9   : > { %v7787_v23 = vpop.eup %6024  ;;  %v2475_v21 = vsub.f32 %v7560_v6, %v2408_v42  ;;  %6036 = vpow2.f32 %v2573_v46  ;;  %v2605_v6 = vmul.f32 1.442695, %v2478_v61 }
 0x3ca   : > { %2713 = vadd.xlane.f32.xlu0 %v7787_v23  ;;  %v2410_v36 = vpop.xlane.xlu0 %2409 }
 0x3cb   : > { %v7793_v31 = vpop.eup %6026  ;;  %v2599_v7 = vmul.f32 1.442695, %v2475_v21  ;;  %v2476_v22 = vsub.f32 %v7565_v12, %v2410_v36 }
 0x3cc   : > { %8890 = vst [vmem:[#allocation9_spill] sm:$0xff] %v7793_v31  ;;  %2723 = vadd.xlane.f32.xlu1 %v7793_v31  ;;  %v2612_v60 = vpop.xlane.xlu1 %2611 }
 0x3cd   : > { %v7797_v58 = vpop.eup %6028  ;;  %6038 = vpow2.f32 %v2599_v7  ;;  %v2601_v33 = vmul.f32 1.442695, %v2476_v22 }
 0x3ce   : > { %2725 = vadd.xlane.f32.xlu0 %v7797_v58 }
 0x3cf   : > { %v7800_v34 = vpop.eup %6030  ;;  %6040 = vpow2.f32 %v2601_v33 }
 0x3d0   : > { %8891 = vst [vmem:[#allocation7_spill] sm:$0xff] %v7800_v34  ;;  %2719 = vadd.xlane.f32.xlu1 %v7800_v34  ;;  %v2608_v28 = vpop.xlane.xlu1 %2607  ;;  %v2614_v37 = vpop.xlane.xlu0 %2613  ;;  %6042 = vpow2.f32 %v2603_v41 }
 0x3d1   : > { %v7803_v46 = vpop.eup %6032  ;;  %6044 = vpow2.f32 %v2605_v6 }
 0x3d2   : > { %8892 = vst [vmem:[#allocation14_spill] sm:$0xff] %v7803_v46  ;;  %2721 = vadd.xlane.f32.xlu0 %v7803_v46  ;;  %v7806_v12 = vpop.eup %6034  ;;  %6046 = vrcp.f32 %v2614_v37 }
 0x3d3   : > { %8893 = vst [vmem:[#allocation21_spill] sm:$0xff] %v7806_v12  ;;  %6048 = vrcp.f32 %v2608_v28  ;;  %v7809_v21 = vpop.eup %6036 }
 0x3d4   : > { %2699 = vadd.xlane.f32.xlu1 %v7806_v12  ;;  %v2620_v42 = vpop.xlane.xlu1 %2619  ;;  %v2610_v1 = vpop.xlane.xlu0 %2609  ;;  %8894 = vst [vmem:[#allocation12_spill] sm:$0xff] %v7809_v21  ;;  %6050 = vrcp.f32 %v2612_v60 }
 0x3d5   : > { %6052 = vrcp.f32 %v2610_v1 }
 0x3d6   : > { %2701 = vadd.xlane.f32.xlu0 %v7809_v21 }
 0x3d7   : > { %v7812_v61 = vpop.eup %6038 }
 0x3d8   : > { %8895 = vst [vmem:[#allocation19_spill] sm:$0xff] %v7812_v61  ;;  %2727 = vadd.xlane.f32.xlu1 %v7812_v61  ;;  %v2616_v36 = vpop.xlane.xlu1 %2615  ;;  %v2622_v7 = vpop.xlane.xlu0 %2621 }
 0x3d9   : > { %v7815_v22 = vpop.eup %6040  ;;  %6054 = vrcp.f32 %v2622_v7 }
 0x3da   : > { %8896 = vst [vmem:[#allocation37_spill] sm:$0xff] %v7815_v22  ;;  %2729 = vadd.xlane.f32.xlu0 %v7815_v22  ;;  %v7818_v41 = vpop.eup %6042  ;;  %6056 = vrcp.f32 %v2616_v36 }
 0x3db   : > { %8897 = vst [vmem:[#allocation38_spill] sm:$0xff] %v7818_v41  ;;  %v7820_v33 = vpop.eup %6044  ;;  %6058 = vrcp.f32 %v2620_v42 }
 0x3dc   : > { %8898 = vst [vmem:[#allocation39_spill] sm:$0xff] %v7820_v33  ;;  %2731 = vadd.xlane.f32.xlu1 %v7818_v41  ;;  %v2628_v60 = vpop.xlane.xlu1 %2627  ;;  %v2618_v6 = vpop.xlane.xlu0 %2617 }
 0x3dd   : > { %v6047_v28 = vpop.eup %6046  ;;  %6060 = vrcp.f32 %v2618_v6 }
 0x3de   : > { %v6049_v37 = vpop.eup %6048  ;;  %2733 = vadd.xlane.f32.xlu0 %v7820_v33  ;;  %v2802_v22 = vmul.f32 %v6047_v28, %v7578_v11  ;;  %v8899_v28 = vld [vmem:[#allocation25_spill] sm:$0xff] }
 0x3df   : > { %v6051_v1 = vpop.eup %6050  ;;  %v2799_v7 = vmul.f32 %v6049_v37, %v7575_v19  ;;  %v8900_v37 = vld [vmem:[#allocation24_spill] sm:$0xff] }
 0x3e0   : > { %v6053_v61 = vpop.eup %6052  ;;  %v2624_v21 = vpop.xlane.xlu1 %2623  ;;  %v2801_v41 = vmul.f32 %v6051_v1, %v7571_v38 }
 0x3e1   : > { %v2630_v12 = vpop.xlane.xlu0 %2629  ;;  %v2800_v36 = vmul.f32 %v6053_v61, %v7583_v0 }
 0x3e2   : > { %6062 = vrcp.f32 %v2630_v12  ;;  %v2864_v6 = vpack.c.bf16 %v2802_v22, %v2801_v41  ;;  %v8901_v22 = vld [vmem:[#allocation27_spill] sm:$0xff] }
 0x3e3   : > { %v2863_v31 = vpack.c.bf16 %v2800_v36, %v2799_v7  ;;  %6064 = vrcp.f32 %v2624_v21  ;;  %v6055_v34 = vpop.eup %6054  ;;  %v8903_v36 = vld [vmem:[#allocation13_spill] sm:$0xff] }
 0x3e4   : > { %v2636_v42 = vpop.xlane.xlu1 %2635  ;;  %6066 = vrcp.f32 %v2628_v60  ;;  %v6057_v33 = vpop.eup %6056  ;;  %v2806_v12 = vmul.f32 %v6055_v34, %v7594_v27  ;;  %v8902_v34 = vld [vmem:[#allocation26_spill] sm:$0xff] }
 0x3e5   : > { %v2626_v46 = vpop.xlane.xlu0 %2625  ;;  %5517 = vmatprep.mubr.bf16.mxu0 %v2863_v31  ;;  %v6059_v11 = vpop.eup %6058  ;;  %v2803_v21 = vmul.f32 %v6057_v33, %v7591_v20 }
 0x3e6   : > { %6068 = vrcp.f32 %v2626_v46  ;;  %5518 = vmatmul.mubr.bf16.vlgmr.msra.gmra.mrb[136].mxu0 %v2864_v6  ;;  %v2805_v31 = vmul.f32 %v6059_v11, %v7586_v3 }
 0x3e7   : > { %5566 = vmatpush3.bf16.msra.mxu0 %v8899_v28  ;;  %v6061_v19 = vpop.eup %6060  ;;  %v8904_v28 = vld [vmem:[#allocation29_spill] sm:$0xff] }
 0x3e8   : > { %5567 = vmatprep.subr.bf16.mxu0 %v8900_v37  ;;  %v2632_v0 = vpop.xlane.xlu1 %2631  ;;  %v2804_v61 = vmul.f32 %v6061_v19, %v7601_v50  ;;  %v2866_v60 = vpack.c.bf16 %v2806_v12, %v2805_v31  ;;  %v8907_v12 = vld [vmem:[#allocation36_spill] sm:$0xff] }
 0x3e9   : > { %v2638_v38 = vpop.xlane.xlu0 %2637  ;;  %6070 = vrcp.f32 %v2632_v0 }
 0x3ea   : > { %6072 = vrcp.f32 %v2638_v38  ;;  %v2865_v46 = vpack.c.bf16 %v2804_v61, %v2803_v21  ;;  %v8908_v61 = vld [vmem:[#allocation35_spill] sm:$0xff] }
 0x3eb   : > { %5568 = vmatpush3.bf16.msra.mxu0 %v8900_v37  ;;  %6074 = vrcp.f32 %v2636_v42 }
 0x3ec   : > { %5569 = vmatprep.subr.bf16.mxu0 %v8901_v22  ;;  %v6063_v1 = vpop.eup %6062  ;;  %5521 = vmatprep.mubr.bf16.mxu0 %v2865_v46 }
 0x3ed   : > { %v2634_v41 = vpop.xlane.xlu0 %2633  ;;  %v6065_v27 = vpop.eup %6064  ;;  %v2810_v3 = vmul.f32 %v6063_v1, %v7607_v15  ;;  %v8905_v15 = vld [vmem:[#allocation28_spill] sm:$0xff] }
 0x3ee   : > { %6076 = vrcp.f32 %v2634_v41  ;;  %5522 = vmatmul.mubr.bf16.gmra.mrb[140].mxu0 %v2866_v60  ;;  %v6067_v20 = vpop.eup %6066  ;;  %v2807_v33 = vmul.f32 %v6065_v27, %v7605_v43  ;;  %v8906_v43 = vld [vmem:[#allocation34_spill] sm:$0xff]  ;;  %v8910_v60 = vld [vmem:[#allocation15_spill] sm:$0xff]  ;;  %v8911_v27 = vld [vmem:[#allocation16_spill] sm:$0xff] }
 0x3ef   : > { %5570 = vmatpush3.bf16.msra.mxu0 %v8901_v22  ;;  %v2809_v42 = vmul.f32 %v6067_v20, %v8903_v36  ;;  %v8909_v22 = vld [vmem:[#allocation11_spill] sm:$0xff] }
 0x3f0   : > { %v6069_v50 = vpop.eup %6068  ;;  %5571 = vmatprep.subr.bf16.mxu0 %v8902_v34 }
 0x3f1   : > { %v2808_v7 = vmul.f32 %v6069_v50, %v7613_v45  ;;  %v2868_v19 = vpack.c.bf16 %v2810_v3, %v2809_v42 }
 0x3f3   : > { %5572 = vmatpush3.bf16.msra.mxu0 %v8902_v34  ;;  %v2867_v6 = vpack.c.bf16 %v2808_v7, %v2807_v33  ;;  %v6071_v11 = vpop.eup %6070 }
 0x3f4   : > { %5573 = vmatprep.subr.bf16.mxu0 %v8904_v28  ;;  %v6073_v37 = vpop.eup %6072  ;;  %v2811_v45 = vmul.f32 %v6071_v11, %v8906_v43 }
 0x3f5   : > { %5525 = vmatprep.mubr.bf16.mxu0 %v2867_v6  ;;  %v6075_v0 = vpop.eup %6074  ;;  %v2814_v31 = vmul.f32 %v6073_v37, %v8908_v61 }
 0x3f6   : > { %5526 = vmatmul.mubr.bf16.gmra.mrb[144].mxu0 %v2868_v19  ;;  %v2813_v41 = vmul.f32 %v6075_v0, %v8909_v22 }
 0x3f7   : > { %5574 = vmatpush3.bf16.msra.mxu0 %v8904_v28 }
 0x3f8   : > { %v6077_v38 = vpop.eup %6076  ;;  %5575 = vmatprep.subr.bf16.mxu0 %v8905_v15  ;;  %v2870_v1 = vpack.c.bf16 %v2814_v31, %v2813_v41 }
 0x3f9   : > { %v2812_v21 = vmul.f32 %v6077_v38, %v8907_v12 }
 0x3fb   : > { %v2869_v46 = vpack.c.bf16 %v2812_v21, %v2811_v45  ;;  %5576 = vmatpush3.bf16.msra.mxu0 %v8905_v15 }
 0x3fc   : > { %5577 = vmatprep.subr.bf16.mxu0 %v8910_v60 }
 0x3fd   : > { %5529 = vmatprep.mubr.bf16.mxu0 %v2869_v46 }
 0x3fe   : > { %5530 = vmatmul.mubr.bf16.gmra.mrb[148].mxu0 %v2870_v1 }
 0x3ff   : > { %5578 = vmatpush3.bf16.msra.mxu0 %v8910_v60 }
 0x400   : > { %5579 = vmatprep.subr.bf16.mxu0 %v8911_v27 }
 0x403   : > { %5580 = vmatpush3.bf16.msra.mxu0 %v8911_v27 }
 0x408   : > { %v2644_v20 = vpop.xlane.xlu1 %2643 }
 0x40a   : > { %v2646_v50 = vpop.xlane.xlu0 %2645 }
 0x40b   : > { %6078 = vrcp.f32 %v2646_v50 }
 0x40c   : > { %v2676_v34 = vpop.xlane.xlu1 %2675 }
 0x40e   : > { %v2678_v3 = vpop.xlane.xlu0 %2677 }
 0x410   : > { %v2640_v33 = vpop.xlane.xlu1 %2639 }
 0x411   : > { %6080 = vrcp.f32 %v2640_v33 }
 0x412   : > { %6082 = vrcp.f32 %v2644_v20  ;;  %v2642_v7 = vpop.xlane.xlu0 %2641 }
 0x413   : > { %6084 = vrcp.f32 %v2642_v7 }
 0x414   : > { %6086 = vrcp.f32 %v2678_v3  ;;  %v2672_v36 = vpop.xlane.xlu1 %2671 }
 0x415   : > { %6088 = vrcp.f32 %v2672_v36  ;;  %v6079_v11 = vpop.eup %6078 }
 0x416   : > { %6090 = vrcp.f32 %v2676_v34  ;;  %v2674_v42 = vpop.xlane.xlu0 %2673  ;;  %v2818_v15 = vmul.f32 %v6079_v11, %v7637_v5 }
 0x417   : > { %6092 = vrcp.f32 %v2674_v42 }
 0x418   : > { %v2652_v6 = vpop.xlane.xlu1 %2651 }
 0x41a   : > { %v2654_v28 = vpop.xlane.xlu0 %2653 }
 0x41b   : > { %v6081_v19 = vpop.eup %6080  ;;  %6094 = vrcp.f32 %v2654_v28  ;;  %v8915_v28 = vld [vmem:[#allocation22_spill] sm:$0xff] }
 0x41c   : > { %v6083_v37 = vpop.eup %6082  ;;  %v2684_v0 = vpop.xlane.xlu1 %2683  ;;  %v2815_v12 = vmul.f32 %v6081_v19, %v7649_v52 }
 0x41d   : > { %v6085_v38 = vpop.eup %6084  ;;  %v2817_v31 = vmul.f32 %v6083_v37, %v7633_v2  ;;  %v8912_v2 = vld [vmem:[#allocation17_spill] sm:$0xff] }
 0x41e   : > { %v6087_v43 = vpop.eup %6086  ;;  %v2686_v45 = vpop.xlane.xlu0 %2685  ;;  %v2816_v21 = vmul.f32 %v6085_v38, %v7653_v47 }
 0x41f   : > { %v6089_v61 = vpop.eup %6088  ;;  %v2834_v1 = vmul.f32 %v6087_v43, %v7645_v49  ;;  %v2872_v27 = vpack.c.bf16 %v2818_v15, %v2817_v31  ;;  %v8913_v49 = vld [vmem:[#allocation18_spill] sm:$0xff] }
 0x420   : > { %v6091_v46 = vpop.eup %6090  ;;  %v2648_v22 = vpop.xlane.xlu1 %2647  ;;  %v2871_v41 = vpack.c.bf16 %v2816_v21, %v2815_v12  ;;  %v2831_v20 = vmul.f32 %v6089_v61, %v7657_v9 }
 0x421   : > { %v6093_v60 = vpop.eup %6092  ;;  %6096 = vrcp.f32 %v2648_v22  ;;  %v2833_v47 = vmul.f32 %v6091_v46, %v7641_v17  ;;  %v8914_v17 = vld [vmem:[#allocation20_spill] sm:$0xff]  ;;  %v8916_v46 = vld [vmem:[#allocation31_spill] sm:$0xff] }
 0x422   : > { %6098 = vrcp.f32 %v2652_v6  ;;  %5549 = vmatprep.mubr.bf16.mxu1 %v2871_v41  ;;  %v2650_v5 = vpop.xlane.xlu0 %2649  ;;  %v2832_v52 = vmul.f32 %v6093_v60, %v7661_v35 }
 0x423   : > { %6100 = vrcp.f32 %v2650_v5  ;;  %5550 = vmatmul.mubr.bf16.vlgmr.msra.gmra.mrb[120].mxu1 %v2872_v27  ;;  %v2880_v3 = vpack.c.bf16 %v2834_v1, %v2833_v47  ;;  %v8917_v27 = vld [vmem:[#allocation30_spill] sm:$0xff] }
 0x424   : > { %6102 = vrcp.f32 %v2686_v45  ;;  %5598 = vmatpush3.bf16.msra.mxu1 %v8912_v2  ;;  %v2680_v50 = vpop.xlane.xlu1 %2679  ;;  %v2879_v34 = vpack.c.bf16 %v2832_v52, %v2831_v20 }
 0x425   : > { %6104 = vrcp.f32 %v2680_v50  ;;  %5599 = vmatprep.subr.bf16.mxu1 %v8913_v49  ;;  %v6095_v35 = vpop.eup %6094  ;;  %v8919_v50 = vld [vmem:[#allocation32_spill] sm:$0xff] }
 0x426   : > { %6106 = vrcp.f32 %v2684_v0  ;;  %5581 = vmatprep.mubr.bf16.mxu0 %v2879_v34  ;;  %v2682_v33 = vpop.xlane.xlu0 %2681  ;;  %v2822_v19 = vmul.f32 %v6095_v35, %v7669_v44 }
 0x427   : > { %6108 = vrcp.f32 %v2682_v33  ;;  %5582 = vmatmul.mubr.bf16.vlgmr.msra.gmra.mrb[152].mxu0 %v2880_v3 }
 0x428   : > { %5600 = vmatpush3.bf16.msra.mxu1 %v8913_v49  ;;  %v2660_v9 = vpop.xlane.xlu1 %2659 }
 0x429   : > { %5601 = vmatprep.subr.bf16.mxu1 %v8914_v17 }
 0x42a   : > { %v2662_v7 = vpop.xlane.xlu0 %2661 }
 0x42b   : > { %v6097_v36 = vpop.eup %6096  ;;  %6110 = vrcp.f32 %v2662_v7 }
 0x42c   : > { %v6099_v42 = vpop.eup %6098  ;;  %5602 = vmatpush3.bf16.msra.mxu1 %v8914_v17  ;;  %v2692_v6 = vpop.xlane.xlu1 %2691  ;;  %v2819_v38 = vmul.f32 %v6097_v36, %v7681_v40 }
 0x42d   : > { %v6101_v11 = vpop.eup %6100  ;;  %5603 = vmatprep.subr.bf16.mxu1 %v8915_v28  ;;  %v2821_v45 = vmul.f32 %v6099_v42, %v7665_v16 }
 0x42e   : > { %v6103_v37 = vpop.eup %6102  ;;  %v2694_v0 = vpop.xlane.xlu0 %2693  ;;  %v2820_v15 = vmul.f32 %v6101_v11, %v7685_v32 }
 0x42f   : > { %v6105_v43 = vpop.eup %6104  ;;  %v2874_v44 = vpack.c.bf16 %v2822_v19, %v2821_v45  ;;  %v2838_v22 = vmul.f32 %v6103_v37, %v7677_v24 }
 0x430   : > { %v6107_v12 = vpop.eup %6106  ;;  %5604 = vmatpush3.bf16.msra.mxu1 %v8915_v28  ;;  %v2656_v21 = vpop.xlane.xlu1 %2655  ;;  %v2873_v61 = vpack.c.bf16 %v2820_v15, %v2819_v38  ;;  %v2835_v32 = vmul.f32 %v6105_v43, %v7689_v4  ;;  %v8918_v4 = vld [vmem:[#allocation33_spill] sm:$0xff] }
 0x431   : > { %v6109_v31 = vpop.eup %6108  ;;  %6112 = vrcp.f32 %v2656_v21  ;;  %5605 = vmatprep.subr.bf16.mxu1 %v8916_v46  ;;  %v2837_v41 = vmul.f32 %v6107_v12, %v7673_v62 }
 0x432   : > { %6114 = vrcp.f32 %v2660_v9  ;;  %5553 = vmatprep.mubr.bf16.mxu1 %v2873_v61  ;;  %v2658_v40 = vpop.xlane.xlu0 %2657  ;;  %v2836_v16 = vmul.f32 %v6109_v31, %v7693_v51 }
 0x433   : > { %6116 = vrcp.f32 %v2658_v40  ;;  %5554 = vmatmul.mubr.bf16.gmra.mrb[124].mxu1 %v2874_v44  ;;  %v2882_v24 = vpack.c.bf16 %v2838_v22, %v2837_v41 }
 0x434   : > { %6118 = vrcp.f32 %v2694_v0  ;;  %5606 = vmatpush3.bf16.msra.mxu1 %v8916_v46  ;;  %v2688_v60 = vpop.xlane.xlu1 %2687  ;;  %v2881_v1 = vpack.c.bf16 %v2836_v16, %v2835_v32 }
 0x435   : > { %6120 = vrcp.f32 %v2688_v60  ;;  %5607 = vmatprep.subr.bf16.mxu1 %v8917_v27  ;;  %v6111_v51 = vpop.eup %6110 }
 0x436   : > { %6122 = vrcp.f32 %v2692_v6  ;;  %5585 = vmatprep.mubr.bf16.mxu0 %v2881_v1  ;;  %v2690_v5 = vpop.xlane.xlu0 %2689  ;;  %v2826_v34 = vmul.f32 %v6111_v51, %v7701_v57 }
 0x437   : > { %6124 = vrcp.f32 %v2690_v5  ;;  %5586 = vmatmul.mubr.bf16.gmra.mrb[156].mxu0 %v2882_v24 }
 0x438   : > { %5608 = vmatpush3.bf16.msra.mxu1 %v8917_v27  ;;  %v2668_v52 = vpop.xlane.xlu1 %2667 }
 0x439   : > { %5609 = vmatprep.subr.bf16.mxu1 %v8918_v4 }
 0x43a   : > { %v2670_v2 = vpop.xlane.xlu0 %2669 }
 0x43b   : > { %v6113_v62 = vpop.eup %6112  ;;  %6126 = vrcp.f32 %v2670_v2 }
 0x43c   : > { %v6115_v20 = vpop.eup %6114  ;;  %5610 = vmatpush3.bf16.msra.mxu1 %v8918_v4  ;;  %v2823_v3 = vmul.f32 %v6113_v62, %v7716_v13  ;;  %v8920_v4 = vld [vmem:[#allocation10_spill] sm:$0xff]  ;;  %v8921_v62 = vld [vmem:[#allocation8_spill] sm:$0xff] }
 0x43d   : > { %v6117_v47 = vpop.eup %6116  ;;  %5611 = vmatprep.subr.bf16.mxu1 %v8919_v50  ;;  %v2825_v17 = vmul.f32 %v6115_v20, %v7697_v10 }
 0x43e   : > { %v6119_v49 = vpop.eup %6118  ;;  %v2824_v33 = vmul.f32 %v6117_v47, %v7719_v26 }
 0x43f   : > { %v6121_v9 = vpop.eup %6120  ;;  %v2876_v6 = vpack.c.bf16 %v2826_v34, %v2825_v17  ;;  %v2842_v11 = vmul.f32 %v6119_v49, %v7711_v56 }
 0x440   : > { %v6123_v35 = vpop.eup %6122  ;;  %5612 = vmatpush3.bf16.msra.mxu1 %v8919_v50  ;;  %v2664_v7 = vpop.xlane.xlu1 %2663  ;;  %v2875_v36 = vpack.c.bf16 %v2824_v33, %v2823_v3  ;;  %v2839_v13 = vmul.f32 %v6121_v9, %v7723_v53 }
 0x441   : > { %v6125_v42 = vpop.eup %6124  ;;  %6128 = vrcp.f32 %v2664_v7  ;;  %v2841_v10 = vmul.f32 %v6123_v35, %v7705_v30 }
 0x442   : > { %6130 = vrcp.f32 %v2668_v52  ;;  %5557 = vmatprep.mubr.bf16.mxu1 %v2875_v36  ;;  %v2666_v57 = vpop.xlane.xlu0 %2665  ;;  %v2840_v26 = vmul.f32 %v6125_v42, %v7727_v29  ;;  %v8922_v52 = vld [vmem:[#allocation23_spill] sm:$0xff] }
 0x443   : > { %6132 = vrcp.f32 %v2666_v57  ;;  %5558 = vmatmul.mubr.bf16.gmra.mrb[128].mxu1 %v2876_v6  ;;  %v2884_v37 = vpack.c.bf16 %v2842_v11, %v2841_v10 }
 0x444   : > { %v2696_v28 = vpop.xlane.xlu1 %2695  ;;  %v2883_v19 = vpack.c.bf16 %v2840_v26, %v2839_v13 }
 0x445   : > { %6134 = vrcp.f32 %v2696_v28  ;;  %v6127_v38 = vpop.eup %6126 }
 0x446   : > { %5589 = vmatprep.mubr.bf16.mxu0 %v2883_v19  ;;  %v2698_v0 = vpop.xlane.xlu0 %2697  ;;  %v2830_v12 = vmul.f32 %v6127_v38, %v7735_v14 }
 0x447   : > { %6136 = vrcp.f32 %v2698_v0  ;;  %5590 = vmatmul.mubr.bf16.gmra.mrb[160].mxu0 %v2884_v37  ;;  %v8923_v0 = vld [vmem:[#allocation7_spill] sm:$0xff] }
 0x449   : > { %v2708_v56 = vpop.xlane.xlu1 %2707 }
 0x44b   : > { %v6129_v15 = vpop.eup %6128  ;;  %v2710_v43 = vpop.xlane.xlu0 %2709 }
 0x44c   : > { %v6131_v45 = vpop.eup %6130  ;;  %6138 = vrcp.f32 %v2710_v43  ;;  %v2827_v30 = vmul.f32 %v6129_v15, %v7741_v63  ;;  %v8925_v43 = vld [vmem:[#allocation9_spill] sm:$0xff] }
 0x44d   : > { %v6133_v53 = vpop.eup %6132  ;;  %v2704_v29 = vpop.xlane.xlu1 %2703  ;;  %v2829_v46 = vmul.f32 %v6131_v45, %v7731_v8 }
 0x44e   : > { %6140 = vrcp.f32 %v2704_v29  ;;  %v2828_v21 = vmul.f32 %v6133_v53, %v7745_v39 }
 0x44f   : > { %v6135_v61 = vpop.eup %6134  ;;  %6142 = vrcp.f32 %v2708_v56  ;;  %v2706_v31 = vpop.xlane.xlu0 %2705  ;;  %v2878_v32 = vpack.c.bf16 %v2830_v12, %v2829_v46 }
 0x450   : > { %6144 = vrcp.f32 %v2706_v31  ;;  %v2877_v44 = vpack.c.bf16 %v2828_v21, %v2827_v30  ;;  %v2843_v16 = vmul.f32 %v6135_v61, %v7749_v59  ;;  %v8926_v30 = vld [vmem:[#allocation21_spill] sm:$0xff]  ;;  %v8927_v61 = vld [vmem:[#allocation12_spill] sm:$0xff] }
 0x451   : > { %v6137_v22 = vpop.eup %6136  ;;  %v2716_v40 = vpop.xlane.xlu1 %2715 }
 0x452   : > { %5561 = vmatprep.mubr.bf16.mxu1 %v2877_v44  ;;  %v2844_v14 = vmul.f32 %v6137_v22, %v7753_v54  ;;  %v8928_v22 = vld [vmem:[#allocation19_spill] sm:$0xff] }
 0x453   : > { %v2718_v41 = vpop.xlane.xlu0 %2717  ;;  %5562 = vmatmul.mubr.bf16.gmra.mrb[132].mxu1 %v2878_v32  ;;  %v8929_v32 = vld [vmem:[#allocation37_spill] sm:$0xff] }
 0x454   : > { %v2885_v63 = vpack.c.bf16 %v2844_v14, %v2843_v16  ;;  %6146 = vrcp.f32 %v2718_v41 }
 0x455   : > { %v2712_v39 = vpop.xlane.xlu1 %2711 }
 0x456   : > { %6148 = vrcp.f32 %v2712_v39  ;;  %5593 = vmatprep.mubr.bf16.mxu0 %v2885_v63  ;;  %v6139_v60 = vpop.eup %6138  ;;  %v8930_v39 = vld [vmem:[#allocation38_spill] sm:$0xff] }
 0x457   : > { %6150 = vrcp.f32 %v2716_v40  ;;  %v2714_v8 = vpop.xlane.xlu0 %2713  ;;  %v2850_v51 = vmul.f32 %v6139_v60, %v8920_v4 }
 0x458   : > { %v6141_v1 = vpop.eup %6140  ;;  %6152 = vrcp.f32 %v2714_v8  ;;  %v8931_v8 = vld [vmem:[#allocation39_spill] sm:$0xff] }
 0x459   : > { %v6143_v27 = vpop.eup %6142  ;;  %v2724_v24 = vpop.xlane.xlu1 %2723  ;;  %v2847_v54 = vmul.f32 %v6141_v1, %v8921_v62 }
 0x45a   : > { %v6145_v5 = vpop.eup %6144  ;;  %v2849_v47 = vmul.f32 %v6143_v27, %v8922_v52 }
 0x45b   : > { %v2726_v59 = vpop.xlane.xlu0 %2725  ;;  %v2848_v20 = vmul.f32 %v6145_v5, %v7769_v55 }
 0x45c   : > { %6154 = vrcp.f32 %v2726_v59  ;;  %v2888_v34 = vpack.c.bf16 %v2850_v51, %v2849_v47 }
 0x45d   : > { %v2720_v2 = vpop.xlane.xlu1 %2719  ;;  %v2887_v50 = vpack.c.bf16 %v2848_v20, %v2847_v54 }
 0x45e   : > { %6156 = vrcp.f32 %v2720_v2  ;;  %v6147_v49 = vpop.eup %6146 }
 0x45f   : > { %6158 = vrcp.f32 %v2724_v24  ;;  %5613 = vmatprep.mubr.bf16.mxu1 %v2887_v50  ;;  %v2722_v3 = vpop.xlane.xlu0 %2721  ;;  %v2854_v55 = vmul.f32 %v6147_v49, %v7781_v48 }
 0x460   : > { %v6149_v33 = vpop.eup %6148  ;;  %6160 = vrcp.f32 %v2722_v3  ;;  %5614 = vmatmul.mubr.bf16.vlgmr.msra.gmra.mrb[136].mxu1 %v2888_v34 }
 0x461   : > { %v6151_v9 = vpop.eup %6150  ;;  %v2700_v17 = vpop.xlane.xlu1 %2699  ;;  %v2851_v36 = vmul.f32 %v6149_v33, %v7784_v25 }
 0x462   : > { %v6153_v35 = vpop.eup %6152  ;;  %6162 = vrcp.f32 %v2700_v17  ;;  %v2853_v6 = vmul.f32 %v6151_v9, %v7775_v18  ;;  %v8924_v18 = vld [vmem:[#allocation14_spill] sm:$0xff] }
 0x463   : > { %v2702_v7 = vpop.xlane.xlu0 %2701  ;;  %v2852_v42 = vmul.f32 %v6153_v35, %v7787_v23 }
 0x464   : > { %6164 = vrcp.f32 %v2702_v7  ;;  %v2890_v13 = vpack.c.bf16 %v2854_v55, %v2853_v6 }
 0x465   : > { %v2728_v11 = vpop.xlane.xlu1 %2727  ;;  %v2889_v57 = vpack.c.bf16 %v2852_v42, %v2851_v36 }
 0x466   : > { %6166 = vrcp.f32 %v2728_v11  ;;  %v6155_v26 = vpop.eup %6154 }
 0x467   : > { %v2730_v10 = vpop.xlane.xlu0 %2729  ;;  %5617 = vmatprep.mubr.bf16.mxu1 %v2889_v57  ;;  %v2858_v25 = vmul.f32 %v6155_v26, %v7797_v58 }
 0x468   : > { %v6157_v28 = vpop.eup %6156  ;;  %6168 = vrcp.f32 %v2730_v10  ;;  %5618 = vmatmul.mubr.bf16.gmra.mrb[140].mxu1 %v2890_v13 }
 0x469   : > { %v6159_v19 = vpop.eup %6158  ;;  %v2732_v48 = vpop.xlane.xlu1 %2731  ;;  %v2855_v56 = vmul.f32 %v6157_v28, %v8923_v0 }
 0x46a   : > { %v6161_v37 = vpop.eup %6160  ;;  %6170 = vrcp.f32 %v2732_v48  ;;  %v2857_v45 = vmul.f32 %v6159_v19, %v8925_v43  ;;  %v5906_v43 = vld [vmem:[%s6408_s14] sm:$0xff]  }
 0x46b   : > { %v2734_v23 = vpop.xlane.xlu0 %2733  ;;  %v2856_v38 = vmul.f32 %v6161_v37, %v8924_v18  ;;  %5629 = vmatprep.subr.bf16.mxu0 %v5906_v43 }
 0x46c   : > { %v6163_v15 = vpop.eup %6162  ;;  %6172 = vrcp.f32 %v2734_v23  ;;  %v2892_v12 = vpack.c.bf16 %v2858_v25, %v2857_v45  ;;  %5630 = vmatpush3.bf16.msra.mxu0 %v5906_v43 }
 0x46d   : > { %v2891_v53 = vpack.c.bf16 %v2856_v38, %v2855_v56  ;;  %v2845_v21 = vmul.f32 %v6163_v15, %v8926_v30 }
 0x46e   : > { %v6165_v29 = vpop.eup %6164 }
 0x46f   : > { %5621 = vmatprep.mubr.bf16.mxu1 %v2891_v53  ;;  %v2846_v31 = vmul.f32 %v6165_v29, %v8927_v61 }
 0x470   : > { %v6167_v46 = vpop.eup %6166  ;;  %5622 = vmatmul.mubr.bf16.gmra.mrb[144].mxu1 %v2892_v12 }
 0x471   : > { %v2886_v58 = vpack.c.bf16 %v2846_v31, %v2845_v21  ;;  %v2859_v40 = vmul.f32 %v6167_v46, %v8928_v22 }
 0x472   : > { %v6169_v44 = vpop.eup %6168 }
 0x473   : > { %5594 = vmatmul.mubr.bf16.gmra.mrb[164].mxu0 %v2886_v58  ;;  %v2860_v16 = vmul.f32 %v6169_v44, %v8929_v32 }
 0x474   : > { %v6171_v14 = vpop.eup %6170 }
 0x475   : > { %v2893_v41 = vpack.c.bf16 %v2860_v16, %v2859_v40  ;;  %v2861_v60 = vmul.f32 %v6171_v14, %v8930_v39  ;;  %v5907_v39 = vld [vmem:[%s6408_s14 + $0x8] sm:$0xff]  }
 0x476   : > { %v6173_v63 = vpop.eup %6172  ;;  %5631 = vmatprep.subr.bf16.mxu0 %v5907_v39 }
 0x477   : > { %5625 = vmatprep.mubr.bf16.mxu1 %v2893_v41  ;;  %v2862_v1 = vmul.f32 %v6173_v63, %v8931_v8  ;;  %5632 = vmatpush3.bf16.msra.mxu0 %v5907_v39 }
 0x479   : > { %v2894_v27 = vpack.c.bf16 %v2862_v1, %v2861_v60 }
 0x47b   : > { %5626 = vmatmul.mubr.bf16.gmra.mrb[148].mxu1 %v2894_v27 }
 0x4b9   : > { %v7918_v24 = vpop.f32.mrb[136].mxu0 }
 0x4ba   : > { %v7920_v5 = vpop.f32.mrb[137].mxu0 }
 0x4bb   : > { %v7922_v4 = vpop.f32.mrb[138].mxu0 }
 0x4bc   : > { %v7924_v51 = vpop.f32.mrb[139].mxu0 }
 0x4c1   : > { %v7926_v59 = vpop.f32.mrb[140].mxu0 }
 0x4c2   : > { %v7928_v62 = vpop.f32.mrb[141].mxu0 }
 0x4c3   : > { %v7930_v54 = vpop.f32.mrb[142].mxu0 }
 0x4c4   : > { %v7932_v20 = vpop.f32.mrb[143].mxu0 }
 0x4c9   : > { %v7934_v52 = vpop.f32.mrb[144].mxu0 }
 0x4ca   : > { %v7936_v47 = vpop.f32.mrb[145].mxu0 }
 0x4cb   : > { %v7938_v2 = vpop.f32.mrb[146].mxu0 }
 0x4cc   : > { %v7940_v50 = vpop.f32.mrb[147].mxu0 }
 0x4d1   : > { %v7942_v34 = vpop.f32.mrb[148].mxu0 }
 0x4d2   : > { %v7944_v49 = vpop.f32.mrb[149].mxu0 }
 0x4d3   : > { %v7946_v3 = vpop.f32.mrb[150].mxu0 }
 0x4d4   : > { %v7948_v33 = vpop.f32.mrb[151].mxu0 }
 0x4f6   : > { %v5551_v9 = vpop.f32.mrb[120].mxu1 }
 0x4f7   : > { %v3026_v17 = vpop.f32.mrb[121].mxu1 }
 0x4f8   : > { %v5552_v35 = vpop.f32.mrb[122].mxu1 }
 0x4f9   : > { %v5786_v55 = vpack.i.bf16 %v5552_v35, %v5551_v9  ;;  %v3029_v7 = vpop.f32.mrb[123].mxu1 }
 0x4fa   : > { %v5796_v36 = vpack.i.bf16 %v3029_v7, %v3026_v17  ;;  %v5583_v42 = vpop.f32.mrb[152].mxu0 }
 0x4fb   : > { %5787 = vrot.lane.b32.xlu0 %v5786_v55, %s6298_s28  ;;  %v3123_v6 = vpop.f32.mrb[153].mxu0 }
 0x4fc   : > { %v5584_v11 = vpop.f32.mrb[154].mxu0 }
 0x4fd   : > { %v5791_v57 = vpack.i.bf16 %v5584_v11, %v5583_v42  ;;  %v3126_v13 = vpop.f32.mrb[155].mxu0 }
 0x4fe   : > { %v5801_v26 = vpack.i.bf16 %v3126_v13, %v3123_v6 }
 0x4ff   : > { %5792 = vrot.lane.b32.xlu1 %v5791_v57, %s6299_s21 }
 0x503   : > { %5797 = vrot.lane.b32.xlu1 %v5796_v36, %s6298_s28 }
 0x506   : > { %v5555_v10 = vpop.f32.mrb[124].mxu1 }
 0x507   : > { %5802 = vrot.lane.b32.xlu1 %v5801_v26, %s6299_s21  ;;  %v3042_v28 = vpop.f32.mrb[125].mxu1 }
 0x508   : > { %v5556_v19 = vpop.f32.mrb[126].mxu1 }
 0x509   : > { %v5806_v48 = vpack.i.bf16 %v5556_v19, %v5555_v10  ;;  %v3045_v37 = vpop.f32.mrb[127].mxu1 }
 0x50a   : > { %v5816_v25 = vpack.i.bf16 %v3045_v37, %v3042_v28  ;;  %v5587_v23 = vpop.f32.mrb[156].mxu0 }
 0x50b   : > { %5807 = vrot.lane.b32.xlu1 %v5806_v48, %s6298_s28  ;;  %v3139_v0 = vpop.f32.mrb[157].mxu0 }
 0x50c   : > { %5817 = vrot.lane.b32.xlu0 %v5816_v25, %s6298_s28  ;;  %v5588_v56 = vpop.f32.mrb[158].mxu0 }
 0x50d   : > { %v5811_v18 = vpack.i.bf16 %v5588_v56, %v5587_v23  ;;  %v3142_v38 = vpop.f32.mrb[159].mxu0 }
 0x50e   : > { %v5821_v15 = vpack.i.bf16 %v3142_v38, %v3139_v0 }
 0x50f   : > { %5812 = vrot.lane.b32.xlu1 %v5811_v18, %s6299_s21 }
 0x510   : > { %5822 = vrot.lane.b32.xlu0 %v5821_v15, %s6299_s21 }
 0x516   : > { %v5559_v45 = vpop.f32.mrb[128].mxu1 }
 0x517   : > { %v3058_v53 = vpop.f32.mrb[129].mxu1 }
 0x518   : > { %v5560_v29 = vpop.f32.mrb[130].mxu1 }
 0x519   : > { %v5826_v12 = vpack.i.bf16 %v5560_v29, %v5559_v45  ;;  %v3061_v30 = vpop.f32.mrb[131].mxu1 }
 0x51a   : > { %v5831_v21 = vpack.i.bf16 %v3061_v30, %v3058_v53  ;;  %v5591_v61 = vpop.f32.mrb[160].mxu0 }
 0x51b   : > { %5827 = vrot.lane.b32.xlu1 %v5826_v12, %s6298_s28  ;;  %v3155_v31 = vpop.f32.mrb[161].mxu0 }
 0x51c   : > { %5832 = vrot.lane.b32.xlu0 %v5831_v21, %s6298_s28  ;;  %v5592_v46 = vpop.f32.mrb[162].mxu0 }
 0x51d   : > { %v5851_v58 = vpack.i.bf16 %v5592_v46, %v5591_v61  ;;  %v3158_v44 = vpop.f32.mrb[163].mxu0 }
 0x51e   : > { %v5846_v22 = vpack.i.bf16 %v3158_v44, %v3155_v31 }
 0x526   : > { %v5563_v40 = vpop.f32.mrb[132].mxu1 }
 0x527   : > { %v3074_v32 = vpop.f32.mrb[133].mxu1 }
 0x528   : > { %v5564_v16 = vpop.f32.mrb[134].mxu1 }
 0x529   : > { %v5871_v14 = vpack.i.bf16 %v5564_v16, %v5563_v40  ;;  %v3077_v41 = vpop.f32.mrb[135].mxu1 }
 0x52a   : > { %v5866_v63 = vpack.i.bf16 %v3077_v41, %v3074_v32 }
 0x533   : > { %v5615_v60 = vpop.f32.mrb[136].mxu1 }
 0x534   : > { %v3220_v8 = vpop.f32.mrb[137].mxu1 }
 0x535   : > { %v5616_v1 = vpop.f32.mrb[138].mxu1 }
 0x536   : > { %v5836_v27 = vpack.i.bf16 %v5616_v1, %v5615_v60  ;;  %v3223_v9 = vpop.f32.mrb[139].mxu1 }
 0x537   : > { %v5841_v17 = vpack.i.bf16 %v3223_v9, %v3220_v8 }
 0x538   : > { %5837 = vrot.lane.b32.xlu1 %v5836_v27, %s6300_s15 }
 0x539   : > { %5842 = vrot.lane.b32.xlu0 %v5841_v17, %s6300_s15 }
 0x53b   : > { %v5619_v35 = vpop.f32.mrb[140].mxu1 }
 0x53c   : > { %5852 = vrot.lane.b32.xlu1 %v5851_v58, %s6299_s21  ;;  %v3236_v55 = vpop.f32.mrb[141].mxu1 }
 0x53d   : > { %5847 = vrot.lane.b32.xlu0 %v5846_v22, %s6299_s21  ;;  %v5620_v7 = vpop.f32.mrb[142].mxu1 }
 0x53e   : > { %v5856_v36 = vpack.i.bf16 %v5620_v7, %v5619_v35  ;;  %v3239_v42 = vpop.f32.mrb[143].mxu1 }
 0x53f   : > { %v5861_v6 = vpack.i.bf16 %v3239_v42, %v3236_v55 }
 0x540   : > { %5857 = vrot.lane.b32.xlu1 %v5856_v36, %s6300_s15 }
 0x541   : > { %5862 = vrot.lane.b32.xlu0 %v5861_v6, %s6300_s15 }
 0x543   : > { %v5623_v11 = vpop.f32.mrb[144].mxu1 }
 0x544   : > { %5872 = vrot.lane.b32.xlu1 %v5871_v14, %s6298_s28  ;;  %v3252_v57 = vpop.f32.mrb[145].mxu1 }
 0x545   : > { %5867 = vrot.lane.b32.xlu0 %v5866_v63, %s6298_s28  ;;  %v5624_v13 = vpop.f32.mrb[146].mxu1 }
 0x546   : > { %v5876_v26 = vpack.i.bf16 %v5624_v13, %v5623_v11  ;;  %v5595_v10 = vpop.f32.mrb[164].mxu0  ;;  %v3255_v28 = vpop.f32.mrb[147].mxu1 }
 0x547   : > { %v5881_v19 = vpack.i.bf16 %v3255_v28, %v3252_v57  ;;  %v3171_v48 = vpop.f32.mrb[165].mxu0 }
 0x548   : > { %v5596_v37 = vpop.f32.mrb[166].mxu0  ;;  %5877 = vrot.lane.b32.xlu1 %v5876_v26, %s6300_s15 }
 0x549   : > { %v5891_v25 = vpack.i.bf16 %v5596_v37, %v5595_v10  ;;  %v3174_v23 = vpop.f32.mrb[167].mxu0  ;;  %5882 = vrot.lane.b32.xlu0 %v5881_v19, %s6300_s15 }
 0x54a   : > { %v5886_v0 = vpack.i.bf16 %v3174_v23, %v3171_v48 }
 0x54c   : > { %5892 = vrot.lane.b32.xlu1 %v5891_v25, %s6299_s21 }
 0x54d   : > { %5887 = vrot.lane.b32.xlu0 %v5886_v0, %s6299_s21 }
 0x54e   : > { %v5627_v56 = vpop.f32.mrb[148].mxu1 }
 0x54f   : > { %v3268_v18 = vpop.f32.mrb[149].mxu1 }
 0x550   : > { %v5628_v38 = vpop.f32.mrb[150].mxu1 }
 0x551   : > { %v5901_v15 = vpack.i.bf16 %v5628_v38, %v5627_v56  ;;  %v3271_v43 = vpop.f32.mrb[151].mxu1 }
 0x552   : > { %v5896_v45 = vpack.i.bf16 %v3271_v43, %v3268_v18 }
 0x553   : > { %5902 = vrot.lane.b32.xlu1 %v5901_v15, %s6300_s15 }
 0x554   : > { %5897 = vrot.lane.b32.xlu0 %v5896_v45, %s6300_s15 }
 0x56d   : > { %v5788_v30 = vpop.permute.xlu0 %5787 }
 0x56e   : > { %v5790_v58 = vunpack.i.h.bf16 %v5788_v30  ;;  %v5789_v44 = vunpack.i.l.bf16 %v5788_v30 }
 0x570   : > { %v3478_v60 = vsel %vm562_vm2, %v7922_v4, %v5790_v58  ;;  %v3477_v8 = vsel %vm562_vm2, %v7918_v24, %v5789_v44 }
 0x571   : > { %v5793_v53 = vpop.permute.xlu1 %5792 }
 0x572   : > { %v5795_v22 = vunpack.i.h.bf16 %v5793_v53  ;;  %v5794_v40 = vunpack.i.l.bf16 %v5793_v53 }
 0x574   : > { %v3494_v1 = vsel %vm3491_vm3, %v3477_v8, %v5794_v40  ;;  %v3495_v27 = vsel %vm3491_vm3, %v3478_v60, %v5795_v22 }
 0x575   : > { %v5798_v29 = vpop.permute.xlu1 %5797 }
 0x576   : > { %v5800_v16 = vunpack.i.h.bf16 %v5798_v29  ;;  %v5799_v14 = vunpack.i.l.bf16 %v5798_v29 }
 0x578   : > { %v3476_v17 = vsel %vm562_vm2, %v7924_v51, %v5800_v16  ;;  %v3475_v35 = vsel %vm562_vm2, %v7920_v5, %v5799_v14 }
 0x579   : > { %v5803_v12 = vpop.permute.xlu1 %5802 }
 0x57a   : > { %v5805_v63 = vunpack.i.h.bf16 %v5803_v12  ;;  %v5804_v39 = vunpack.i.l.bf16 %v5803_v12 }
 0x57c   : > { %v3493_v4 = vsel %vm3491_vm3, %v3476_v17, %v5805_v63  ;;  %v3492_v24 = vsel %vm3491_vm3, %v3475_v35, %v5804_v39 }
 0x57d   : > { %v5808_v21 = vpop.permute.xlu1 %5807 }
 0x57e   : > { %v5818_v61 = vpop.permute.xlu0 %5817  ;;  %v5810_v11 = vunpack.i.h.bf16 %v5808_v21  ;;  %v5809_v57 = vunpack.i.l.bf16 %v5808_v21 }
 0x57f   : > { %v5820_v10 = vunpack.i.h.bf16 %v5818_v61  ;;  %v5819_v48 = vunpack.i.l.bf16 %v5818_v61 }
 0x580   : > { %v3482_v38 = vsel %vm562_vm2, %v7930_v54, %v5810_v11  ;;  %v3481_v15 = vsel %vm562_vm2, %v7926_v59, %v5809_v57 }
 0x581   : > { %v5813_v31 = vpop.permute.xlu1 %5812  ;;  %v3480_v43 = vsel %vm562_vm2, %v7932_v20, %v5820_v10  ;;  %v3479_v53 = vsel %vm562_vm2, %v7928_v62, %v5819_v48 }
 0x582   : > { %v5823_v46 = vpop.permute.xlu0 %5822  ;;  %v5815_v37 = vunpack.i.h.bf16 %v5813_v31  ;;  %v5814_v0 = vunpack.i.l.bf16 %v5813_v31 }
 0x583   : > { %v5824_v56 = vunpack.i.l.bf16 %v5823_v46  ;;  %v5825_v18 = vunpack.i.h.bf16 %v5823_v46 }
 0x584   : > { %v3499_v29 = vsel %vm3491_vm3, %v3482_v38, %v5815_v37  ;;  %v3498_v61 = vsel %vm3491_vm3, %v3481_v15, %v5814_v0 }
 0x585   : > { %v3496_v54 = vsel %vm3491_vm3, %v3479_v53, %v5824_v56  ;;  %v3497_v46 = vsel %vm3491_vm3, %v3480_v43, %v5825_v18 }
 0x58d   : > { %v7976_v32 = vpop.permute.xlu1 %5827 }
 0x58e   : > { %v7978_v41 = vpop.permute.xlu0 %5832  ;;  %v5830_v20 = vunpack.i.h.bf16 %v7976_v32  ;;  %v5829_v62 = vunpack.i.l.bf16 %v7976_v32 }
 0x58f   : > { %v5835_v63 = vunpack.i.h.bf16 %v7978_v41  ;;  %v5834_v39 = vunpack.i.l.bf16 %v7978_v41 }
 0x590   : > { %v3486_v32 = vsel %vm562_vm2, %v7938_v2, %v5830_v20  ;;  %v3485_v35 = vsel %vm562_vm2, %v7934_v52, %v5829_v62 }
 0x591   : > { %v3484_v41 = vsel %vm562_vm2, %v7940_v50, %v5835_v63 }
 0x5aa   : > { %v5838_v9 = vpop.permute.xlu1 %5837 }
 0x5ab   : > { %v5840_v55 = vunpack.i.h.bf16 %v5838_v9  ;;  %v5839_v7 = vunpack.i.l.bf16 %v5838_v9  ;;  %v5843_v36 = vpop.permute.xlu0 %5842 }
 0x5ac   : > { %v5845_v42 = vunpack.i.h.bf16 %v5843_v36  ;;  %v5844_v6 = vunpack.i.l.bf16 %v5843_v36 }
 0x5ad   : > { %v3512_v13 = vsel %vm3508_vm4, %v3495_v27, %v5840_v55  ;;  %v3511_v26 = vsel %vm3508_vm4, %v3494_v1, %v5839_v7  ;;  %v3483_v7 = vsel %vm562_vm2, %v7936_v47, %v5834_v39 }
 0x5ae   : > { %v3527_v51 = vpack.c.bf16 %v3512_v13, %v3511_v26  ;;  %v3510_v28 = vsel %vm3508_vm4, %v3493_v4, %v5845_v42  ;;  %v3509_v5 = vsel %vm3508_vm4, %v3492_v24, %v5844_v6  ;;  %v5853_v19 = vpop.permute.xlu1 %5852 }
 0x5af   : > { %v3526_v25 = vpack.c.bf16 %v3510_v28, %v3509_v5  ;;  %v5848_v23 = vpop.permute.xlu0 %5847  ;;  %v5855_v1 = vunpack.i.h.bf16 %v5853_v19  ;;  %v5854_v27 = vunpack.i.l.bf16 %v5853_v19 }
 0x5b0   : > { %v5850_v9 = vunpack.i.h.bf16 %v5848_v23  ;;  %v5849_v17 = vunpack.i.l.bf16 %v5848_v23 }
 0x5b1   : > { %5633 = vmatprep.mubr.msk.bf16.mxu0 %vm3554_vm5, %v3526_v25  ;;  %v3503_v42 = vsel %vm3491_vm3, %v3486_v32, %v5855_v1  ;;  %v3502_v6 = vsel %vm3491_vm3, %v3485_v35, %v5854_v27  ;;  %v6238_v27 = vld [vmem:[#allocation2] sm:$0xff]  ;;  %v6239_v32 = vld [vmem:[#allocation2 + $0x10] sm:$0xff] }
 0x5b2   : > { %5634 = vmatmul.mubr.msk.bf16.vlgmr.msra.gmra.mrb[168].mxu0 %vm3554_vm5, %v3527_v51  ;;  %v5858_v45 = vpop.permute.xlu1 %5857  ;;  %v3501_v52 = vsel %vm3491_vm3, %v3484_v41, %v5850_v9  ;;  %v3500_v57 = vsel %vm3491_vm3, %v3483_v7, %v5849_v17  ;;  %v6240_v41 = vld [vmem:[#allocation2 + $0x8] sm:$0xff] }
 0x5b3   : > { %v5860_v12 = vunpack.i.h.bf16 %v5858_v45  ;;  %v5859_v30 = vunpack.i.l.bf16 %v5858_v45  ;;  %v5863_v21 = vpop.permute.xlu0 %5862 }
 0x5b4   : > { %v5865_v31 = vunpack.i.h.bf16 %v5863_v21  ;;  %v5864_v59 = vunpack.i.l.bf16 %v5863_v21 }
 0x5b5   : > { %v3516_v58 = vsel %vm3508_vm4, %v3499_v29, %v5860_v12  ;;  %v3515_v44 = vsel %vm3508_vm4, %v3498_v61, %v5859_v30 }
 0x5b6   : > { %v3529_v22 = vpack.c.bf16 %v3516_v58, %v3515_v44  ;;  %v3514_v40 = vsel %vm3508_vm4, %v3497_v46, %v5865_v31  ;;  %v3513_v16 = vsel %vm3508_vm4, %v3496_v54, %v5864_v59  ;;  %v5873_v14 = vpop.permute.xlu1 %5872  ;;  %v3538_v44 = vlaneseq }
 0x5b7   : > { %v3528_v60 = vpack.c.bf16 %v3514_v40, %v3513_v16  ;;  %v5868_v8 = vpop.permute.xlu0 %5867  ;;  %v5875_v5 = vunpack.i.h.bf16 %v5873_v14  ;;  %v5874_v19 = vunpack.i.l.bf16 %v5873_v14  ;;  %v8060_v40 = vld [vmem:[%s6425_s26] sm:$0x3f] }
 0x5b8   : > { %v5870_v37 = vunpack.i.h.bf16 %v5868_v8  ;;  %v5869_v25 = vunpack.i.l.bf16 %v5868_v8  ;;  %v8056_v62 = vshrl.u32 %v3538_v44, 7 }
 0x5b9   : > { %5637 = vmatprep.mubr.msk.bf16.mxu0 %vm3554_vm5, %v3528_v60  ;;  %v3490_v38 = vsel %vm562_vm2, %v7946_v3, %v5875_v5  ;;  %v3489_v15 = vsel %vm562_vm2, %v7942_v34, %v5874_v19  ;;  %v6244_v19 = vld [vmem:[#allocation2 + $0x28] sm:$0xff] }
 0x5ba   : > { %5638 = vmatmul.mubr.msk.bf16.gmra.mrb[172].mxu0 %vm3554_vm5, %v3529_v22  ;;  %v5878_v55 = vpop.permute.xlu1 %5877  ;;  %v3488_v45 = vsel %vm562_vm2, %v7948_v33, %v5870_v37  ;;  %v3487_v53 = vsel %vm562_vm2, %v7944_v49, %v5869_v25  ;;  %v3540_v22 = vsub.s32 0, %v8056_v62 }
 0x5bb   : > { %v5880_v36 = vunpack.i.h.bf16 %v5878_v55  ;;  %v5879_v4 = vunpack.i.l.bf16 %v5878_v55  ;;  %v5883_v24 = vpop.permute.xlu0 %5882 }
 0x5bc   : > { %v5885_v2 = vunpack.i.h.bf16 %v5883_v24  ;;  %v5884_v11 = vunpack.i.l.bf16 %v5883_v24  ;;  %v8063_v16 = vrot.slane %v8060_v40, %v3540_v22 }
 0x5bd   : > { %v3520_v13 = vsel %vm3508_vm4, %v3503_v42, %v5880_v36  ;;  %v3519_v50 = vsel %vm3508_vm4, %v3502_v6, %v5879_v4  ;;  %v6241_v6 = vld [vmem:[#allocation2 + $0x18] sm:$0xff] }
 0x5be   : > { %v3531_v26 = vpack.c.bf16 %v3520_v13, %v3519_v50  ;;  %v3518_v47 = vsel %vm3508_vm4, %v3501_v52, %v5885_v2  ;;  %v3517_v10 = vsel %vm3508_vm4, %v3500_v57, %v5884_v11  ;;  %v5893_v28 = vpop.permute.xlu1 %5892 }
 0x5bf   : > { %v3530_v51 = vpack.c.bf16 %v3518_v47, %v3517_v10  ;;  %v5888_v48 = vpop.permute.xlu0 %5887  ;;  %v5895_v23 = vunpack.i.h.bf16 %v5893_v28  ;;  %v5894_v0 = vunpack.i.l.bf16 %v5893_v28  ;;  %v6243_v28 = vld [vmem:[#allocation2 + $0x30] sm:$0xff] }
 0x5c0   : > { %v5890_v56 = vunpack.i.h.bf16 %v5888_v48  ;;  %v5889_v18 = vunpack.i.l.bf16 %v5888_v48 }
 0x5c1   : > { %5641 = vmatprep.mubr.msk.bf16.mxu0 %vm3554_vm5, %v3530_v51  ;;  %v3507_v21 = vsel %vm3491_vm3, %v3490_v38, %v5895_v23  ;;  %v3506_v61 = vsel %vm3491_vm3, %v3489_v15, %v5894_v0  ;;  %v6245_v0 = vld [vmem:[#allocation2 + $0x38] sm:$0xff] }
 0x5c2   : > { %5642 = vmatmul.mubr.msk.bf16.gmra.mrb[176].mxu0 %vm3554_vm5, %v3531_v26  ;;  %v3505_v31 = vsel %vm3491_vm3, %v3488_v45, %v5890_v56  ;;  %v3504_v34 = vsel %vm3491_vm3, %v3487_v53, %v5889_v18  ;;  %v6242_v26 = vld [vmem:[#allocation2 + $0x20] sm:$0xff] }
 0x5c5   : > { %v5903_v43 = vpop.permute.xlu1 %5902 }
 0x5c6   : > { %v5905_v29 = vunpack.i.h.bf16 %v5903_v43  ;;  %v5904_v12 = vunpack.i.l.bf16 %v5903_v43  ;;  %v5898_v30 = vpop.permute.xlu0 %5897 }
 0x5c7   : > { %v5900_v54 = vunpack.i.h.bf16 %v5898_v30  ;;  %v5899_v3 = vunpack.i.l.bf16 %v5898_v30 }
 0x5c8   : > { %v3524_v59 = vsel %vm3508_vm4, %v3507_v21, %v5905_v29  ;;  %v3523_v33 = vsel %vm3508_vm4, %v3506_v61, %v5904_v12  ;;  %v6246_v12 = vld [vmem:[#allocation2 + $0x40] sm:$0xff] }
 0x5c9   : > { %v3533_v46 = vpack.c.bf16 %v3524_v59, %v3523_v33  ;;  %v3522_v49 = vsel %vm3508_vm4, %v3505_v31, %v5900_v54  ;;  %v3521_v20 = vsel %vm3508_vm4, %v3504_v34, %v5899_v3  ;;  %v6247_v54 = vld [vmem:[#allocation2 + $0x50] sm:$0xff]  ;;  %v6248_v34 = vld [vmem:[#allocation2 + $0x48] sm:$0xff] }
 0x5ca   : > { %v3532_v58 = vpack.c.bf16 %v3522_v49, %v3521_v20 }
 0x5cc   : > { %5645 = vmatprep.mubr.msk.bf16.mxu0 %vm3554_vm5, %v3532_v58 }
 0x5cd   : > { %5646 = vmatmul.mubr.msk.bf16.gmra.mrb[180].mxu0 %vm3554_vm5, %v3533_v46  ;;  %v6249_v46 = vld [vmem:[#allocation2 + $0x58] sm:$0xff] }
 0x685   : > { %v5635_v14 = vpop.f32.mrb[168].mxu0 }
 0x686   : > { %v3613_v63 = vpop.f32.mrb[169].mxu0  ;;  %v3622_v39 = vadd.f32 %v5635_v14, %v8063_v16 }
 0x687   : > { %v3614_v60 = vadd.f32 %v3613_v63, %v8063_v16  ;;  %v5636_v8 = vpop.f32.mrb[170].mxu0 }
 0x688   : > { %v3616_v1 = vpop.f32.mrb[171].mxu0  ;;  %v8070_v35 = vadd.f32 %v6239_v32, %v3622_v39  ;;  %v3625_v55 = vadd.f32 %v5636_v8, %v8063_v16 }
 0x689   : > { %v8067_v9 = vadd.f32 %v6238_v27, %v3614_v60  ;;  %v3617_v17 = vadd.f32 %v3616_v1, %v8063_v16  ;;  %v6250_v1 = vld [vmem:[#allocation2 + $0x60] sm:$0xff] }
 0x68a   : > { %v8079_v2 = vadd.f32 %v6241_v6, %v3625_v55  ;;  %v3698_v13 = vsel %vm3554_vm5, %v8070_v35, 0.0  ;;  %v6251_v55 = vld [vmem:[#allocation2 + $0x70] sm:$0xff] }
 0x68b   : > { %v8073_v7 = vadd.f32 %v6240_v41, %v3617_v17  ;;  %v3692_v36 = vsel %vm3554_vm5, %v8067_v9, 0.0 }
 0x68c   : > { %3693 = vadd.xlane.f32.xlu0 %v3692_v36  ;;  %v3701_v25 = vsel %vm3554_vm5, %v8079_v2, 0.0  ;;  %v6252_v36 = vld [vmem:[#allocation2 + $0x68] sm:$0xff] }
 0x68d   : > { %v5639_v4 = vpop.f32.mrb[172].mxu0  ;;  %v3695_v24 = vsel %vm3554_vm5, %v8073_v7, 0.0 }
 0x68e   : > { %v3629_v42 = vpop.f32.mrb[173].mxu0  ;;  %3696 = vadd.xlane.f32.xlu1 %v3695_v24  ;;  %v3638_v11 = vadd.f32 %v5639_v4, %v8063_v16 }
 0x68f   : > { %v3630_v52 = vadd.f32 %v3629_v42, %v8063_v16  ;;  %v5640_v57 = vpop.f32.mrb[174].mxu0  ;;  %v6253_v42 = vld [vmem:[#allocation2 + $0x78] sm:$0xff] }
 0x690   : > { %v3632_v50 = vpop.f32.mrb[175].mxu0  ;;  %3699 = vadd.xlane.f32.xlu0 %v3698_v13  ;;  %v3641_v51 = vadd.f32 %v5640_v57, %v8063_v16  ;;  %v8089_v5 = vadd.f32 %v6243_v28, %v3638_v11 }
 0x691   : > { %v8085_v47 = vadd.f32 %v6242_v26, %v3630_v52  ;;  %v3633_v10 = vadd.f32 %v3632_v50, %v8063_v16 }
 0x692   : > { %v8097_v56 = vadd.f32 %v6245_v0, %v3641_v51  ;;  %v3710_v45 = vsel %vm3554_vm5, %v8089_v5, 0.0 }
 0x693   : > { %v8091_v48 = vadd.f32 %v6244_v19, %v3633_v10  ;;  %v3704_v37 = vsel %vm3554_vm5, %v8085_v47, 0.0 }
 0x694   : > { %3705 = vadd.xlane.f32.xlu1 %v3704_v37  ;;  %3702 = vadd.xlane.f32.xlu0 %v3701_v25  ;;  %v3713_v61 = vsel %vm3554_vm5, %v8097_v56, 0.0 }
 0x695   : > { %v5643_v23 = vpop.f32.mrb[176].mxu0  ;;  %v3707_v53 = vsel %vm3554_vm5, %v8091_v48, 0.0 }
 0x696   : > { %v3645_v18 = vpop.f32.mrb[177].mxu0  ;;  %v3654_v38 = vadd.f32 %v5643_v23, %v8063_v16 }
 0x697   : > { %v3646_v15 = vadd.f32 %v3645_v18, %v8063_v16  ;;  %v5644_v43 = vpop.f32.mrb[178].mxu0 }
 0x698   : > { %v3648_v29 = vpop.f32.mrb[179].mxu0  ;;  %3711 = vadd.xlane.f32.xlu1 %v3710_v45  ;;  %3708 = vadd.xlane.f32.xlu0 %v3707_v53  ;;  %v8110_v3 = vadd.f32 %v6247_v54, %v3654_v38  ;;  %v3657_v31 = vadd.f32 %v5644_v43, %v8063_v16 }
 0x699   : > { %v8105_v30 = vadd.f32 %v6246_v12, %v3646_v15  ;;  %v3649_v21 = vadd.f32 %v3648_v29, %v8063_v16 }
 0x69a   : > { %v8117_v49 = vadd.f32 %v6249_v46, %v3657_v31  ;;  %v3722_v20 = vsel %vm3554_vm5, %v8110_v3, 0.0 }
 0x69b   : > { %v8113_v59 = vadd.f32 %v6248_v34, %v3649_v21  ;;  %v3716_v33 = vsel %vm3554_vm5, %v8105_v30, 0.0 }
 0x69c   : > { %3717 = vadd.xlane.f32.xlu1 %v3716_v33  ;;  %3714 = vadd.xlane.f32.xlu0 %v3713_v61  ;;  %v3725_v8 = vsel %vm3554_vm5, %v8117_v49, 0.0 }
 0x69d   : > { %v3719_v58 = vsel %vm3554_vm5, %v8113_v59, 0.0 }
 0x6a0   : > { %3723 = vadd.xlane.f32.xlu1 %v3722_v20  ;;  %3720 = vadd.xlane.f32.xlu0 %v3719_v58  ;;  %v5647_v44 = vpop.f32.mrb[180].mxu0 }
 0x6a1   : > { %v3661_v22 = vpop.f32.mrb[181].mxu0  ;;  %v3670_v14 = vadd.f32 %v5647_v44, %v8063_v16 }
 0x6a2   : > { %v3662_v63 = vadd.f32 %v3661_v22, %v8063_v16  ;;  %v5648_v39 = vpop.f32.mrb[182].mxu0 }
 0x6a3   : > { %v3664_v60 = vpop.f32.mrb[183].mxu0  ;;  %v3673_v17 = vadd.f32 %v5648_v39, %v8063_v16  ;;  %v8131_v41 = vadd.f32 %v6251_v55, %v3670_v14 }
 0x6a4   : > { %v8127_v27 = vadd.f32 %v6250_v1, %v3662_v63  ;;  %v3665_v32 = vadd.f32 %v3664_v60, %v8063_v16  ;;  %3726 = vadd.xlane.f32.xlu0 %v3725_v8 }
 0x6a5   : > { %v8137_v6 = vadd.f32 %v6253_v42, %v3673_v17  ;;  %v3734_v16 = vsel %vm3554_vm5, %v8131_v41, 0.0 }
 0x6a6   : > { %v8133_v4 = vadd.f32 %v6252_v36, %v3665_v32  ;;  %v3728_v24 = vsel %vm3554_vm5, %v8127_v27, 0.0 }
 0x6a7   : > { %3729 = vadd.xlane.f32.xlu1 %v3728_v24  ;;  %v3737_v52 = vsel %vm3554_vm5, %v8137_v6, 0.0 }
 0x6a8   : > { %v3731_v11 = vsel %vm3554_vm5, %v8133_v4, 0.0 }
 0x6a9   : > { %3732 = vadd.xlane.f32.xlu0 %v3731_v11 }
 0x6ab   : > { %3735 = vadd.xlane.f32.xlu1 %v3734_v16 }
 0x6ad   : > { %3738 = vadd.xlane.f32.xlu0 %v3737_v52 }
 0x719   : > { %v3694_v57 = vpop.xlane.xlu0 %3693 }
 0x71a   : > { %v3741_v13 = vmul.f32 0.03125, %v3694_v57 }
 0x71b   : > { %v3697_v50 = vpop.xlane.xlu1 %3696 }
 0x71c   : > { %v8146_v26 = vsub.f32 %v8067_v9, %v3741_v13  ;;  %v3742_v10 = vmul.f32 0.03125, %v3697_v50 }
 0x71d   : > { %v3700_v51 = vpop.xlane.xlu0 %3699 }
 0x71e   : > { %v8149_v28 = vsub.f32 %v8073_v7, %v3742_v10  ;;  %v3743_v19 = vmul.f32 0.03125, %v3700_v51  ;;  %v3773_v37 = vmul.f32 %v8146_v26, %v8146_v26 }
 0x720   : > { %v8154_v25 = vsub.f32 %v8070_v35, %v3743_v19  ;;  %v3789_v23 = vsel %vm3554_vm5, %v3773_v37, 0.0  ;;  %v3774_v0 = vmul.f32 %v8149_v28, %v8149_v28 }
 0x721   : > { %v3706_v18 = vpop.xlane.xlu1 %3705  ;;  %v3703_v9 = vpop.xlane.xlu0 %3702  ;;  %3790 = vadd.xlane.f32.xlu1 %v3789_v23 }
 0x722   : > { %v3745_v38 = vmul.f32 0.03125, %v3706_v18  ;;  %v3744_v15 = vmul.f32 0.03125, %v3703_v9  ;;  %v3792_v7 = vsel %vm3554_vm5, %v3774_v0, 0.0  ;;  %v3775_v43 = vmul.f32 %v8154_v25, %v8154_v25 }
 0x723   : > { %3793 = vadd.xlane.f32.xlu0 %v3792_v7 }
 0x724   : > { %v8163_v45 = vsub.f32 %v8085_v47, %v3745_v38  ;;  %v8166_v35 = vsub.f32 %v8079_v2, %v3744_v15  ;;  %v3795_v53 = vsel %vm3554_vm5, %v3775_v43, 0.0 }
 0x725   : > { %v3712_v29 = vpop.xlane.xlu1 %3711  ;;  %v3709_v12 = vpop.xlane.xlu0 %3708  ;;  %3796 = vadd.xlane.f32.xlu1 %v3795_v53 }
 0x726   : > { %v3747_v21 = vmul.f32 0.03125, %v3712_v29  ;;  %v3746_v61 = vmul.f32 0.03125, %v3709_v12  ;;  %v3776_v54 = vmul.f32 %v8166_v35, %v8166_v35  ;;  %v3777_v31 = vmul.f32 %v8163_v45, %v8163_v45 }
 0x728   : > { %v8174_v34 = vsub.f32 %v8089_v5, %v3747_v21  ;;  %v8177_v47 = vsub.f32 %v8091_v48, %v3746_v61  ;;  %v3798_v2 = vsel %vm3554_vm5, %v3776_v54, 0.0  ;;  %v3801_v33 = vsel %vm3554_vm5, %v3777_v31, 0.0  ;;  %v5909_v61 = vld [vmem:[%s6413_s18 + $0x8] sm:$0xff]   ;;  %v5910_v54 = vld [vmem:[%s6419_s22] sm:$0xff]  }
 0x729   : > { %v3718_v46 = vpop.xlane.xlu1 %3717  ;;  %v3715_v20 = vpop.xlane.xlu0 %3714  ;;  %3799 = vadd.xlane.f32.xlu0 %v3798_v2  ;;  %3802 = vadd.xlane.f32.xlu1 %v3801_v33  ;;  %v5911_v31 = vld [vmem:[%s6419_s22 + $0x8] sm:$0xff]   ;;  %v5912_v2 = vld [vmem:[%s6419_s22 + $0x10] sm:$0xff]   ;;  %v5913_v33 = vld [vmem:[%s6419_s22 + $0x18] sm:$0xff]  }
 0x72a   : > { %v3749_v58 = vmul.f32 0.03125, %v3718_v46  ;;  %v3748_v44 = vmul.f32 0.03125, %v3715_v20  ;;  %v3778_v22 = vmul.f32 %v8177_v47, %v8177_v47  ;;  %v3779_v5 = vmul.f32 %v8174_v34, %v8174_v34  ;;  %5669 = vmatprep.subr.bf16.mxu0 %v5910_v54  ;;  %v5914_v46 = vld [vmem:[%s6419_s22 + $0x20] sm:$0xff]   ;;  %v5915_v20 = vld [vmem:[%s6419_s22 + $0x28] sm:$0xff]  }
 0x72b   : > { %5670 = vmatpush3.bf16.msra.mxu0 %v5910_v54 }
 0x72c   : > { %v8186_v14 = vsub.f32 %v8105_v30, %v3749_v58  ;;  %v8189_v48 = vsub.f32 %v8097_v56, %v3748_v44  ;;  %v3804_v63 = vsel %vm3554_vm5, %v3778_v22, 0.0  ;;  %v3807_v39 = vsel %vm3554_vm5, %v3779_v5, 0.0  ;;  %5671 = vmatprep.subr.bf16.mxu0 %v5911_v31 }
 0x72d   : > { %v3724_v60 = vpop.xlane.xlu1 %3723  ;;  %v3721_v8 = vpop.xlane.xlu0 %3720  ;;  %3805 = vadd.xlane.f32.xlu0 %v3804_v63  ;;  %3808 = vadd.xlane.f32.xlu1 %v3807_v39 }
 0x72e   : > { %v3751_v1 = vmul.f32 0.03125, %v3724_v60  ;;  %v3750_v17 = vmul.f32 0.03125, %v3721_v8  ;;  %v3780_v32 = vmul.f32 %v8189_v48, %v8189_v48  ;;  %v3781_v30 = vmul.f32 %v8186_v14, %v8186_v14 }
 0x72f   : > { %5672 = vmatpush3.bf16.msra.mxu0 %v5911_v31 }
 0x730   : > { %v8198_v55 = vsub.f32 %v8110_v3, %v3751_v1  ;;  %v8201_v56 = vsub.f32 %v8113_v59, %v3750_v17  ;;  %v3810_v36 = vsel %vm3554_vm5, %v3780_v32, 0.0  ;;  %v3813_v24 = vsel %vm3554_vm5, %v3781_v30, 0.0  ;;  %5673 = vmatprep.subr.bf16.mxu0 %v5912_v2 }
 0x731   : > { %v3727_v42 = vpop.xlane.xlu0 %3726  ;;  %3811 = vadd.xlane.f32.xlu0 %v3810_v36  ;;  %3814 = vadd.xlane.f32.xlu1 %v3813_v24  ;;  %v3903_v24 = vsub.s32 1, %v8056_v62 }
 0x732   : > { %v3752_v11 = vmul.f32 0.03125, %v3727_v42  ;;  %v3782_v16 = vmul.f32 %v8201_v56, %v8201_v56  ;;  %v3783_v52 = vmul.f32 %v8198_v55, %v8198_v55 }
 0x733   : > { %5674 = vmatpush3.bf16.msra.mxu0 %v5912_v2 }
 0x734   : > { %v8210_v3 = vsub.f32 %v8117_v49, %v3752_v11  ;;  %v3730_v57 = vpop.xlane.xlu1 %3729  ;;  %v3816_v59 = vsel %vm3554_vm5, %v3782_v16, 0.0  ;;  %v3819_v13 = vsel %vm3554_vm5, %v3783_v52, 0.0  ;;  %5675 = vmatprep.subr.bf16.mxu0 %v5913_v33 }
 0x735   : > { %v3753_v50 = vmul.f32 0.03125, %v3730_v57  ;;  %3817 = vadd.xlane.f32.xlu0 %v3816_v59  ;;  %3820 = vadd.xlane.f32.xlu1 %v3819_v13  ;;  %v8251_v13 = vrot.slane %v8060_v40, %v3903_v24 }
 0x736   : > { %v3733_v10 = vpop.xlane.xlu0 %3732  ;;  %v3784_v51 = vmul.f32 %v8210_v3, %v8210_v3 }
 0x737   : > { %v8217_v19 = vsub.f32 %v8127_v27, %v3753_v50  ;;  %v3754_v37 = vmul.f32 0.03125, %v3733_v10  ;;  %5676 = vmatpush3.bf16.msra.mxu0 %v5913_v33  ;;  %v3923_v50 = vsub.s32 2, %v8056_v62 }
 0x738   : > { %v3736_v23 = vpop.xlane.xlu1 %3735  ;;  %v3822_v49 = vsel %vm3554_vm5, %v3784_v51, 0.0  ;;  %5677 = vmatprep.subr.bf16.mxu0 %v5914_v46 }
 0x739   : > { %v8221_v0 = vsub.f32 %v8133_v4, %v3754_v37  ;;  %v3755_v18 = vmul.f32 0.03125, %v3736_v23  ;;  %3823 = vadd.xlane.f32.xlu0 %v3822_v49  ;;  %v3785_v9 = vmul.f32 %v8217_v19, %v8217_v19 }
 0x73a   : > { %v3739_v38 = vpop.xlane.xlu0 %3738 }
 0x73b   : > { %v8226_v15 = vsub.f32 %v8131_v41, %v3755_v18  ;;  %v3756_v7 = vmul.f32 0.03125, %v3739_v38  ;;  %v3825_v27 = vsel %vm3554_vm5, %v3785_v9, 0.0  ;;  %v3786_v43 = vmul.f32 %v8221_v0, %v8221_v0  ;;  %5678 = vmatpush3.bf16.msra.mxu0 %v5914_v46 }
 0x73c   : > { %3826 = vadd.xlane.f32.xlu1 %v3825_v27  ;;  %5679 = vmatprep.subr.bf16.mxu0 %v5915_v20 }
 0x73d   : > { %v8232_v4 = vsub.f32 %v8137_v6, %v3756_v7  ;;  %v3828_v53 = vsel %vm3554_vm5, %v3786_v43, 0.0  ;;  %v3787_v29 = vmul.f32 %v8226_v15, %v8226_v15  ;;  %v5908_v6 = vld [vmem:[%s6413_s18] sm:$0xff]   ;;  %v8257_v43 = vrot.slane %v8060_v40, %v3923_v50  ;;  %s8932_s18 = scalar_lea.vmem %s8712_s5, %s6382_s12 }
 0x73e   : > { %3829 = vadd.xlane.f32.xlu0 %v3828_v53  ;;  %5649 = vmatprep.subr.bf16.mxu1 %v5908_v6 }
 0x73f   : > { %v3831_v41 = vsel %vm3554_vm5, %v3787_v29, 0.0  ;;  %v3788_v12 = vmul.f32 %v8232_v4, %v8232_v4  ;;  %5650 = vmatpush3.bf16.msra.mxu1 %v5908_v6  ;;  %5680 = vmatpush3.bf16.msra.mxu0 %v5915_v20 }
 0x740   : > { %3832 = vadd.xlane.f32.xlu1 %v3831_v41  ;;  %5651 = vmatprep.subr.bf16.mxu1 %v5909_v61 }
 0x741   : > { %v3834_v21 = vsel %vm3554_vm5, %v3788_v12, 0.0 }
 0x742   : > { %3835 = vadd.xlane.f32.xlu0 %v3834_v21 }
 0x743   : > { %5652 = vmatpush3.bf16.msra.mxu1 %v5909_v61 }
 0x7ae   : > { %v3791_v58 = vpop.xlane.xlu1 %3790 }
 0x7af   : > { %v3837_v44 = vmul.f32 0.03125, %v3791_v58 }
 0x7b0   : > { %v3794_v22 = vpop.xlane.xlu0 %3793 }
 0x7b1   : > { %v3853_v5 = vadd.f32 1e-05, %v3837_v44  ;;  %v3838_v63 = vmul.f32 0.03125, %v3794_v22 }
 0x7b2   : > { %v3797_v39 = vpop.xlane.xlu1 %3796 }
 0x7b3   : > { %6174 = vrsqrt.f32 %v3853_v5  ;;  %v3854_v60 = vadd.f32 1e-05, %v3838_v63  ;;  %v3839_v8 = vmul.f32 0.03125, %v3797_v39 }
 0x7b5   : > { %6176 = vrsqrt.f32 %v3854_v60  ;;  %v3855_v1 = vadd.f32 1e-05, %v3839_v8 }
 0x7b6   : > { %v3800_v17 = vpop.xlane.xlu0 %3799  ;;  %v3803_v32 = vpop.xlane.xlu1 %3802 }
 0x7b7   : > { %6178 = vrsqrt.f32 %v3855_v1  ;;  %v3840_v30 = vmul.f32 0.03125, %v3800_v17  ;;  %v3841_v36 = vmul.f32 0.03125, %v3803_v32 }
 0x7b9   : > { %v3856_v42 = vadd.f32 1e-05, %v3840_v30  ;;  %v3857_v11 = vadd.f32 1e-05, %v3841_v36 }
 0x7ba   : > { %v3806_v16 = vpop.xlane.xlu0 %3805  ;;  %v3809_v52 = vpop.xlane.xlu1 %3808 }
 0x7bb   : > { %6180 = vrsqrt.f32 %v3856_v42  ;;  %v3842_v57 = vmul.f32 0.03125, %v3806_v16  ;;  %v3843_v59 = vmul.f32 0.03125, %v3809_v52 }
 0x7bc   : > { %6182 = vrsqrt.f32 %v3857_v11 }
 0x7bd   : > { %v6175_v10 = vpop.eup %6174  ;;  %v3858_v51 = vadd.f32 1e-05, %v3842_v57  ;;  %v3859_v37 = vadd.f32 1e-05, %v3843_v59 }
 0x7be   : > { %v3885_v23 = vmul.f32 %v6175_v10, %v8146_v26  ;;  %v3812_v49 = vpop.xlane.xlu0 %3811  ;;  %v3815_v18 = vpop.xlane.xlu1 %3814 }
 0x7bf   : > { %v6177_v9 = vpop.eup %6176  ;;  %6184 = vrsqrt.f32 %v3858_v51  ;;  %v3844_v38 = vmul.f32 0.03125, %v3812_v49  ;;  %v3845_v7 = vmul.f32 0.03125, %v3815_v18 }
 0x7c0   : > { %v3886_v27 = vmul.f32 %v6177_v9, %v8149_v28  ;;  %6186 = vrsqrt.f32 %v3859_v37  ;;  %v3905_v53 = vmul.f32 %v8251_v13, %v3885_v23 }
 0x7c1   : > { %v6179_v29 = vpop.eup %6178  ;;  %v3860_v41 = vadd.f32 1e-05, %v3844_v38  ;;  %v3861_v12 = vadd.f32 1e-05, %v3845_v7 }
 0x7c2   : > { %v3887_v21 = vmul.f32 %v6179_v29, %v8154_v25  ;;  %v3818_v26 = vpop.xlane.xlu0 %3817  ;;  %v3821_v6 = vpop.xlane.xlu1 %3820  ;;  %v3906_v61 = vmul.f32 %v8251_v13, %v3886_v27  ;;  %v8263_v28 = vadd.f32 %v8257_v43, %v3905_v53 }
 0x7c3   : > { %6188 = vrsqrt.f32 %v3860_v41  ;;  %v3846_v54 = vmul.f32 0.03125, %v3818_v26  ;;  %v3847_v31 = vmul.f32 0.03125, %v3821_v6 }
 0x7c4   : > { %6190 = vrsqrt.f32 %v3861_v12  ;;  %v8266_v2 = vadd.f32 %v8257_v43, %v3906_v61  ;;  %v3907_v25 = vmul.f32 %v8251_v13, %v3887_v21 }
 0x7c5   : > { %v6181_v33 = vpop.eup %6180  ;;  %v3862_v46 = vadd.f32 1e-05, %v3846_v54  ;;  %v3863_v20 = vadd.f32 1e-05, %v3847_v31 }
 0x7c6   : > { %v6183_v58 = vpop.eup %6182  ;;  %v3888_v44 = vmul.f32 %v6181_v33, %v8166_v35  ;;  %v3824_v22 = vpop.xlane.xlu0 %3823  ;;  %v3941_v5 = vpack.c.bf16 %v8266_v2, %v8263_v28  ;;  %v8276_v30 = vadd.f32 %v8257_v43, %v3907_v25 }
 0x7c7   : > { %v3889_v63 = vmul.f32 %v6183_v58, %v8163_v45  ;;  %6192 = vrsqrt.f32 %v3862_v46  ;;  %v3848_v39 = vmul.f32 0.03125, %v3824_v22 }
 0x7c8   : > { %v3908_v60 = vmul.f32 %v8251_v13, %v3888_v44  ;;  %6194 = vrsqrt.f32 %v3863_v20  ;;  %5653 = vmatprep.mubr.msk.bf16.mxu1 %vm3554_vm5, %v3941_v5 }
 0x7c9   : > { %v6185_v8 = vpop.eup %6184  ;;  %v3864_v1 = vadd.f32 1e-05, %v3848_v39  ;;  %v3827_v17 = vpop.xlane.xlu1 %3826  ;;  %v3909_v11 = vmul.f32 %v8251_v13, %v3889_v63 }
 0x7ca   : > { %v6187_v32 = vpop.eup %6186  ;;  %v8279_v35 = vadd.f32 %v8257_v43, %v3908_v60  ;;  %v3890_v36 = vmul.f32 %v6185_v8, %v8177_v47  ;;  %v3849_v45 = vmul.f32 0.03125, %v3827_v17 }
 0x7cb   : > { %v3891_v24 = vmul.f32 %v6187_v32, %v8174_v34  ;;  %6196 = vrsqrt.f32 %v3864_v1  ;;  %v3830_v42 = vpop.xlane.xlu0 %3829  ;;  %v8292_v9 = vadd.f32 %v8257_v43, %v3909_v11 }
 0x7cc   : > { %v3865_v16 = vadd.f32 1e-05, %v3849_v45  ;;  %v3850_v52 = vmul.f32 0.03125, %v3830_v42  ;;  %v3942_v57 = vpack.c.bf16 %v8279_v35, %v8276_v30  ;;  %v3910_v59 = vmul.f32 %v8251_v13, %v3890_v36 }
 0x7cd   : > { %v6189_v50 = vpop.eup %6188  ;;  %v3833_v10 = vpop.xlane.xlu1 %3832  ;;  %v3911_v51 = vmul.f32 %v8251_v13, %v3891_v24 }
 0x7ce   : > { %v6191_v37 = vpop.eup %6190  ;;  %v3892_v47 = vmul.f32 %v6189_v50, %v8189_v48  ;;  %6198 = vrsqrt.f32 %v3865_v16  ;;  %v3866_v34 = vadd.f32 1e-05, %v3850_v52  ;;  %v3851_v23 = vmul.f32 0.03125, %v3833_v10  ;;  %5654 = vmatmul.mubr.msk.bf16.vlgmr.msra.gmra.mrb[152].mxu1 %vm3554_vm5, %v3942_v57  ;;  %v5916_v52 = vld [vmem:[%s6419_s22 + $0x30] sm:$0xff]   ;;  %v5917_v57 = vld [vmem:[%s6419_s22 + $0x38] sm:$0xff]  }
 0x7cf   : > { %v3893_v49 = vmul.f32 %v6191_v37, %v8186_v14  ;;  %v3836_v18 = vpop.xlane.xlu0 %3835  ;;  %v8295_v38 = vadd.f32 %v8257_v43, %v3910_v59  ;;  %v8301_v41 = vadd.f32 %v8257_v43, %v3911_v51  ;;  %5681 = vmatprep.subr.bf16.mxu0 %v5916_v52 }
 0x7d0   : > { %6200 = vrsqrt.f32 %v3866_v34  ;;  %v3867_v7 = vadd.f32 1e-05, %v3851_v23  ;;  %v3852_v27 = vmul.f32 0.03125, %v3836_v18  ;;  %v3912_v53 = vmul.f32 %v8251_v13, %v3892_v47  ;;  %5682 = vmatpush3.bf16.msra.mxu0 %v5916_v52 }
 0x7d1   : > { %v6193_v48 = vpop.eup %6192  ;;  %v3943_v29 = vpack.c.bf16 %v8295_v38, %v8292_v9  ;;  %v3913_v14 = vmul.f32 %v8251_v13, %v3893_v49  ;;  %5683 = vmatprep.subr.bf16.mxu0 %v5917_v57 }
 0x7d2   : > { %v6195_v12 = vpop.eup %6194  ;;  %v3894_v21 = vmul.f32 %v6193_v48, %v8201_v56  ;;  %6202 = vrsqrt.f32 %v3867_v7  ;;  %v3868_v26 = vadd.f32 1e-05, %v3852_v27  ;;  %v8306_v6 = vadd.f32 %v8257_v43, %v3912_v53 }
 0x7d3   : > { %v3895_v61 = vmul.f32 %v6195_v12, %v8198_v55  ;;  %5657 = vmatprep.mubr.msk.bf16.mxu1 %vm3554_vm5, %v3943_v29  ;;  %v8316_v56 = vadd.f32 %v8257_v43, %v3913_v14 }
 0x7d4   : > { %6204 = vrsqrt.f32 %v3868_v26  ;;  %v3944_v54 = vpack.c.bf16 %v8306_v6, %v8301_v41  ;;  %v3914_v31 = vmul.f32 %v8251_v13, %v3894_v21  ;;  %5684 = vmatpush3.bf16.msra.mxu0 %v5917_v57 }
 0x7d5   : > { %v6197_v33 = vpop.eup %6196  ;;  %v3915_v55 = vmul.f32 %v8251_v13, %v3895_v61 }
 0x7d6   : > { %v3896_v46 = vmul.f32 %v6197_v33, %v8210_v3  ;;  %5658 = vmatmul.mubr.msk.bf16.gmra.mrb[156].mxu1 %vm3554_vm5, %v3944_v54  ;;  %v8319_v20 = vadd.f32 %v8257_v43, %v3914_v31 }
 0x7d7   : > { %v8328_v3 = vadd.f32 %v8257_v43, %v3915_v55 }
 0x7d8   : > { %v6199_v58 = vpop.eup %6198  ;;  %v3945_v25 = vpack.c.bf16 %v8319_v20, %v8316_v56  ;;  %v3916_v44 = vmul.f32 %v8251_v13, %v3896_v46 }
 0x7d9   : > { %v3897_v22 = vmul.f32 %v6199_v58, %v8217_v19 }
 0x7da   : > { %v6201_v5 = vpop.eup %6200  ;;  %5661 = vmatprep.mubr.msk.bf16.mxu1 %vm3554_vm5, %v3945_v25  ;;  %v8331_v63 = vadd.f32 %v8257_v43, %v3916_v44 }
 0x7db   : > { %v3898_v39 = vmul.f32 %v6201_v5, %v8221_v0  ;;  %v3917_v60 = vmul.f32 %v8251_v13, %v3897_v22 }
 0x7dc   : > { %v6203_v8 = vpop.eup %6202  ;;  %v3946_v1 = vpack.c.bf16 %v8331_v63, %v8328_v3 }
 0x7dd   : > { %v3899_v19 = vmul.f32 %v6203_v8, %v8226_v15  ;;  %v3918_v17 = vmul.f32 %v8251_v13, %v3898_v39  ;;  %v8342_v45 = vadd.f32 %v8257_v43, %v3917_v60 }
 0x7de   : > { %v6205_v32 = vpop.eup %6204  ;;  %5662 = vmatmul.mubr.msk.bf16.gmra.mrb[160].mxu1 %vm3554_vm5, %v3946_v1 }
 0x7df   : > { %v3900_v36 = vmul.f32 %v6205_v32, %v8232_v4  ;;  %v8345_v0 = vadd.f32 %v8257_v43, %v3918_v17  ;;  %v3919_v24 = vmul.f32 %v8251_v13, %v3899_v19 }
 0x7e1   : > { %v3947_v15 = vpack.c.bf16 %v8345_v0, %v8342_v45  ;;  %v3920_v42 = vmul.f32 %v8251_v13, %v3900_v36  ;;  %v8353_v11 = vadd.f32 %v8257_v43, %v3919_v24  ;;  %v4885_v13 = vld [vmem:[%s8932_s18] ss:$0 sm:$0xff] }
 0x7e3   : > { %5665 = vmatprep.mubr.msk.bf16.mxu1 %vm3554_vm5, %v3947_v15  ;;  %v8356_v4 = vadd.f32 %v8257_v43, %v3920_v42 }
 0x7e5   : > { %v3948_v16 = vpack.c.bf16 %v8356_v4, %v8353_v11 }
 0x7e7   : > { %5666 = vmatmul.mubr.msk.bf16.gmra.mrb[164].mxu1 %vm3554_vm5, %v3948_v16 }
 0x8a1   : > { %v5655_v59 = vpop.f32.mrb[152].mxu1 }
 0x8a2   : > { %v4039_v50 = vadd.f32 %v5655_v59, %v4885_v13  ;;  %v4030_v43 = vpop.f32.mrb[153].mxu1 }
 0x8a3   : > { %v4031_v10 = vadd.f32 %v4885_v13, %v4030_v43  ;;  %v5656_v51 = vpop.f32.mrb[154].mxu1 }
 0x8a4   : > { %v4042_v37 = vadd.f32 %v5656_v51, %v4885_v13  ;;  %v4033_v47 = vpop.f32.mrb[155].mxu1  ;;  %v4095_v23 = vmax.f32 %v4039_v50, 0.0 }
 0x8a5   : > { %v4034_v34 = vadd.f32 %v4885_v13, %v4033_v47  ;;  %v4093_v18 = vmax.f32 %v4031_v10, 0.0 }
 0x8a6   : > { %v4096_v49 = vmax.f32 %v4042_v37, 0.0 }
 0x8a7   : > { %v4094_v7 = vmax.f32 %v4034_v34, 0.0 }
 0x8a8   : > { %v4110_v27 = vpack.c.bf16 %v4096_v49, %v4095_v23 }
 0x8a9   : > { %v4109_v53 = vpack.c.bf16 %v4094_v7, %v4093_v18  ;;  %v5659_v48 = vpop.f32.mrb[156].mxu1  ;;  %v4135_v7 = vsub.s32 3, %v8056_v62 }
 0x8aa   : > { %v4055_v29 = vadd.f32 %v5659_v48, %v4885_v13  ;;  %v4046_v14 = vpop.f32.mrb[157].mxu1 }
 0x8ab   : > { %v4047_v12 = vadd.f32 %v4885_v13, %v4046_v14  ;;  %v5660_v21 = vpop.f32.mrb[158].mxu1  ;;  %5685 = vmatprep.mubr.bf16.mxu0 %v4109_v53 }
 0x8ac   : > { %v4058_v26 = vadd.f32 %v5660_v21, %v4885_v13  ;;  %v4049_v61 = vpop.f32.mrb[159].mxu1  ;;  %5686 = vmatmul.mubr.bf16.vlgmr.msra.gmra.mrb[184].mxu0 %v4110_v27  ;;  %v4099_v31 = vmax.f32 %v4055_v29, 0.0  ;;  %v8370_v27 = vrot.slane %v8060_v40, %v4135_v7 }
 0x8ad   : > { %v4050_v54 = vadd.f32 %v4885_v13, %v4049_v61  ;;  %v4097_v46 = vmax.f32 %v4047_v12, 0.0 }
 0x8ae   : > { %v4100_v33 = vmax.f32 %v4058_v26, 0.0 }
 0x8af   : > { %v4098_v55 = vmax.f32 %v4050_v54, 0.0 }
 0x8b0   : > { %v4112_v58 = vpack.c.bf16 %v4100_v33, %v4099_v31 }
 0x8b1   : > { %v4111_v25 = vpack.c.bf16 %v4098_v55, %v4097_v46  ;;  %v5663_v44 = vpop.f32.mrb[160].mxu1 }
 0x8b2   : > { %v4071_v22 = vadd.f32 %v5663_v44, %v4885_v13  ;;  %v4062_v5 = vpop.f32.mrb[161].mxu1 }
 0x8b3   : > { %v4063_v39 = vadd.f32 %v4885_v13, %v4062_v5  ;;  %v5664_v60 = vpop.f32.mrb[162].mxu1  ;;  %5689 = vmatprep.mubr.bf16.mxu0 %v4111_v25 }
 0x8b4   : > { %v4074_v8 = vadd.f32 %v5664_v60, %v4885_v13  ;;  %v4065_v1 = vpop.f32.mrb[163].mxu1  ;;  %5690 = vmatmul.mubr.bf16.gmra.mrb[188].mxu0 %v4112_v58  ;;  %v4103_v17 = vmax.f32 %v4071_v22, 0.0 }
 0x8b5   : > { %v4066_v19 = vadd.f32 %v4885_v13, %v4065_v1  ;;  %v4101_v36 = vmax.f32 %v4063_v39, 0.0 }
 0x8b6   : > { %v4104_v32 = vmax.f32 %v4074_v8, 0.0 }
 0x8b7   : > { %v4102_v24 = vmax.f32 %v4066_v19, 0.0 }
 0x8b8   : > { %v4114_v15 = vpack.c.bf16 %v4104_v32, %v4103_v17 }
 0x8b9   : > { %v4113_v42 = vpack.c.bf16 %v4102_v24, %v4101_v36 }
 0x8ba   : > { %v5667_v16 = vpop.f32.mrb[164].mxu1 }
 0x8bb   : > { %v4087_v52 = vadd.f32 %v5667_v16, %v4885_v13  ;;  %v4078_v57 = vpop.f32.mrb[165].mxu1  ;;  %5693 = vmatprep.mubr.bf16.mxu0 %v4113_v42 }
 0x8bc   : > { %v4079_v59 = vadd.f32 %v4885_v13, %v4078_v57  ;;  %v5668_v50 = vpop.f32.mrb[166].mxu1  ;;  %5694 = vmatmul.mubr.bf16.gmra.mrb[192].mxu0 %v4114_v15 }
 0x8bd   : > { %v4090_v43 = vadd.f32 %v5668_v50, %v4885_v13  ;;  %v4081_v10 = vpop.f32.mrb[167].mxu1  ;;  %v4107_v37 = vmax.f32 %v4087_v52, 0.0 }
 0x8be   : > { %v4082_v51 = vadd.f32 %v4885_v13, %v4081_v10  ;;  %v4105_v34 = vmax.f32 %v4079_v59, 0.0 }
 0x8bf   : > { %v4108_v47 = vmax.f32 %v4090_v43, 0.0 }
 0x8c0   : > { %v4106_v23 = vmax.f32 %v4082_v51, 0.0 }
 0x8c1   : > { %v4116_v49 = vpack.c.bf16 %v4108_v47, %v4107_v37 }
 0x8c2   : > { %v4115_v18 = vpack.c.bf16 %v4106_v23, %v4105_v34 }
 0x8c4   : > { %5697 = vmatprep.mubr.bf16.mxu0 %v4115_v18 }
 0x8c5   : > { %5698 = vmatmul.mubr.bf16.gmra.mrb[196].mxu0 %v4116_v49 }
 0x97f   : > { %v5687_v53 = vpop.f32.mrb[184].mxu0 }
 0x980   : > { %v4228_v48 = vadd.f32 %v5687_v53, %v8370_v27  ;;  %v4219_v29 = vpop.f32.mrb[185].mxu0 }
 0x981   : > { %v4220_v14 = vadd.f32 %v4219_v29, %v8370_v27  ;;  %v5688_v13 = vpop.f32.mrb[186].mxu0 }
 0x982   : > { %v8375_v12 = vadd.f32 %v4228_v48, %v8276_v30  ;;  %v4231_v21 = vadd.f32 %v5688_v13, %v8370_v27  ;;  %v4222_v26 = vpop.f32.mrb[187].mxu0 }
 0x983   : > { %v4223_v61 = vadd.f32 %v4222_v26, %v8370_v27  ;;  %v8380_v54 = vadd.f32 %v4220_v14, %v8263_v28 }
 0x984   : > { %v8383_v40 = vadd.f32 %v4231_v21, %v8279_v35  ;;  %v4304_v31 = vsel %vm3554_vm5, %v8375_v12, 0.0 }
 0x985   : > { %4305 = vadd.xlane.f32.xlu1 %v4304_v31  ;;  %v8388_v33 = vadd.f32 %v4223_v61, %v8266_v2  ;;  %v4298_v28 = vsel %vm3554_vm5, %v8380_v54, 0.0 }
 0x986   : > { %v4307_v30 = vsel %vm3554_vm5, %v8383_v40, 0.0 }
 0x987   : > { %4308 = vadd.xlane.f32.xlu0 %v4307_v30  ;;  %v5691_v46 = vpop.f32.mrb[188].mxu0  ;;  %v4301_v5 = vsel %vm3554_vm5, %v8388_v33, 0.0 }
 0x988   : > { %v4244_v55 = vadd.f32 %v5691_v46, %v8370_v27  ;;  %v4235_v58 = vpop.f32.mrb[189].mxu0 }
 0x989   : > { %v4236_v35 = vadd.f32 %v4235_v58, %v8370_v27  ;;  %4299 = vadd.xlane.f32.xlu1 %v4298_v28  ;;  %v5692_v25 = vpop.f32.mrb[190].mxu0 }
 0x98a   : > { %v8397_v44 = vadd.f32 %v4244_v55, %v8301_v41  ;;  %v4247_v2 = vadd.f32 %v5692_v25, %v8370_v27  ;;  %v4238_v22 = vpop.f32.mrb[191].mxu0 }
 0x98b   : > { %v4239_v39 = vadd.f32 %v4238_v22, %v8370_v27  ;;  %4302 = vadd.xlane.f32.xlu0 %v4301_v5  ;;  %v8404_v60 = vadd.f32 %v4236_v35, %v8292_v9 }
 0x98c   : > { %v8407_v8 = vadd.f32 %v4247_v2, %v8306_v6  ;;  %v4316_v1 = vsel %vm3554_vm5, %v8397_v44, 0.0 }
 0x98d   : > { %4317 = vadd.xlane.f32.xlu1 %v4316_v1  ;;  %v8412_v41 = vadd.f32 %v4239_v39, %v8295_v38  ;;  %v4310_v9 = vsel %vm3554_vm5, %v8404_v60, 0.0 }
 0x98e   : > { %v4319_v19 = vsel %vm3554_vm5, %v8407_v8, 0.0 }
 0x98f   : > { %4320 = vadd.xlane.f32.xlu0 %v4319_v19  ;;  %v5695_v17 = vpop.f32.mrb[192].mxu0  ;;  %v4313_v16 = vsel %vm3554_vm5, %v8412_v41, 0.0 }
 0x990   : > { %v4260_v32 = vadd.f32 %v5695_v17, %v8370_v27  ;;  %v4251_v36 = vpop.f32.mrb[193].mxu0 }
 0x991   : > { %v4252_v6 = vadd.f32 %v4251_v36, %v8370_v27  ;;  %4311 = vadd.xlane.f32.xlu1 %v4310_v9  ;;  %v5696_v24 = vpop.f32.mrb[194].mxu0 }
 0x992   : > { %v8421_v15 = vadd.f32 %v4260_v32, %v8328_v3  ;;  %v4263_v38 = vadd.f32 %v5696_v24, %v8370_v27  ;;  %v4254_v42 = vpop.f32.mrb[195].mxu0 }
 0x993   : > { %v4255_v52 = vadd.f32 %v4254_v42, %v8370_v27  ;;  %4314 = vadd.xlane.f32.xlu0 %v4313_v16  ;;  %v8428_v57 = vadd.f32 %v4252_v6, %v8316_v56 }
 0x994   : > { %v8431_v59 = vadd.f32 %v4263_v38, %v8331_v63  ;;  %v4328_v50 = vsel %vm3554_vm5, %v8421_v15, 0.0 }
 0x995   : > { %4329 = vadd.xlane.f32.xlu1 %v4328_v50  ;;  %v8436_v3 = vadd.f32 %v4255_v52, %v8319_v20  ;;  %v4322_v51 = vsel %vm3554_vm5, %v8428_v57, 0.0 }
 0x996   : > { %v4331_v43 = vsel %vm3554_vm5, %v8431_v59, 0.0 }
 0x997   : > { %4332 = vadd.xlane.f32.xlu0 %v4331_v43  ;;  %v4325_v34 = vsel %vm3554_vm5, %v8436_v3, 0.0 }
 0x998   : > { %v5699_v10 = vpop.f32.mrb[196].mxu0 }
 0x999   : > { %4323 = vadd.xlane.f32.xlu1 %v4322_v51  ;;  %v4267_v56 = vpop.f32.mrb[197].mxu0  ;;  %v4276_v63 = vadd.f32 %v5699_v10, %v8370_v27 }
 0x99a   : > { %v4268_v37 = vadd.f32 %v4267_v56, %v8370_v27  ;;  %v5700_v47 = vpop.f32.mrb[198].mxu0 }
 0x99b   : > { %4326 = vadd.xlane.f32.xlu0 %v4325_v34  ;;  %v4270_v20 = vpop.f32.mrb[199].mxu0  ;;  %v4279_v49 = vadd.f32 %v5700_v47, %v8370_v27  ;;  %v8452_v7 = vadd.f32 %v4276_v63, %v8353_v11 }
 0x99c   : > { %v8447_v23 = vadd.f32 %v4268_v37, %v8342_v45  ;;  %v4271_v18 = vadd.f32 %v4270_v20, %v8370_v27 }
 0x99d   : > { %v8460_v29 = vadd.f32 %v4279_v49, %v8356_v4  ;;  %v4340_v27 = vsel %vm3554_vm5, %v8452_v7, 0.0 }
 0x99e   : > { %v8455_v53 = vadd.f32 %v4271_v18, %v8345_v0  ;;  %v4334_v48 = vsel %vm3554_vm5, %v8447_v23, 0.0 }
 0x99f   : > { %4335 = vadd.xlane.f32.xlu1 %v4334_v48  ;;  %v4343_v11 = vsel %vm3554_vm5, %v8460_v29, 0.0 }
 0x9a0   : > { %v4337_v45 = vsel %vm3554_vm5, %v8455_v53, 0.0 }
 0x9a1   : > { %4338 = vadd.xlane.f32.xlu0 %v4337_v45 }
 0x9a3   : > { %4341 = vadd.xlane.f32.xlu1 %v4340_v27 }
 0x9a5   : > { %4344 = vadd.xlane.f32.xlu0 %v4343_v11 }
 0xa12   : > { %v4306_v0 = vpop.xlane.xlu1 %4305 }
 0xa13   : > { %v4348_v14 = vmul.f32 0.03125, %v4306_v0 }
 0xa14   : > { %v4309_v13 = vpop.xlane.xlu0 %4308 }
 0xa15   : > { %v8469_v21 = vsub.f32 %v8375_v12, %v4348_v14  ;;  %v4349_v4 = vmul.f32 0.03125, %v4309_v13 }
 0xa16   : > { %v4300_v26 = vpop.xlane.xlu1 %4299 }
 0xa17   : > { %v8472_v61 = vsub.f32 %v8383_v40, %v4349_v4  ;;  %v4346_v31 = vmul.f32 0.03125, %v4300_v26  ;;  %v4380_v30 = vmul.f32 %v8469_v21, %v8469_v21 }
 0xa18   : > { %v4303_v46 = vpop.xlane.xlu0 %4302 }
 0xa19   : > { %v8477_v55 = vsub.f32 %v8380_v54, %v4346_v31  ;;  %v4347_v58 = vmul.f32 0.03125, %v4303_v46  ;;  %v4400_v28 = vsel %vm3554_vm5, %v4380_v30, 0.0  ;;  %v4381_v12 = vmul.f32 %v8472_v61, %v8472_v61 }
 0xa1a   : > { %4401 = vadd.xlane.f32.xlu1 %v4400_v28  ;;  %v4318_v35 = vpop.xlane.xlu1 %4317 }
 0xa1b   : > { %v8483_v25 = vsub.f32 %v8388_v33, %v4347_v58  ;;  %v4352_v40 = vmul.f32 0.03125, %v4318_v35  ;;  %v4403_v2 = vsel %vm3554_vm5, %v4381_v12, 0.0  ;;  %v4378_v22 = vmul.f32 %v8477_v55, %v8477_v55 }
 0xa1c   : > { %v4321_v5 = vpop.xlane.xlu0 %4320  ;;  %4404 = vadd.xlane.f32.xlu0 %v4403_v2 }
 0xa1d   : > { %v8489_v54 = vsub.f32 %v8397_v44, %v4352_v40  ;;  %v4353_v39 = vmul.f32 0.03125, %v4321_v5  ;;  %v4394_v1 = vsel %vm3554_vm5, %v4378_v22, 0.0  ;;  %v4379_v19 = vmul.f32 %v8483_v25, %v8483_v25 }
 0xa1e   : > { %4395 = vadd.xlane.f32.xlu1 %v4394_v1  ;;  %v4312_v33 = vpop.xlane.xlu1 %4311 }
 0xa1f   : > { %v8495_v17 = vsub.f32 %v8407_v8, %v4353_v39  ;;  %v4350_v32 = vmul.f32 0.03125, %v4312_v33  ;;  %v4397_v36 = vsel %vm3554_vm5, %v4379_v19, 0.0  ;;  %v4384_v9 = vmul.f32 %v8489_v54, %v8489_v54 }
 0xa20   : > { %v4315_v6 = vpop.xlane.xlu0 %4314  ;;  %4398 = vadd.xlane.f32.xlu0 %v4397_v36 }
 0xa21   : > { %v8501_v44 = vsub.f32 %v8404_v60, %v4350_v32  ;;  %v4351_v24 = vmul.f32 0.03125, %v4315_v6  ;;  %v4412_v38 = vsel %vm3554_vm5, %v4384_v9, 0.0  ;;  %v4385_v42 = vmul.f32 %v8495_v17, %v8495_v17 }
 0xa22   : > { %4413 = vadd.xlane.f32.xlu1 %v4412_v38  ;;  %v4330_v8 = vpop.xlane.xlu1 %4329 }
 0xa23   : > { %v8507_v16 = vsub.f32 %v8412_v41, %v4351_v24  ;;  %v4356_v52 = vmul.f32 0.03125, %v4330_v8  ;;  %v4415_v50 = vsel %vm3554_vm5, %v4385_v42, 0.0  ;;  %v4382_v43 = vmul.f32 %v8501_v44, %v8501_v44 }
 0xa24   : > { %v4333_v10 = vpop.xlane.xlu0 %4332  ;;  %4416 = vadd.xlane.f32.xlu0 %v4415_v50 }
 0xa25   : > { %v8513_v60 = vsub.f32 %v8421_v15, %v4356_v52  ;;  %v4357_v51 = vmul.f32 0.03125, %v4333_v10  ;;  %v4406_v56 = vsel %vm3554_vm5, %v4382_v43, 0.0  ;;  %v4383_v63 = vmul.f32 %v8507_v16, %v8507_v16 }
 0xa26   : > { %4407 = vadd.xlane.f32.xlu1 %v4406_v56  ;;  %v4324_v41 = vpop.xlane.xlu1 %4323  ;;  %v4508_v10 = vsub.s32 4, %v8056_v62 }
 0xa27   : > { %v8519_v37 = vsub.f32 %v8431_v59, %v4357_v51  ;;  %v4354_v47 = vmul.f32 0.03125, %v4324_v41  ;;  %v4409_v34 = vsel %vm3554_vm5, %v4383_v63, 0.0  ;;  %v4388_v20 = vmul.f32 %v8513_v60, %v8513_v60 }
 0xa28   : > { %v4327_v49 = vpop.xlane.xlu0 %4326  ;;  %4410 = vadd.xlane.f32.xlu0 %v4409_v34  ;;  %v4528_v41 = vsub.s32 5, %v8056_v62 }
 0xa29   : > { %v8525_v15 = vsub.f32 %v8428_v57, %v4354_v47  ;;  %v4355_v18 = vmul.f32 0.03125, %v4327_v49  ;;  %v4424_v48 = vsel %vm3554_vm5, %v4388_v20, 0.0  ;;  %v4389_v45 = vmul.f32 %v8519_v37, %v8519_v37  ;;  %v6254_v49 = vld [vmem:[%s6425_s26] sm:$0x3f] }
 0xa2a   : > { %4425 = vadd.xlane.f32.xlu1 %v4424_v48 }
 0xa2b   : > { %v8531_v59 = vsub.f32 %v8436_v3, %v4355_v18  ;;  %v4427_v27 = vsel %vm3554_vm5, %v4389_v45, 0.0  ;;  %v4386_v11 = vmul.f32 %v8525_v15, %v8525_v15  ;;  %v8567_v18 = vrot.slane %v6254_v49, %v4508_v10 }
 0xa2c   : > { %4428 = vadd.xlane.f32.xlu0 %v4427_v27  ;;  %v4336_v0 = vpop.xlane.xlu1 %4335 }
 0xa2d   : > { %v4358_v14 = vmul.f32 0.03125, %v4336_v0  ;;  %v4418_v57 = vsel %vm3554_vm5, %v4386_v11, 0.0  ;;  %v4387_v13 = vmul.f32 %v8531_v59, %v8531_v59  ;;  %v8569_v0 = vrot.slane %v6254_v49, %v4528_v41 }
 0xa2e   : > { %v4339_v4 = vpop.xlane.xlu0 %4338  ;;  %4419 = vadd.xlane.f32.xlu1 %v4418_v57 }
 0xa2f   : > { %v8540_v26 = vsub.f32 %v8447_v23, %v4358_v14  ;;  %v4359_v3 = vmul.f32 0.03125, %v4339_v4  ;;  %v4421_v31 = vsel %vm3554_vm5, %v4387_v13, 0.0 }
 0xa30   : > { %4422 = vadd.xlane.f32.xlu0 %v4421_v31  ;;  %v4342_v30 = vpop.xlane.xlu1 %4341 }
 0xa31   : > { %v8544_v46 = vsub.f32 %v8455_v53, %v4359_v3  ;;  %v4360_v58 = vmul.f32 0.03125, %v4342_v30  ;;  %v4390_v28 = vmul.f32 %v8540_v26, %v8540_v26 }
 0xa32   : > { %v4345_v12 = vpop.xlane.xlu0 %4344 }
 0xa33   : > { %v8549_v35 = vsub.f32 %v8452_v7, %v4360_v58  ;;  %v4361_v40 = vmul.f32 0.03125, %v4345_v12  ;;  %v4430_v23 = vsel %vm3554_vm5, %v4390_v28, 0.0  ;;  %v4391_v2 = vmul.f32 %v8544_v46, %v8544_v46 }
 0xa34   : > { %4431 = vadd.xlane.f32.xlu1 %v4430_v23 }
 0xa35   : > { %v8555_v22 = vsub.f32 %v8460_v29, %v4361_v40  ;;  %v4433_v53 = vsel %vm3554_vm5, %v4391_v2, 0.0  ;;  %v4392_v5 = vmul.f32 %v8549_v35, %v8549_v35 }
 0xa36   : > { %4434 = vadd.xlane.f32.xlu0 %v4433_v53 }
 0xa37   : > { %v4436_v39 = vsel %vm3554_vm5, %v4392_v5, 0.0  ;;  %v4393_v7 = vmul.f32 %v8555_v22, %v8555_v22 }
 0xa38   : > { %4437 = vadd.xlane.f32.xlu1 %v4436_v39 }
 0xa39   : > { %v4439_v1 = vsel %vm3554_vm5, %v4393_v7, 0.0 }
 0xa3a   : > { %4440 = vadd.xlane.f32.xlu0 %v4439_v1 }
 0xaa7   : > { %v4402_v19 = vpop.xlane.xlu1 %4401 }
 0xaa8   : > { %v4444_v33 = vmul.f32 0.03125, %v4402_v19 }
 0xaa9   : > { %v4405_v32 = vpop.xlane.xlu0 %4404 }
 0xaaa   : > { %v4460_v29 = vadd.f32 1e-05, %v4444_v33  ;;  %v4445_v36 = vmul.f32 0.03125, %v4405_v32 }
 0xaab   : > { %v4396_v9 = vpop.xlane.xlu1 %4395 }
 0xaac   : > { %6206 = vrsqrt.f32 %v4460_v29  ;;  %v4461_v6 = vadd.f32 1e-05, %v4445_v36  ;;  %v4442_v24 = vmul.f32 0.03125, %v4396_v9 }
 0xaad   : > { %v4399_v38 = vpop.xlane.xlu0 %4398 }
 0xaae   : > { %6208 = vrsqrt.f32 %v4461_v6  ;;  %v4458_v42 = vadd.f32 1e-05, %v4442_v24  ;;  %v4443_v8 = vmul.f32 0.03125, %v4399_v38 }
 0xaaf   : > { %v4414_v52 = vpop.xlane.xlu1 %4413 }
 0xab0   : > { %6210 = vrsqrt.f32 %v4458_v42  ;;  %v4459_v50 = vadd.f32 1e-05, %v4443_v8  ;;  %v4448_v43 = vmul.f32 0.03125, %v4414_v52 }
 0xab1   : > { %v4417_v51 = vpop.xlane.xlu0 %4416 }
 0xab2   : > { %6212 = vrsqrt.f32 %v4459_v50  ;;  %v4464_v56 = vadd.f32 1e-05, %v4448_v43  ;;  %v4449_v63 = vmul.f32 0.03125, %v4417_v51 }
 0xab3   : > { %v4408_v47 = vpop.xlane.xlu1 %4407 }
 0xab4   : > { %6214 = vrsqrt.f32 %v4464_v56  ;;  %v4465_v34 = vadd.f32 1e-05, %v4449_v63  ;;  %v4446_v20 = vmul.f32 0.03125, %v4408_v47 }
 0xab5   : > { %v4411_v48 = vpop.xlane.xlu0 %4410 }
 0xab6   : > { %v6207_v45 = vpop.eup %6206  ;;  %6216 = vrsqrt.f32 %v4465_v34  ;;  %v4462_v27 = vadd.f32 1e-05, %v4446_v20  ;;  %v4447_v11 = vmul.f32 0.03125, %v4411_v48 }
 0xab7   : > { %v4492_v14 = vmul.f32 %v6207_v45, %v8469_v21  ;;  %v4426_v57 = vpop.xlane.xlu1 %4425 }
 0xab8   : > { %v6209_v13 = vpop.eup %6208  ;;  %6218 = vrsqrt.f32 %v4462_v27  ;;  %v4463_v62 = vadd.f32 1e-05, %v4447_v11  ;;  %v4452_v4 = vmul.f32 0.03125, %v4426_v57 }
 0xab9   : > { %v4512_v3 = vmul.f32 %v8567_v18, %v4492_v14  ;;  %v4493_v31 = vmul.f32 %v6209_v13, %v8472_v61  ;;  %v4429_v30 = vpop.xlane.xlu0 %4428 }
 0xaba   : > { %v6211_v58 = vpop.eup %6210  ;;  %6220 = vrsqrt.f32 %v4463_v62  ;;  %v4468_v28 = vadd.f32 1e-05, %v4452_v4  ;;  %v4453_v12 = vmul.f32 0.03125, %v4429_v30 }
 0xabb   : > { %v8575_v40 = vadd.f32 %v8569_v0, %v4512_v3  ;;  %v4513_v23 = vmul.f32 %v8567_v18, %v4493_v31  ;;  %v4490_v21 = vmul.f32 %v6211_v58, %v8477_v55  ;;  %v4420_v2 = vpop.xlane.xlu1 %4419 }
 0xabc   : > { %v6213_v53 = vpop.eup %6212  ;;  %6222 = vrsqrt.f32 %v4468_v28  ;;  %v4469_v5 = vadd.f32 1e-05, %v4453_v12  ;;  %v4450_v39 = vmul.f32 0.03125, %v4420_v2 }
 0xabd   : > { %4548 = vst.msk [vmem:[#allocation2 + $0x10] sm:$0xff] %vm3554_vm5, %v8575_v40  ;;  %v8582_v61 = vadd.f32 %v8569_v0, %v4513_v23  ;;  %v4510_v7 = vmul.f32 %v8567_v18, %v4490_v21  ;;  %v4491_v1 = vmul.f32 %v6213_v53, %v8483_v25  ;;  %v4423_v19 = vpop.xlane.xlu0 %4422  ;;  %4568 = vst.msk [vmem:[%s6430_s24 + $0x10] sm:$0xff] (!%p4904_p8), %vm3554_vm5, %v8575_v40 }
 0xabe   : > { %v6215_v33 = vpop.eup %6214  ;;  %6224 = vrsqrt.f32 %v4469_v5  ;;  %v4466_v32 = vadd.f32 1e-05, %v4450_v39  ;;  %v4451_v55 = vmul.f32 0.03125, %v4423_v19 }
 0xabf   : > { %4549 = vst.msk [vmem:[#allocation2 + $0x18] sm:$0xff] %vm3554_vm5, %v8582_v61  ;;  %v8589_v29 = vadd.f32 %v8569_v0, %v4510_v7  ;;  %v4511_v36 = vmul.f32 %v8567_v18, %v4491_v1  ;;  %v4496_v9 = vmul.f32 %v6215_v33, %v8489_v54  ;;  %4569 = vst.msk [vmem:[%s6430_s24 + $0x18] sm:$0xff] (!%p4904_p8), %vm3554_vm5, %v8582_v61 }
 0xac0   : > { %v6217_v6 = vpop.eup %6216  ;;  %6226 = vrsqrt.f32 %v4466_v32  ;;  %v4467_v24 = vadd.f32 1e-05, %v4451_v55 }
 0xac1   : > { %4546 = vst.msk [vmem:[#allocation2] sm:$0xff] %vm3554_vm5, %v8589_v29  ;;  %v8596_v25 = vadd.f32 %v8569_v0, %v4511_v36  ;;  %v4516_v38 = vmul.f32 %v8567_v18, %v4496_v9  ;;  %v4497_v42 = vmul.f32 %v6217_v6, %v8495_v17  ;;  %v4432_v8 = vpop.xlane.xlu1 %4431  ;;  %4566 = vst.msk [vmem:[%s6430_s24] sm:$0xff] (!%p4904_p8), %vm3554_vm5, %v8589_v29 }
 0xac2   : > { %v6219_v52 = vpop.eup %6218  ;;  %6228 = vrsqrt.f32 %v4467_v24  ;;  %v4454_v50 = vmul.f32 0.03125, %v4432_v8 }
 0xac3   : > { %4547 = vst.msk [vmem:[#allocation2 + $0x8] sm:$0xff] %vm3554_vm5, %v8596_v25  ;;  %v8603_v54 = vadd.f32 %v8569_v0, %v4516_v38  ;;  %v4517_v43 = vmul.f32 %v8567_v18, %v4497_v42  ;;  %v4494_v10 = vmul.f32 %v6219_v52, %v8501_v44  ;;  %v4435_v51 = vpop.xlane.xlu0 %4434  ;;  %4567 = vst.msk [vmem:[%s6430_s24 + $0x8] sm:$0xff] (!%p4904_p8), %vm3554_vm5, %v8596_v25 }
 0xac4   : > { %v6221_v56 = vpop.eup %6220  ;;  %v4470_v63 = vadd.f32 1e-05, %v4454_v50  ;;  %v4455_v41 = vmul.f32 0.03125, %v4435_v51 }
 0xac5   : > { %4552 = vst.msk [vmem:[#allocation2 + $0x30] sm:$0xff] %vm3554_vm5, %v8603_v54  ;;  %v8610_v17 = vadd.f32 %v8569_v0, %v4517_v43  ;;  %v4514_v47 = vmul.f32 %v8567_v18, %v4494_v10  ;;  %v4495_v34 = vmul.f32 %v6221_v56, %v8507_v16  ;;  %v4438_v20 = vpop.xlane.xlu1 %4437  ;;  %4572 = vst.msk [vmem:[%s6430_s24 + $0x30] sm:$0xff] (!%p4904_p8), %vm3554_vm5, %v8603_v54 }
 0xac6   : > { %v6223_v49 = vpop.eup %6222  ;;  %6230 = vrsqrt.f32 %v4470_v63  ;;  %v4471_v48 = vadd.f32 1e-05, %v4455_v41  ;;  %v4456_v45 = vmul.f32 0.03125, %v4438_v20 }
 0xac7   : > { %4553 = vst.msk [vmem:[#allocation2 + $0x38] sm:$0xff] %vm3554_vm5, %v8610_v17  ;;  %v4534_v44 = vadd.f32 %v8569_v0, %v4514_v47  ;;  %v4515_v27 = vmul.f32 %v8567_v18, %v4495_v34  ;;  %v4500_v11 = vmul.f32 %v6223_v49, %v8513_v60  ;;  %v4441_v14 = vpop.xlane.xlu0 %4440  ;;  %4573 = vst.msk [vmem:[%s6430_s24 + $0x38] sm:$0xff] (!%p4904_p8), %vm3554_vm5, %v8610_v17 }
 0xac8   : > { %v6225_v57 = vpop.eup %6224  ;;  %6232 = vrsqrt.f32 %v4471_v48  ;;  %v4472_v13 = vadd.f32 1e-05, %v4456_v45  ;;  %v4457_v62 = vmul.f32 0.03125, %v4441_v14 }
 0xac9   : > { %4550 = vst.msk [vmem:[#allocation2 + $0x20] sm:$0xff] %vm3554_vm5, %v4534_v44  ;;  %v4535_v16 = vadd.f32 %v8569_v0, %v4515_v27  ;;  %v4520_v4 = vmul.f32 %v8567_v18, %v4500_v11  ;;  %v4501_v3 = vmul.f32 %v6225_v57, %v8519_v37  ;;  %4570 = vst.msk [vmem:[%s6430_s24 + $0x20] sm:$0xff] (!%p4904_p8), %vm3554_vm5, %v4534_v44 }
 0xaca   : > { %v6227_v31 = vpop.eup %6226  ;;  %6234 = vrsqrt.f32 %v4472_v13  ;;  %v4473_v30 = vadd.f32 1e-05, %v4457_v62 }
 0xacb   : > { %4551 = vst.msk [vmem:[#allocation2 + $0x28] sm:$0xff] %vm3554_vm5, %v4535_v16  ;;  %v4540_v60 = vadd.f32 %v8569_v0, %v4520_v4  ;;  %v4521_v58 = vmul.f32 %v8567_v18, %v4501_v3  ;;  %v4498_v28 = vmul.f32 %v6227_v31, %v8525_v15  ;;  %4571 = vst.msk [vmem:[%s6430_s24 + $0x28] sm:$0xff] (!%p4904_p8), %vm3554_vm5, %v4535_v16 }
 0xacc   : > { %v6229_v12 = vpop.eup %6228  ;;  %6236 = vrsqrt.f32 %v4473_v30 }
 0xacd   : > { %4556 = vst.msk [vmem:[#allocation2 + $0x50] sm:$0xff] %vm3554_vm5, %v4540_v60  ;;  %v4541_v23 = vadd.f32 %v8569_v0, %v4521_v58  ;;  %v4518_v21 = vmul.f32 %v8567_v18, %v4498_v28  ;;  %v4499_v37 = vmul.f32 %v6229_v12, %v8531_v59  ;;  %4576 = vst.msk [vmem:[%s6430_s24 + $0x50] sm:$0xff] (!%p4904_p8), %vm3554_vm5, %v4540_v60 }
 0xacf   : > { %4557 = vst.msk [vmem:[#allocation2 + $0x58] sm:$0xff] %vm3554_vm5, %v4541_v23  ;;  %v4538_v2 = vadd.f32 %v8569_v0, %v4518_v21  ;;  %v4519_v53 = vmul.f32 %v8567_v18, %v4499_v37  ;;  %4577 = vst.msk [vmem:[%s6430_s24 + $0x58] sm:$0xff] (!%p4904_p8), %vm3554_vm5, %v4541_v23 }
 0xad0   : > { %v6231_v5 = vpop.eup %6230 }
 0xad1   : > { %4554 = vst.msk [vmem:[#allocation2 + $0x40] sm:$0xff] %vm3554_vm5, %v4538_v2  ;;  %v4539_v15 = vadd.f32 %v8569_v0, %v4519_v53  ;;  %v4502_v39 = vmul.f32 %v6231_v5, %v8540_v26  ;;  %4574 = vst.msk [vmem:[%s6430_s24 + $0x40] sm:$0xff] (!%p4904_p8), %vm3554_vm5, %v4538_v2 }
 0xad2   : > { %v6233_v7 = vpop.eup %6232 }
 0xad3   : > { %4555 = vst.msk [vmem:[#allocation2 + $0x48] sm:$0xff] %vm3554_vm5, %v4539_v15  ;;  %v4522_v1 = vmul.f32 %v8567_v18, %v4502_v39  ;;  %v4503_v59 = vmul.f32 %v6233_v7, %v8544_v46  ;;  %4575 = vst.msk [vmem:[%s6430_s24 + $0x48] sm:$0xff] (!%p4904_p8), %vm3554_vm5, %v4539_v15 }
 0xad4   : > { %v6235_v19 = vpop.eup %6234 }
 0xad5   : > { %v4542_v33 = vadd.f32 %v8569_v0, %v4522_v1  ;;  %v4523_v32 = vmul.f32 %v8567_v18, %v4503_v59  ;;  %v4504_v55 = vmul.f32 %v6235_v19, %v8549_v35 }
 0xad6   : > { %v6237_v36 = vpop.eup %6236 }
 0xad7   : > { %4558 = vst.msk [vmem:[#allocation2 + $0x60] sm:$0xff] %vm3554_vm5, %v4542_v33  ;;  %v4543_v9 = vadd.f32 %v8569_v0, %v4523_v32  ;;  %v4524_v26 = vmul.f32 %v8567_v18, %v4504_v55  ;;  %v4505_v6 = vmul.f32 %v6237_v36, %v8555_v22  ;;  %4565 = sbr.rel (%p4904_p8) target bundleno = 2782 (0xade), region = 60  ;;  %4578 = vst.msk [vmem:[%s6430_s24 + $0x60] sm:$0xff] (!%p4904_p8), %vm3554_vm5, %v4542_v33 }
 0xad9   : > { %4559 = vst.msk [vmem:[#allocation2 + $0x68] sm:$0xff] %vm3554_vm5, %v4543_v9  ;;  %v4544_v46 = vadd.f32 %v8569_v0, %v4524_v26  ;;  %v4525_v24 = vmul.f32 %v8567_v18, %v4505_v6  ;;  %4579 = vst.msk [vmem:[%s6430_s24 + $0x68] sm:$0xff] (!%p4904_p8), %vm3554_vm5, %v4543_v9 }
 0xadb   : > { %4560 = vst.msk [vmem:[#allocation2 + $0x70] sm:$0xff] %vm3554_vm5, %v4544_v46  ;;  %v4545_v38 = vadd.f32 %v8569_v0, %v4525_v24  ;;  %4580 = vst.msk [vmem:[%s6430_s24 + $0x70] sm:$0xff] (!%p4904_p8), %vm3554_vm5, %v4544_v46 }
 0xadd   : > { %4561 = vst.msk [vmem:[#allocation2 + $0x78] sm:$0xff] %vm3554_vm5, %v4545_v38  ;;  %4581 = vst.msk [vmem:[%s6430_s24 + $0x78] sm:$0xff] (!%p4904_p8), %vm3554_vm5, %v4545_v38 }
 0xade PF: > { %s18_s9 = sadd.s32 1, %s6293_s9   ;;  %s8933_s27 = sld [smem:[#allocation3_spill]] }
 0xadf   : > { %p15_p9 = scmp.ge.s32.totalorder %s18_s9, 6   ;;  %s8934_s28 = sld [smem:[#allocation4_spill]] }
 0xae0   : > { %s8935_s29 = sld [smem:[#allocation5_spill]]  ;;  %s8936_s30 = sld [smem:[#allocation6_spill]] }
 0xae1   :  { %17 = sbr.rel (!%p15_p9) target bundleno = 3 (0x3), region = 113 }

</bundles_post_ra>
